<compile_context>
chip_gen: v5e
topology: v5e:2x2
jax: 0.10.0
libtpu: 0.0.40
codegen_flags: <defaults>
</compile_context>

<pallas_src>
import functools

import jax
import jax.numpy as jnp
from jax import lax
from jax.experimental import pallas as pl
from jax.experimental.pallas import tpu as pltpu


# ----------------------------------------------------------------------------
# Pallas kernel: whole encoder RNN (all layers, both directions), one call.
# Gate order follows PyTorch: r, z, n (stacked along the last weight dim).
# ----------------------------------------------------------------------------
def _make_encoder_kernel(n_layers, seq_len, batch, hid):
    T, B, H = seq_len, batch, hid

    def gru_cell(xp_t, h, whh, bhh):
        # Single fused (B,H) @ (H,3H) hidden projection per step.
        hh = jnp.dot(h, whh, preferred_element_type=jnp.float32) + bhh
        r = jax.nn.sigmoid(xp_t[:, 0:H] + hh[:, 0:H])
        z = jax.nn.sigmoid(xp_t[:, H:2 * H] + hh[:, H:2 * H])
        n = jnp.tanh(xp_t[:, 2 * H:3 * H] + r * hh[:, 2 * H:3 * H])
        return (1.0 - z) * n + z * h

    def kernel(x_ref, *refs):
        """Refs:
          x_ref     : (T*B, E)        time-major flattened embeddings
          refs[:4L] : per layer l -> wih (2,Din,3H), whh (2,H,3H),
                                     bih (2,1,3H),   bhh (2,1,3H)
          refs[4L]   = out_ref   : (T*B, 2H)  time-major outputs (also used
                                   as the inter-layer activation buffer)
          refs[4L+1] = hlast_ref : (2L, B, H) final hidden per (layer, dir)
        """
        w_refs = refs[:4 * n_layers]
        out_ref = refs[4 * n_layers]
        hlast_ref = refs[4 * n_layers + 1]

        x = x_ref[...]                                        # (T*B, Din)
        for l in range(n_layers):
            wih_ref, whh_ref, bih_ref, bhh_ref = w_refs[4 * l:4 * l + 4]

            # All-timestep input projections: one large MXU matmul per
            # direction, bias folded in once.
            xp_f = jnp.dot(x, wih_ref[0],
                           preferred_element_type=jnp.float32) + bih_ref[0]
            xp_b = jnp.dot(x, wih_ref[1],
                           preferred_element_type=jnp.float32) + bih_ref[1]

            # Hoist hidden weights / biases out of the time loop.
            whh_f, whh_b = whh_ref[0], whh_ref[1]
            bhh_f, bhh_b = bhh_ref[0], bhh_ref[1]

            h_f = jnp.zeros((B, H), jnp.float32)   # PyTorch default h0 = 0
            h_b = jnp.zeros((B, H), jnp.float32)

            # Statically unrolled time loop; h stays in vregs.  The backward
            # direction walks the sequence in reverse via index arithmetic.
            for t in range(T):
                rt = T - 1 - t
                h_f = gru_cell(xp_f[t * B:(t + 1) * B], h_f, whh_f, bhh_f)
                h_b = gru_cell(xp_b[rt * B:(rt + 1) * B], h_b, whh_b, bhh_b)
                out_ref[t * B:(t + 1) * B, 0:H] = h_f
                out_ref[rt * B:(rt + 1) * B, H:2 * H] = h_b

            hlast_ref[2 * l] = h_f          # PyTorch order: [l0_f, l0_b, ...]
            hlast_ref[2 * l + 1] = h_b

            if l + 1 < n_layers:
                # Inter-layer dropout == identity (inference mode).
                x = out_ref[...]            # (T*B, 2H) readback, stays in VMEM

    return kernel


def _full_spec(shape):
    rank = len(shape)
    return pl.BlockSpec(shape, lambda i, _r=rank: (0,) * _r)


# ----------------------------------------------------------------------------
# Encoder forward: embedding gather + one fused Pallas call for the RNN.
# ----------------------------------------------------------------------------
def encoder_forward(tokens, params, n_layers, hid_dim):
    """tokens: (B,S) int32 -> (outputs (B,S,2H), hidden (2*n_layers, B, H))."""
    B, S = tokens.shape
    H = hid_dim

    # Gather directly in time-major order (avoids a float transpose).
    emb_tm = jnp.take(params["embedding"], tokens.T, axis=0)    # (S, B, E)
    # Embedding dropout == identity (inference mode).
    x2d = emb_tm.reshape(S * B, -1)                             # free reshape

    args = [x2d]
    in_specs = [_full_spec(x2d.shape)]
    for l in range(n_layers):
        p = params[f"layer{l}"]
        for name in ("wih", "whh", "bih", "bhh"):
            w = p[name]
            args.append(w)
            in_specs.append(_full_spec(w.shape))

    kernel = _make_encoder_kernel(n_layers, S, B, H)
    out2d, hidden = pl.pallas_call(
        kernel,
        out_shape=(jax.ShapeDtypeStruct((S * B, 2 * H), jnp.float32),
                   jax.ShapeDtypeStruct((2 * n_layers, B, H), jnp.float32)),
        grid_spec=pltpu.PrefetchScalarGridSpec(
            num_scalar_prefetch=0,
            grid=(1,),                                   # single invocation
            in_specs=in_specs,
            out_specs=[_full_spec((S * B, 2 * H)),
                       _full_spec((2 * n_layers, B, H))],
        ),
        compiler_params=pltpu.CompilerParams(
            dimension_semantics=("arbitrary",)),
    )(*args)

    outputs = jnp.transpose(out2d.reshape(S, B, 2 * H), (1, 0, 2))  # (B,S,2H)
    return outputs, hidden


# ----------------------------------------------------------------------------
# Pure-JAX reference (correctness check only).
# ----------------------------------------------------------------------------
def _ref_gru_dir(x_tbd, h0, wih, whh, bih, bhh):
    H = h0.shape[-1]

    def step(h, xt):
        xp = xt @ wih + bih[0]
        hh = h @ whh + bhh[0]
        r = jax.nn.sigmoid(xp[:, :H] + hh[:, :H])
        z = jax.nn.sigmoid(xp[:, H:2 * H] + hh[:, H:2 * H])
        n = jnp.tanh(xp[:, 2 * H:] + r * hh[:, 2 * H:])
        hn = (1.0 - z) * n + z * h
        return hn, hn

    hlast, outs = lax.scan(step, h0, x_tbd)
    return outs, hlast


def _ref_encoder_forward(tokens, params, n_layers, hid_dim):
    B, S = tokens.shape
    emb = jnp.take(params["embedding"], tokens, axis=0)        # (B, S, E)
    layer_in = jnp.transpose(emb, (1, 0, 2))                   # (T, B, E)
    hiddens = []
    for l in range(n_layers):
        p = params[f"layer{l}"]
        dir_outs = []
        for d in range(2):
            xin = layer_in if d == 0 else layer_in[::-1]
            h0 = jnp.zeros((B, hid_dim), jnp.float32)
            out, hlast = _ref_gru_dir(xin, h0, p["wih"][d], p["whh"][d],
                                      p["bih"][d], p["bhh"][d])
            if d == 1:
                out = out[::-1]
            dir_outs.append(out)
            hiddens.append(hlast)
        layer_in = jnp.concatenate(dir_outs, axis=-1)
    return jnp.transpose(layer_in, (1, 0, 2)), jnp.stack(hiddens, axis=0)


# ----------------------------------------------------------------------------
# Deterministic parameter construction (shapes follow nn.Embedding / nn.GRU;
# weights stored transposed and gate-fused: (dir, D_in, 3H) with gates r|z|n).
# ----------------------------------------------------------------------------
def init_params(key, vocab, emb_dim, hid_dim, n_layers):
    params = {}
    key, k = jax.random.split(key)
    params["embedding"] = jax.random.normal(k, (vocab, emb_dim), jnp.float32)
    bound = 1.0 / jnp.sqrt(hid_dim)
    for l in range(n_layers):
        d_in = emb_dim if l == 0 else 2 * hid_dim
        key, k1, k2, k3, k4 = jax.random.split(key, 5)
        params[f"layer{l}"] = {
            "wih": jax.random.uniform(k1, (2, d_in, 3 * hid_dim), jnp.float32,
                                      -bound, bound),
            "whh": jax.random.uniform(k2, (2, hid_dim, 3 * hid_dim),
                                      jnp.float32, -bound, bound),
            "bih": jax.random.uniform(k3, (2, 1, 3 * hid_dim), jnp.float32,
                                      -bound, bound),
            "bhh": jax.random.uniform(k4, (2, 1, 3 * hid_dim), jnp.float32,
                                      -bound, bound),
        }
    return params


if __name__ == "__main__":
    # small, module-consistent shapes
    EN_VOCAB, EMB_DIM, HID_DIM, N_LAYERS = 50, 32, 32, 2
    B, S = 8, 8

    key = jax.random.PRNGKey(0)
    key, kp, kt = jax.random.split(key, 3)
    params = init_params(kp, EN_VOCAB, EMB_DIM, HID_DIM, N_LAYERS)
    tokens = jax.random.randint(kt, (B, S), 0, EN_VOCAB, dtype=jnp.int32)

    fwd = jax.jit(functools.partial(encoder_forward,
                                    n_layers=N_LAYERS, hid_dim=HID_DIM))
    outputs, hidden = fwd(tokens, params)
    jax.block_until_ready((outputs, hidden))

    assert outputs.shape == (B, S, 2 * HID_DIM)
    assert hidden.shape == (N_LAYERS * 2, B, HID_DIM)

    # check against pure-JAX reference
    ref_out, ref_hid = _ref_encoder_forward(tokens, params, N_LAYERS, HID_DIM)
    assert jnp.allclose(outputs, ref_out, atol=1e-5, rtol=1e-5)
    assert jnp.allclose(hidden, ref_hid, atol=1e-5, rtol=1e-5)

    print("KERNEL_OK")
</pallas_src>

<mosaic_0001>
module attributes {stable_mosaic.version = 11 : i64} {
  func.func @kernel(%arg0: i32, %arg1: memref<64x32xf32, #tpu.memory_space<vmem>>, %arg2: memref<2x32x96xf32, #tpu.memory_space<vmem>>, %arg3: memref<2x32x96xf32, #tpu.memory_space<vmem>>, %arg4: memref<2x1x96xf32, #tpu.memory_space<vmem>>, %arg5: memref<2x1x96xf32, #tpu.memory_space<vmem>>, %arg6: memref<2x64x96xf32, #tpu.memory_space<vmem>>, %arg7: memref<2x32x96xf32, #tpu.memory_space<vmem>>, %arg8: memref<2x1x96xf32, #tpu.memory_space<vmem>>, %arg9: memref<2x1x96xf32, #tpu.memory_space<vmem>>, %arg10: memref<64x64xf32, #tpu.memory_space<vmem>>, %arg11: memref<4x8x32xf32, #tpu.memory_space<vmem>>) attributes {dimension_semantics = [#tpu.dimension_semantics<arbitrary>], iteration_bounds = array<i64: 1>, scalar_prefetch = 0 : i64, scratch_operands = 0 : i64, tpu.core_type = #tpu.core_type<tc>, window_params = [{pipeline_mode = #tpu.pipeline_mode<synchronous>, transform_indices = @transform_0, window_bounds = array<i64: 64, 32>}, {pipeline_mode = #tpu.pipeline_mode<synchronous>, transform_indices = @transform_1, window_bounds = array<i64: 2, 32, 96>}, {pipeline_mode = #tpu.pipeline_mode<synchronous>, transform_indices = @transform_2, window_bounds = array<i64: 2, 32, 96>}, {pipeline_mode = #tpu.pipeline_mode<synchronous>, transform_indices = @transform_3, window_bounds = array<i64: 2, 1, 96>}, {pipeline_mode = #tpu.pipeline_mode<synchronous>, transform_indices = @transform_4, window_bounds = array<i64: 2, 1, 96>}, {pipeline_mode = #tpu.pipeline_mode<synchronous>, transform_indices = @transform_5, window_bounds = array<i64: 2, 64, 96>}, {pipeline_mode = #tpu.pipeline_mode<synchronous>, transform_indices = @transform_6, window_bounds = array<i64: 2, 32, 96>}, {pipeline_mode = #tpu.pipeline_mode<synchronous>, transform_indices = @transform_7, window_bounds = array<i64: 2, 1, 96>}, {pipeline_mode = #tpu.pipeline_mode<synchronous>, transform_indices = @transform_8, window_bounds = array<i64: 2, 1, 96>}, {pipeline_mode = #tpu.pipeline_mode<synchronous>, transform_indices = @transform_9, window_bounds = array<i64: 64, 64>}, {pipeline_mode = #tpu.pipeline_mode<synchronous>, transform_indices = @transform_10, window_bounds = array<i64: 4, 8, 32>}]} {
    %c0 = arith.constant 0 : index
    %c0_0 = arith.constant 0 : index
    %0 = vector.load %arg1[%c0, %c0_0] : memref<64x32xf32, #tpu.memory_space<vmem>>, vector<64x32xf32>
    %c0_1 = arith.constant 0 : index
    %c0_2 = arith.constant 0 : index
    %c0_3 = arith.constant 0 : index
    %1 = vector.load %arg2[%c0_1, %c0_2, %c0_3] : memref<2x32x96xf32, #tpu.memory_space<vmem>>, vector<1x32x96xf32>
    %2 = vector.shape_cast %1 : vector<1x32x96xf32> to vector<32x96xf32>
    %cst = arith.constant dense<0.000000e+00> : vector<64x96xf32>
    %3 = tpu.matmul %0, %2, %cst {dimension_numbers = #tpu.dot_dimension_numbers<[1], [0], [0], [1], [0, 0, 1, 1], [], []>} : vector<64x32xf32>, vector<32x96xf32>, vector<64x96xf32> -> vector<64x96xf32>
    %c0_4 = arith.constant 0 : index
    %c0_5 = arith.constant 0 : index
    %c0_6 = arith.constant 0 : index
    %4 = vector.load %arg4[%c0_4, %c0_5, %c0_6] : memref<2x1x96xf32, #tpu.memory_space<vmem>>, vector<1x1x96xf32>
    %5 = vector.shape_cast %4 : vector<1x1x96xf32> to vector<1x96xf32>
    %6 = vector.broadcast %5 : vector<1x96xf32> to vector<64x96xf32>
    %7 = arith.addf %3, %6 : vector<64x96xf32>
    %c1 = arith.constant 1 : index
    %c0_7 = arith.constant 0 : index
    %c0_8 = arith.constant 0 : index
    %8 = vector.load %arg2[%c1, %c0_7, %c0_8] : memref<2x32x96xf32, #tpu.memory_space<vmem>>, vector<1x32x96xf32>
    %9 = vector.shape_cast %8 : vector<1x32x96xf32> to vector<32x96xf32>
    %cst_9 = arith.constant dense<0.000000e+00> : vector<64x96xf32>
    %10 = tpu.matmul %0, %9, %cst_9 {dimension_numbers = #tpu.dot_dimension_numbers<[1], [0], [0], [1], [0, 0, 1, 1], [], []>} : vector<64x32xf32>, vector<32x96xf32>, vector<64x96xf32> -> vector<64x96xf32>
    %c1_10 = arith.constant 1 : index
    %c0_11 = arith.constant 0 : index
    %c0_12 = arith.constant 0 : index
    %11 = vector.load %arg4[%c1_10, %c0_11, %c0_12] : memref<2x1x96xf32, #tpu.memory_space<vmem>>, vector<1x1x96xf32>
    %12 = vector.shape_cast %11 : vector<1x1x96xf32> to vector<1x96xf32>
    %13 = vector.broadcast %12 : vector<1x96xf32> to vector<64x96xf32>
    %14 = arith.addf %10, %13 : vector<64x96xf32>
    %c0_13 = arith.constant 0 : index
    %c0_14 = arith.constant 0 : index
    %c0_15 = arith.constant 0 : index
    %15 = vector.load %arg3[%c0_13, %c0_14, %c0_15] : memref<2x32x96xf32, #tpu.memory_space<vmem>>, vector<1x32x96xf32>
    %16 = vector.shape_cast %15 : vector<1x32x96xf32> to vector<32x96xf32>
    %c1_16 = arith.constant 1 : index
    %c0_17 = arith.constant 0 : index
    %c0_18 = arith.constant 0 : index
    %17 = vector.load %arg3[%c1_16, %c0_17, %c0_18] : memref<2x32x96xf32, #tpu.memory_space<vmem>>, vector<1x32x96xf32>
    %18 = vector.shape_cast %17 : vector<1x32x96xf32> to vector<32x96xf32>
    %c0_19 = arith.constant 0 : index
    %c0_20 = arith.constant 0 : index
    %c0_21 = arith.constant 0 : index
    %19 = vector.load %arg5[%c0_19, %c0_20, %c0_21] : memref<2x1x96xf32, #tpu.memory_space<vmem>>, vector<1x1x96xf32>
    %20 = vector.shape_cast %19 : vector<1x1x96xf32> to vector<1x96xf32>
    %c1_22 = arith.constant 1 : index
    %c0_23 = arith.constant 0 : index
    %c0_24 = arith.constant 0 : index
    %21 = vector.load %arg5[%c1_22, %c0_23, %c0_24] : memref<2x1x96xf32, #tpu.memory_space<vmem>>, vector<1x1x96xf32>
    %22 = vector.shape_cast %21 : vector<1x1x96xf32> to vector<1x96xf32>
    %cst_25 = arith.constant 0.000000e+00 : f32
    %23 = vector.broadcast %cst_25 : f32 to vector<8x32xf32>
    %cst_26 = arith.constant 0.000000e+00 : f32
    %24 = vector.broadcast %cst_26 : f32 to vector<8x32xf32>
    %25 = vector.extract_strided_slice %7 {offsets = [0, 0], sizes = [8, 96], strides = [1, 1]} : vector<64x96xf32> to vector<8x96xf32>
    %cst_27 = arith.constant dense<0.000000e+00> : vector<8x96xf32>
    %26 = tpu.matmul %23, %16, %cst_27 {dimension_numbers = #tpu.dot_dimension_numbers<[1], [0], [0], [1], [0, 0, 1, 1], [], []>} : vector<8x32xf32>, vector<32x96xf32>, vector<8x96xf32> -> vector<8x96xf32>
    %27 = vector.broadcast %20 : vector<1x96xf32> to vector<8x96xf32>
    %28 = arith.addf %26, %27 : vector<8x96xf32>
    %29 = vector.extract_strided_slice %25 {offsets = [0, 0], sizes = [8, 32], strides = [1, 1]} : vector<8x96xf32> to vector<8x32xf32>
    %30 = vector.extract_strided_slice %28 {offsets = [0, 0], sizes = [8, 32], strides = [1, 1]} : vector<8x96xf32> to vector<8x32xf32>
    %31 = arith.addf %29, %30 : vector<8x32xf32>
    %32 = arith.negf %31 : vector<8x32xf32>
    %33 = math.exp %32 : vector<8x32xf32>
    %cst_28 = arith.constant 1.000000e+00 : f32
    %34 = vector.broadcast %cst_28 : f32 to vector<8x32xf32>
    %35 = arith.addf %34, %33 : vector<8x32xf32>
    %36 = arith.divf %34, %35 : vector<8x32xf32>
    %37 = vector.extract_strided_slice %25 {offsets = [0, 32], sizes = [8, 32], strides = [1, 1]} : vector<8x96xf32> to vector<8x32xf32>
    %38 = vector.extract_strided_slice %28 {offsets = [0, 32], sizes = [8, 32], strides = [1, 1]} : vector<8x96xf32> to vector<8x32xf32>
    %39 = arith.addf %37, %38 : vector<8x32xf32>
    %40 = arith.negf %39 : vector<8x32xf32>
    %41 = math.exp %40 : vector<8x32xf32>
    %cst_29 = arith.constant 1.000000e+00 : f32
    %42 = vector.broadcast %cst_29 : f32 to vector<8x32xf32>
    %43 = arith.addf %42, %41 : vector<8x32xf32>
    %44 = arith.divf %42, %43 : vector<8x32xf32>
    %45 = vector.extract_strided_slice %25 {offsets = [0, 64], sizes = [8, 32], strides = [1, 1]} : vector<8x96xf32> to vector<8x32xf32>
    %46 = vector.extract_strided_slice %28 {offsets = [0, 64], sizes = [8, 32], strides = [1, 1]} : vector<8x96xf32> to vector<8x32xf32>
    %47 = arith.mulf %36, %46 : vector<8x32xf32>
    %48 = arith.addf %45, %47 : vector<8x32xf32>
    %49 = math.tanh %48 : vector<8x32xf32>
    %cst_30 = arith.constant 1.000000e+00 : f32
    %50 = vector.broadcast %cst_30 : f32 to vector<8x32xf32>
    %51 = arith.subf %50, %44 : vector<8x32xf32>
    %52 = arith.mulf %51, %49 : vector<8x32xf32>
    %53 = arith.mulf %44, %23 : vector<8x32xf32>
    %54 = arith.addf %52, %53 : vector<8x32xf32>
    %55 = vector.extract_strided_slice %14 {offsets = [56, 0], sizes = [8, 96], strides = [1, 1]} : vector<64x96xf32> to vector<8x96xf32>
    %cst_31 = arith.constant dense<0.000000e+00> : vector<8x96xf32>
    %56 = tpu.matmul %24, %18, %cst_31 {dimension_numbers = #tpu.dot_dimension_numbers<[1], [0], [0], [1], [0, 0, 1, 1], [], []>} : vector<8x32xf32>, vector<32x96xf32>, vector<8x96xf32> -> vector<8x96xf32>
    %57 = vector.broadcast %22 : vector<1x96xf32> to vector<8x96xf32>
    %58 = arith.addf %56, %57 : vector<8x96xf32>
    %59 = vector.extract_strided_slice %55 {offsets = [0, 0], sizes = [8, 32], strides = [1, 1]} : vector<8x96xf32> to vector<8x32xf32>
    %60 = vector.extract_strided_slice %58 {offsets = [0, 0], sizes = [8, 32], strides = [1, 1]} : vector<8x96xf32> to vector<8x32xf32>
    %61 = arith.addf %59, %60 : vector<8x32xf32>
    %62 = arith.negf %61 : vector<8x32xf32>
    %63 = math.exp %62 : vector<8x32xf32>
    %cst_32 = arith.constant 1.000000e+00 : f32
    %64 = vector.broadcast %cst_32 : f32 to vector<8x32xf32>
    %65 = arith.addf %64, %63 : vector<8x32xf32>
    %66 = arith.divf %64, %65 : vector<8x32xf32>
    %67 = vector.extract_strided_slice %55 {offsets = [0, 32], sizes = [8, 32], strides = [1, 1]} : vector<8x96xf32> to vector<8x32xf32>
    %68 = vector.extract_strided_slice %58 {offsets = [0, 32], sizes = [8, 32], strides = [1, 1]} : vector<8x96xf32> to vector<8x32xf32>
    %69 = arith.addf %67, %68 : vector<8x32xf32>
    %70 = arith.negf %69 : vector<8x32xf32>
    %71 = math.exp %70 : vector<8x32xf32>
    %cst_33 = arith.constant 1.000000e+00 : f32
    %72 = vector.broadcast %cst_33 : f32 to vector<8x32xf32>
    %73 = arith.addf %72, %71 : vector<8x32xf32>
    %74 = arith.divf %72, %73 : vector<8x32xf32>
    %75 = vector.extract_strided_slice %55 {offsets = [0, 64], sizes = [8, 32], strides = [1, 1]} : vector<8x96xf32> to vector<8x32xf32>
    %76 = vector.extract_strided_slice %58 {offsets = [0, 64], sizes = [8, 32], strides = [1, 1]} : vector<8x96xf32> to vector<8x32xf32>
    %77 = arith.mulf %66, %76 : vector<8x32xf32>
    %78 = arith.addf %75, %77 : vector<8x32xf32>
    %79 = math.tanh %78 : vector<8x32xf32>
    %cst_34 = arith.constant 1.000000e+00 : f32
    %80 = vector.broadcast %cst_34 : f32 to vector<8x32xf32>
    %81 = arith.subf %80, %74 : vector<8x32xf32>
    %82 = arith.mulf %81, %79 : vector<8x32xf32>
    %83 = arith.mulf %74, %24 : vector<8x32xf32>
    %84 = arith.addf %82, %83 : vector<8x32xf32>
    %c0_35 = arith.constant 0 : index
    %c0_36 = arith.constant 0 : index
    %85 = vector.load %arg10[%c0_35, %c0_36] : memref<64x64xf32, #tpu.memory_space<vmem>>, vector<8x32xf32>
    tpu.vector_store %arg10[%c0_35, %c0_36], %54 {strides = array<i32>} : memref<64x64xf32, #tpu.memory_space<vmem>>, vector<8x32xf32>,
    %c56 = arith.constant 56 : index
    %c32 = arith.constant 32 : index
    %86 = vector.load %arg10[%c56, %c32] : memref<64x64xf32, #tpu.memory_space<vmem>>, vector<8x32xf32>
    tpu.vector_store %arg10[%c56, %c32], %84 {strides = array<i32>} : memref<64x64xf32, #tpu.memory_space<vmem>>, vector<8x32xf32>,
    %87 = vector.extract_strided_slice %7 {offsets = [8, 0], sizes = [8, 96], strides = [1, 1]} : vector<64x96xf32> to vector<8x96xf32>
    %cst_37 = arith.constant dense<0.000000e+00> : vector<8x96xf32>
    %88 = tpu.matmul %54, %16, %cst_37 {dimension_numbers = #tpu.dot_dimension_numbers<[1], [0], [0], [1], [0, 0, 1, 1], [], []>} : vector<8x32xf32>, vector<32x96xf32>, vector<8x96xf32> -> vector<8x96xf32>
    %89 = vector.broadcast %20 : vector<1x96xf32> to vector<8x96xf32>
    %90 = arith.addf %88, %89 : vector<8x96xf32>
    %91 = vector.extract_strided_slice %87 {offsets = [0, 0], sizes = [8, 32], strides = [1, 1]} : vector<8x96xf32> to vector<8x32xf32>
    %92 = vector.extract_strided_slice %90 {offsets = [0, 0], sizes = [8, 32], strides = [1, 1]} : vector<8x96xf32> to vector<8x32xf32>
    %93 = arith.addf %91, %92 : vector<8x32xf32>
    %94 = arith.negf %93 : vector<8x32xf32>
    %95 = math.exp %94 : vector<8x32xf32>
    %cst_38 = arith.constant 1.000000e+00 : f32
    %96 = vector.broadcast %cst_38 : f32 to vector<8x32xf32>
    %97 = arith.addf %96, %95 : vector<8x32xf32>
    %98 = arith.divf %96, %97 : vector<8x32xf32>
    %99 = vector.extract_strided_slice %87 {offsets = [0, 32], sizes = [8, 32], strides = [1, 1]} : vector<8x96xf32> to vector<8x32xf32>
    %100 = vector.extract_strided_slice %90 {offsets = [0, 32], sizes = [8, 32], strides = [1, 1]} : vector<8x96xf32> to vector<8x32xf32>
    %101 = arith.addf %99, %100 : vector<8x32xf32>
    %102 = arith.negf %101 : vector<8x32xf32>
    %103 = math.exp %102 : vector<8x32xf32>
    %cst_39 = arith.constant 1.000000e+00 : f32
    %104 = vector.broadcast %cst_39 : f32 to vector<8x32xf32>
    %105 = arith.addf %104, %103 : vector<8x32xf32>
    %106 = arith.divf %104, %105 : vector<8x32xf32>
    %107 = vector.extract_strided_slice %87 {offsets = [0, 64], sizes = [8, 32], strides = [1, 1]} : vector<8x96xf32> to vector<8x32xf32>
    %108 = vector.extract_strided_slice %90 {offsets = [0, 64], sizes = [8, 32], strides = [1, 1]} : vector<8x96xf32> to vector<8x32xf32>
    %109 = arith.mulf %98, %108 : vector<8x32xf32>
    %110 = arith.addf %107, %109 : vector<8x32xf32>
    %111 = math.tanh %110 : vector<8x32xf32>
    %cst_40 = arith.constant 1.000000e+00 : f32
    %112 = vector.broadcast %cst_40 : f32 to vector<8x32xf32>
    %113 = arith.subf %112, %106 : vector<8x32xf32>
    %114 = arith.mulf %113, %111 : vector<8x32xf32>
    %115 = arith.mulf %106, %54 : vector<8x32xf32>
    %116 = arith.addf %114, %115 : vector<8x32xf32>
    %117 = vector.extract_strided_slice %14 {offsets = [48, 0], sizes = [8, 96], strides = [1, 1]} : vector<64x96xf32> to vector<8x96xf32>
    %cst_41 = arith.constant dense<0.000000e+00> : vector<8x96xf32>
    %118 = tpu.matmul %84, %18, %cst_41 {dimension_numbers = #tpu.dot_dimension_numbers<[1], [0], [0], [1], [0, 0, 1, 1], [], []>} : vector<8x32xf32>, vector<32x96xf32>, vector<8x96xf32> -> vector<8x96xf32>
    %119 = vector.broadcast %22 : vector<1x96xf32> to vector<8x96xf32>
    %120 = arith.addf %118, %119 : vector<8x96xf32>
    %121 = vector.extract_strided_slice %117 {offsets = [0, 0], sizes = [8, 32], strides = [1, 1]} : vector<8x96xf32> to vector<8x32xf32>
    %122 = vector.extract_strided_slice %120 {offsets = [0, 0], sizes = [8, 32], strides = [1, 1]} : vector<8x96xf32> to vector<8x32xf32>
    %123 = arith.addf %121, %122 : vector<8x32xf32>
    %124 = arith.negf %123 : vector<8x32xf32>
    %125 = math.exp %124 : vector<8x32xf32>
    %cst_42 = arith.constant 1.000000e+00 : f32
    %126 = vector.broadcast %cst_42 : f32 to vector<8x32xf32>
    %127 = arith.addf %126, %125 : vector<8x32xf32>
    %128 = arith.divf %126, %127 : vector<8x32xf32>
    %129 = vector.extract_strided_slice %117 {offsets = [0, 32], sizes = [8, 32], strides = [1, 1]} : vector<8x96xf32> to vector<8x32xf32>
    %130 = vector.extract_strided_slice %120 {offsets = [0, 32], sizes = [8, 32], strides = [1, 1]} : vector<8x96xf32> to vector<8x32xf32>
    %131 = arith.addf %129, %130 : vector<8x32xf32>
    %132 = arith.negf %131 : vector<8x32xf32>
    %133 = math.exp %132 : vector<8x32xf32>
    %cst_43 = arith.constant 1.000000e+00 : f32
    %134 = vector.broadcast %cst_43 : f32 to vector<8x32xf32>
    %135 = arith.addf %134, %133 : vector<8x32xf32>
    %136 = arith.divf %134, %135 : vector<8x32xf32>
    %137 = vector.extract_strided_slice %117 {offsets = [0, 64], sizes = [8, 32], strides = [1, 1]} : vector<8x96xf32> to vector<8x32xf32>
    %138 = vector.extract_strided_slice %120 {offsets = [0, 64], sizes = [8, 32], strides = [1, 1]} : vector<8x96xf32> to vector<8x32xf32>
    %139 = arith.mulf %128, %138 : vector<8x32xf32>
    %140 = arith.addf %137, %139 : vector<8x32xf32>
    %141 = math.tanh %140 : vector<8x32xf32>
    %cst_44 = arith.constant 1.000000e+00 : f32
    %142 = vector.broadcast %cst_44 : f32 to vector<8x32xf32>
    %143 = arith.subf %142, %136 : vector<8x32xf32>
    %144 = arith.mulf %143, %141 : vector<8x32xf32>
    %145 = arith.mulf %136, %84 : vector<8x32xf32>
    %146 = arith.addf %144, %145 : vector<8x32xf32>
    %c8 = arith.constant 8 : index
    %c0_45 = arith.constant 0 : index
    %147 = vector.load %arg10[%c8, %c0_45] : memref<64x64xf32, #tpu.memory_space<vmem>>, vector<8x32xf32>
    tpu.vector_store %arg10[%c8, %c0_45], %116 {strides = array<i32>} : memref<64x64xf32, #tpu.memory_space<vmem>>, vector<8x32xf32>,
    %c48 = arith.constant 48 : index
    %c32_46 = arith.constant 32 : index
    %148 = vector.load %arg10[%c48, %c32_46] : memref<64x64xf32, #tpu.memory_space<vmem>>, vector<8x32xf32>
    tpu.vector_store %arg10[%c48, %c32_46], %146 {strides = array<i32>} : memref<64x64xf32, #tpu.memory_space<vmem>>, vector<8x32xf32>,
    %149 = vector.extract_strided_slice %7 {offsets = [16, 0], sizes = [8, 96], strides = [1, 1]} : vector<64x96xf32> to vector<8x96xf32>
    %cst_47 = arith.constant dense<0.000000e+00> : vector<8x96xf32>
    %150 = tpu.matmul %116, %16, %cst_47 {dimension_numbers = #tpu.dot_dimension_numbers<[1], [0], [0], [1], [0, 0, 1, 1], [], []>} : vector<8x32xf32>, vector<32x96xf32>, vector<8x96xf32> -> vector<8x96xf32>
    %151 = vector.broadcast %20 : vector<1x96xf32> to vector<8x96xf32>
    %152 = arith.addf %150, %151 : vector<8x96xf32>
    %153 = vector.extract_strided_slice %149 {offsets = [0, 0], sizes = [8, 32], strides = [1, 1]} : vector<8x96xf32> to vector<8x32xf32>
    %154 = vector.extract_strided_slice %152 {offsets = [0, 0], sizes = [8, 32], strides = [1, 1]} : vector<8x96xf32> to vector<8x32xf32>
    %155 = arith.addf %153, %154 : vector<8x32xf32>
    %156 = arith.negf %155 : vector<8x32xf32>
    %157 = math.exp %156 : vector<8x32xf32>
    %cst_48 = arith.constant 1.000000e+00 : f32
    %158 = vector.broadcast %cst_48 : f32 to vector<8x32xf32>
    %159 = arith.addf %158, %157 : vector<8x32xf32>
    %160 = arith.divf %158, %159 : vector<8x32xf32>
    %161 = vector.extract_strided_slice %149 {offsets = [0, 32], sizes = [8, 32], strides = [1, 1]} : vector<8x96xf32> to vector<8x32xf32>
    %162 = vector.extract_strided_slice %152 {offsets = [0, 32], sizes = [8, 32], strides = [1, 1]} : vector<8x96xf32> to vector<8x32xf32>
    %163 = arith.addf %161, %162 : vector<8x32xf32>
    %164 = arith.negf %163 : vector<8x32xf32>
    %165 = math.exp %164 : vector<8x32xf32>
    %cst_49 = arith.constant 1.000000e+00 : f32
    %166 = vector.broadcast %cst_49 : f32 to vector<8x32xf32>
    %167 = arith.addf %166, %165 : vector<8x32xf32>
    %168 = arith.divf %166, %167 : vector<8x32xf32>
    %169 = vector.extract_strided_slice %149 {offsets = [0, 64], sizes = [8, 32], strides = [1, 1]} : vector<8x96xf32> to vector<8x32xf32>
    %170 = vector.extract_strided_slice %152 {offsets = [0, 64], sizes = [8, 32], strides = [1, 1]} : vector<8x96xf32> to vector<8x32xf32>
    %171 = arith.mulf %160, %170 : vector<8x32xf32>
    %172 = arith.addf %169, %171 : vector<8x32xf32>
    %173 = math.tanh %172 : vector<8x32xf32>
    %cst_50 = arith.constant 1.000000e+00 : f32
    %174 = vector.broadcast %cst_50 : f32 to vector<8x32xf32>
    %175 = arith.subf %174, %168 : vector<8x32xf32>
    %176 = arith.mulf %175, %173 : vector<8x32xf32>
    %177 = arith.mulf %168, %116 : vector<8x32xf32>
    %178 = arith.addf %176, %177 : vector<8x32xf32>
    %179 = vector.extract_strided_slice %14 {offsets = [40, 0], sizes = [8, 96], strides = [1, 1]} : vector<64x96xf32> to vector<8x96xf32>
    %cst_51 = arith.constant dense<0.000000e+00> : vector<8x96xf32>
    %180 = tpu.matmul %146, %18, %cst_51 {dimension_numbers = #tpu.dot_dimension_numbers<[1], [0], [0], [1], [0, 0, 1, 1], [], []>} : vector<8x32xf32>, vector<32x96xf32>, vector<8x96xf32> -> vector<8x96xf32>
    %181 = vector.broadcast %22 : vector<1x96xf32> to vector<8x96xf32>
    %182 = arith.addf %180, %181 : vector<8x96xf32>
    %183 = vector.extract_strided_slice %179 {offsets = [0, 0], sizes = [8, 32], strides = [1, 1]} : vector<8x96xf32> to vector<8x32xf32>
    %184 = vector.extract_strided_slice %182 {offsets = [0, 0], sizes = [8, 32], strides = [1, 1]} : vector<8x96xf32> to vector<8x32xf32>
    %185 = arith.addf %183, %184 : vector<8x32xf32>
    %186 = arith.negf %185 : vector<8x32xf32>
    %187 = math.exp %186 : vector<8x32xf32>
    %cst_52 = arith.constant 1.000000e+00 : f32
    %188 = vector.broadcast %cst_52 : f32 to vector<8x32xf32>
    %189 = arith.addf %188, %187 : vector<8x32xf32>
    %190 = arith.divf %188, %189 : vector<8x32xf32>
    %191 = vector.extract_strided_slice %179 {offsets = [0, 32], sizes = [8, 32], strides = [1, 1]} : vector<8x96xf32> to vector<8x32xf32>
    %192 = vector.extract_strided_slice %182 {offsets = [0, 32], sizes = [8, 32], strides = [1, 1]} : vector<8x96xf32> to vector<8x32xf32>
    %193 = arith.addf %191, %192 : vector<8x32xf32>
    %194 = arith.negf %193 : vector<8x32xf32>
    %195 = math.exp %194 : vector<8x32xf32>
    %cst_53 = arith.constant 1.000000e+00 : f32
    %196 = vector.broadcast %cst_53 : f32 to vector<8x32xf32>
    %197 = arith.addf %196, %195 : vector<8x32xf32>
    %198 = arith.divf %196, %197 : vector<8x32xf32>
    %199 = vector.extract_strided_slice %179 {offsets = [0, 64], sizes = [8, 32], strides = [1, 1]} : vector<8x96xf32> to vector<8x32xf32>
    %200 = vector.extract_strided_slice %182 {offsets = [0, 64], sizes = [8, 32], strides = [1, 1]} : vector<8x96xf32> to vector<8x32xf32>
    %201 = arith.mulf %190, %200 : vector<8x32xf32>
    %202 = arith.addf %199, %201 : vector<8x32xf32>
    %203 = math.tanh %202 : vector<8x32xf32>
    %cst_54 = arith.constant 1.000000e+00 : f32
    %204 = vector.broadcast %cst_54 : f32 to vector<8x32xf32>
    %205 = arith.subf %204, %198 : vector<8x32xf32>
    %206 = arith.mulf %205, %203 : vector<8x32xf32>
    %207 = arith.mulf %198, %146 : vector<8x32xf32>
    %208 = arith.addf %206, %207 : vector<8x32xf32>
    %c16 = arith.constant 16 : index
    %c0_55 = arith.constant 0 : index
    %209 = vector.load %arg10[%c16, %c0_55] : memref<64x64xf32, #tpu.memory_space<vmem>>, vector<8x32xf32>
    tpu.vector_store %arg10[%c16, %c0_55], %178 {strides = array<i32>} : memref<64x64xf32, #tpu.memory_space<vmem>>, vector<8x32xf32>,
    %c40 = arith.constant 40 : index
    %c32_56 = arith.constant 32 : index
    %210 = vector.load %arg10[%c40, %c32_56] : memref<64x64xf32, #tpu.memory_space<vmem>>, vector<8x32xf32>
    tpu.vector_store %arg10[%c40, %c32_56], %208 {strides = array<i32>} : memref<64x64xf32, #tpu.memory_space<vmem>>, vector<8x32xf32>,
    %211 = vector.extract_strided_slice %7 {offsets = [24, 0], sizes = [8, 96], strides = [1, 1]} : vector<64x96xf32> to vector<8x96xf32>
    %cst_57 = arith.constant dense<0.000000e+00> : vector<8x96xf32>
    %212 = tpu.matmul %178, %16, %cst_57 {dimension_numbers = #tpu.dot_dimension_numbers<[1], [0], [0], [1], [0, 0, 1, 1], [], []>} : vector<8x32xf32>, vector<32x96xf32>, vector<8x96xf32> -> vector<8x96xf32>
    %213 = vector.broadcast %20 : vector<1x96xf32> to vector<8x96xf32>
    %214 = arith.addf %212, %213 : vector<8x96xf32>
    %215 = vector.extract_strided_slice %211 {offsets = [0, 0], sizes = [8, 32], strides = [1, 1]} : vector<8x96xf32> to vector<8x32xf32>
    %216 = vector.extract_strided_slice %214 {offsets = [0, 0], sizes = [8, 32], strides = [1, 1]} : vector<8x96xf32> to vector<8x32xf32>
    %217 = arith.addf %215, %216 : vector<8x32xf32>
    %218 = arith.negf %217 : vector<8x32xf32>
    %219 = math.exp %218 : vector<8x32xf32>
    %cst_58 = arith.constant 1.000000e+00 : f32
    %220 = vector.broadcast %cst_58 : f32 to vector<8x32xf32>
    %221 = arith.addf %220, %219 : vector<8x32xf32>
    %222 = arith.divf %220, %221 : vector<8x32xf32>
    %223 = vector.extract_strided_slice %211 {offsets = [0, 32], sizes = [8, 32], strides = [1, 1]} : vector<8x96xf32> to vector<8x32xf32>
    %224 = vector.extract_strided_slice %214 {offsets = [0, 32], sizes = [8, 32], strides = [1, 1]} : vector<8x96xf32> to vector<8x32xf32>
    %225 = arith.addf %223, %224 : vector<8x32xf32>
    %226 = arith.negf %225 : vector<8x32xf32>
    %227 = math.exp %226 : vector<8x32xf32>
    %cst_59 = arith.constant 1.000000e+00 : f32
    %228 = vector.broadcast %cst_59 : f32 to vector<8x32xf32>
    %229 = arith.addf %228, %227 : vector<8x32xf32>
    %230 = arith.divf %228, %229 : vector<8x32xf32>
    %231 = vector.extract_strided_slice %211 {offsets = [0, 64], sizes = [8, 32], strides = [1, 1]} : vector<8x96xf32> to vector<8x32xf32>
    %232 = vector.extract_strided_slice %214 {offsets = [0, 64], sizes = [8, 32], strides = [1, 1]} : vector<8x96xf32> to vector<8x32xf32>
    %233 = arith.mulf %222, %232 : vector<8x32xf32>
    %234 = arith.addf %231, %233 : vector<8x32xf32>
    %235 = math.tanh %234 : vector<8x32xf32>
    %cst_60 = arith.constant 1.000000e+00 : f32
    %236 = vector.broadcast %cst_60 : f32 to vector<8x32xf32>
    %237 = arith.subf %236, %230 : vector<8x32xf32>
    %238 = arith.mulf %237, %235 : vector<8x32xf32>
    %239 = arith.mulf %230, %178 : vector<8x32xf32>
    %240 = arith.addf %238, %239 : vector<8x32xf32>
    %241 = vector.extract_strided_slice %14 {offsets = [32, 0], sizes = [8, 96], strides = [1, 1]} : vector<64x96xf32> to vector<8x96xf32>
    %cst_61 = arith.constant dense<0.000000e+00> : vector<8x96xf32>
    %242 = tpu.matmul %208, %18, %cst_61 {dimension_numbers = #tpu.dot_dimension_numbers<[1], [0], [0], [1], [0, 0, 1, 1], [], []>} : vector<8x32xf32>, vector<32x96xf32>, vector<8x96xf32> -> vector<8x96xf32>
    %243 = vector.broadcast %22 : vector<1x96xf32> to vector<8x96xf32>
    %244 = arith.addf %242, %243 : vector<8x96xf32>
    %245 = vector.extract_strided_slice %241 {offsets = [0, 0], sizes = [8, 32], strides = [1, 1]} : vector<8x96xf32> to vector<8x32xf32>
    %246 = vector.extract_strided_slice %244 {offsets = [0, 0], sizes = [8, 32], strides = [1, 1]} : vector<8x96xf32> to vector<8x32xf32>
    %247 = arith.addf %245, %246 : vector<8x32xf32>
    %248 = arith.negf %247 : vector<8x32xf32>
    %249 = math.exp %248 : vector<8x32xf32>
    %cst_62 = arith.constant 1.000000e+00 : f32
    %250 = vector.broadcast %cst_62 : f32 to vector<8x32xf32>
    %251 = arith.addf %250, %249 : vector<8x32xf32>
    %252 = arith.divf %250, %251 : vector<8x32xf32>
    %253 = vector.extract_strided_slice %241 {offsets = [0, 32], sizes = [8, 32], strides = [1, 1]} : vector<8x96xf32> to vector<8x32xf32>
    %254 = vector.extract_strided_slice %244 {offsets = [0, 32], sizes = [8, 32], strides = [1, 1]} : vector<8x96xf32> to vector<8x32xf32>
    %255 = arith.addf %253, %254 : vector<8x32xf32>
    %256 = arith.negf %255 : vector<8x32xf32>
    %257 = math.exp %256 : vector<8x32xf32>
    %cst_63 = arith.constant 1.000000e+00 : f32
    %258 = vector.broadcast %cst_63 : f32 to vector<8x32xf32>
    %259 = arith.addf %258, %257 : vector<8x32xf32>
    %260 = arith.divf %258, %259 : vector<8x32xf32>
    %261 = vector.extract_strided_slice %241 {offsets = [0, 64], sizes = [8, 32], strides = [1, 1]} : vector<8x96xf32> to vector<8x32xf32>
    %262 = vector.extract_strided_slice %244 {offsets = [0, 64], sizes = [8, 32], strides = [1, 1]} : vector<8x96xf32> to vector<8x32xf32>
    %263 = arith.mulf %252, %262 : vector<8x32xf32>
    %264 = arith.addf %261, %263 : vector<8x32xf32>
    %265 = math.tanh %264 : vector<8x32xf32>
    %cst_64 = arith.constant 1.000000e+00 : f32
    %266 = vector.broadcast %cst_64 : f32 to vector<8x32xf32>
    %267 = arith.subf %266, %260 : vector<8x32xf32>
    %268 = arith.mulf %267, %265 : vector<8x32xf32>
    %269 = arith.mulf %260, %208 : vector<8x32xf32>
    %270 = arith.addf %268, %269 : vector<8x32xf32>
    %c24 = arith.constant 24 : index
    %c0_65 = arith.constant 0 : index
    %271 = vector.load %arg10[%c24, %c0_65] : memref<64x64xf32, #tpu.memory_space<vmem>>, vector<8x32xf32>
    tpu.vector_store %arg10[%c24, %c0_65], %240 {strides = array<i32>} : memref<64x64xf32, #tpu.memory_space<vmem>>, vector<8x32xf32>,
    %c32_66 = arith.constant 32 : index
    %c32_67 = arith.constant 32 : index
    %272 = vector.load %arg10[%c32_66, %c32_67] : memref<64x64xf32, #tpu.memory_space<vmem>>, vector<8x32xf32>
    tpu.vector_store %arg10[%c32_66, %c32_67], %270 {strides = array<i32>} : memref<64x64xf32, #tpu.memory_space<vmem>>, vector<8x32xf32>,
    %273 = vector.extract_strided_slice %7 {offsets = [32, 0], sizes = [8, 96], strides = [1, 1]} : vector<64x96xf32> to vector<8x96xf32>
    %cst_68 = arith.constant dense<0.000000e+00> : vector<8x96xf32>
    %274 = tpu.matmul %240, %16, %cst_68 {dimension_numbers = #tpu.dot_dimension_numbers<[1], [0], [0], [1], [0, 0, 1, 1], [], []>} : vector<8x32xf32>, vector<32x96xf32>, vector<8x96xf32> -> vector<8x96xf32>
    %275 = vector.broadcast %20 : vector<1x96xf32> to vector<8x96xf32>
    %276 = arith.addf %274, %275 : vector<8x96xf32>
    %277 = vector.extract_strided_slice %273 {offsets = [0, 0], sizes = [8, 32], strides = [1, 1]} : vector<8x96xf32> to vector<8x32xf32>
    %278 = vector.extract_strided_slice %276 {offsets = [0, 0], sizes = [8, 32], strides = [1, 1]} : vector<8x96xf32> to vector<8x32xf32>
    %279 = arith.addf %277, %278 : vector<8x32xf32>
    %280 = arith.negf %279 : vector<8x32xf32>
    %281 = math.exp %280 : vector<8x32xf32>
    %cst_69 = arith.constant 1.000000e+00 : f32
    %282 = vector.broadcast %cst_69 : f32 to vector<8x32xf32>
    %283 = arith.addf %282, %281 : vector<8x32xf32>
    %284 = arith.divf %282, %283 : vector<8x32xf32>
    %285 = vector.extract_strided_slice %273 {offsets = [0, 32], sizes = [8, 32], strides = [1, 1]} : vector<8x96xf32> to vector<8x32xf32>
    %286 = vector.extract_strided_slice %276 {offsets = [0, 32], sizes = [8, 32], strides = [1, 1]} : vector<8x96xf32> to vector<8x32xf32>
    %287 = arith.addf %285, %286 : vector<8x32xf32>
    %288 = arith.negf %287 : vector<8x32xf32>
    %289 = math.exp %288 : vector<8x32xf32>
    %cst_70 = arith.constant 1.000000e+00 : f32
    %290 = vector.broadcast %cst_70 : f32 to vector<8x32xf32>
    %291 = arith.addf %290, %289 : vector<8x32xf32>
    %292 = arith.divf %290, %291 : vector<8x32xf32>
    %293 = vector.extract_strided_slice %273 {offsets = [0, 64], sizes = [8, 32], strides = [1, 1]} : vector<8x96xf32> to vector<8x32xf32>
    %294 = vector.extract_strided_slice %276 {offsets = [0, 64], sizes = [8, 32], strides = [1, 1]} : vector<8x96xf32> to vector<8x32xf32>
    %295 = arith.mulf %284, %294 : vector<8x32xf32>
    %296 = arith.addf %293, %295 : vector<8x32xf32>
    %297 = math.tanh %296 : vector<8x32xf32>
    %cst_71 = arith.constant 1.000000e+00 : f32
    %298 = vector.broadcast %cst_71 : f32 to vector<8x32xf32>
    %299 = arith.subf %298, %292 : vector<8x32xf32>
    %300 = arith.mulf %299, %297 : vector<8x32xf32>
    %301 = arith.mulf %292, %240 : vector<8x32xf32>
    %302 = arith.addf %300, %301 : vector<8x32xf32>
    %303 = vector.extract_strided_slice %14 {offsets = [24, 0], sizes = [8, 96], strides = [1, 1]} : vector<64x96xf32> to vector<8x96xf32>
    %cst_72 = arith.constant dense<0.000000e+00> : vector<8x96xf32>
    %304 = tpu.matmul %270, %18, %cst_72 {dimension_numbers = #tpu.dot_dimension_numbers<[1], [0], [0], [1], [0, 0, 1, 1], [], []>} : vector<8x32xf32>, vector<32x96xf32>, vector<8x96xf32> -> vector<8x96xf32>
    %305 = vector.broadcast %22 : vector<1x96xf32> to vector<8x96xf32>
    %306 = arith.addf %304, %305 : vector<8x96xf32>
    %307 = vector.extract_strided_slice %303 {offsets = [0, 0], sizes = [8, 32], strides = [1, 1]} : vector<8x96xf32> to vector<8x32xf32>
    %308 = vector.extract_strided_slice %306 {offsets = [0, 0], sizes = [8, 32], strides = [1, 1]} : vector<8x96xf32> to vector<8x32xf32>
    %309 = arith.addf %307, %308 : vector<8x32xf32>
    %310 = arith.negf %309 : vector<8x32xf32>
    %311 = math.exp %310 : vector<8x32xf32>
    %cst_73 = arith.constant 1.000000e+00 : f32
    %312 = vector.broadcast %cst_73 : f32 to vector<8x32xf32>
    %313 = arith.addf %312, %311 : vector<8x32xf32>
    %314 = arith.divf %312, %313 : vector<8x32xf32>
    %315 = vector.extract_strided_slice %303 {offsets = [0, 32], sizes = [8, 32], strides = [1, 1]} : vector<8x96xf32> to vector<8x32xf32>
    %316 = vector.extract_strided_slice %306 {offsets = [0, 32], sizes = [8, 32], strides = [1, 1]} : vector<8x96xf32> to vector<8x32xf32>
    %317 = arith.addf %315, %316 : vector<8x32xf32>
    %318 = arith.negf %317 : vector<8x32xf32>
    %319 = math.exp %318 : vector<8x32xf32>
    %cst_74 = arith.constant 1.000000e+00 : f32
    %320 = vector.broadcast %cst_74 : f32 to vector<8x32xf32>
    %321 = arith.addf %320, %319 : vector<8x32xf32>
    %322 = arith.divf %320, %321 : vector<8x32xf32>
    %323 = vector.extract_strided_slice %303 {offsets = [0, 64], sizes = [8, 32], strides = [1, 1]} : vector<8x96xf32> to vector<8x32xf32>
    %324 = vector.extract_strided_slice %306 {offsets = [0, 64], sizes = [8, 32], strides = [1, 1]} : vector<8x96xf32> to vector<8x32xf32>
    %325 = arith.mulf %314, %324 : vector<8x32xf32>
    %326 = arith.addf %323, %325 : vector<8x32xf32>
    %327 = math.tanh %326 : vector<8x32xf32>
    %cst_75 = arith.constant 1.000000e+00 : f32
    %328 = vector.broadcast %cst_75 : f32 to vector<8x32xf32>
    %329 = arith.subf %328, %322 : vector<8x32xf32>
    %330 = arith.mulf %329, %327 : vector<8x32xf32>
    %331 = arith.mulf %322, %270 : vector<8x32xf32>
    %332 = arith.addf %330, %331 : vector<8x32xf32>
    %c32_76 = arith.constant 32 : index
    %c0_77 = arith.constant 0 : index
    %333 = vector.load %arg10[%c32_76, %c0_77] : memref<64x64xf32, #tpu.memory_space<vmem>>, vector<8x32xf32>
    tpu.vector_store %arg10[%c32_76, %c0_77], %302 {strides = array<i32>} : memref<64x64xf32, #tpu.memory_space<vmem>>, vector<8x32xf32>,
    %c24_78 = arith.constant 24 : index
    %c32_79 = arith.constant 32 : index
    %334 = vector.load %arg10[%c24_78, %c32_79] : memref<64x64xf32, #tpu.memory_space<vmem>>, vector<8x32xf32>
    tpu.vector_store %arg10[%c24_78, %c32_79], %332 {strides = array<i32>} : memref<64x64xf32, #tpu.memory_space<vmem>>, vector<8x32xf32>,
    %335 = vector.extract_strided_slice %7 {offsets = [40, 0], sizes = [8, 96], strides = [1, 1]} : vector<64x96xf32> to vector<8x96xf32>
    %cst_80 = arith.constant dense<0.000000e+00> : vector<8x96xf32>
    %336 = tpu.matmul %302, %16, %cst_80 {dimension_numbers = #tpu.dot_dimension_numbers<[1], [0], [0], [1], [0, 0, 1, 1], [], []>} : vector<8x32xf32>, vector<32x96xf32>, vector<8x96xf32> -> vector<8x96xf32>
    %337 = vector.broadcast %20 : vector<1x96xf32> to vector<8x96xf32>
    %338 = arith.addf %336, %337 : vector<8x96xf32>
    %339 = vector.extract_strided_slice %335 {offsets = [0, 0], sizes = [8, 32], strides = [1, 1]} : vector<8x96xf32> to vector<8x32xf32>
    %340 = vector.extract_strided_slice %338 {offsets = [0, 0], sizes = [8, 32], strides = [1, 1]} : vector<8x96xf32> to vector<8x32xf32>
    %341 = arith.addf %339, %340 : vector<8x32xf32>
    %342 = arith.negf %341 : vector<8x32xf32>
    %343 = math.exp %342 : vector<8x32xf32>
    %cst_81 = arith.constant 1.000000e+00 : f32
    %344 = vector.broadcast %cst_81 : f32 to vector<8x32xf32>
    %345 = arith.addf %344, %343 : vector<8x32xf32>
    %346 = arith.divf %344, %345 : vector<8x32xf32>
    %347 = vector.extract_strided_slice %335 {offsets = [0, 32], sizes = [8, 32], strides = [1, 1]} : vector<8x96xf32> to vector<8x32xf32>
    %348 = vector.extract_strided_slice %338 {offsets = [0, 32], sizes = [8, 32], strides = [1, 1]} : vector<8x96xf32> to vector<8x32xf32>
    %349 = arith.addf %347, %348 : vector<8x32xf32>
    %350 = arith.negf %349 : vector<8x32xf32>
    %351 = math.exp %350 : vector<8x32xf32>
    %cst_82 = arith.constant 1.000000e+00 : f32
    %352 = vector.broadcast %cst_82 : f32 to vector<8x32xf32>
    %353 = arith.addf %352, %351 : vector<8x32xf32>
    %354 = arith.divf %352, %353 : vector<8x32xf32>
    %355 = vector.extract_strided_slice %335 {offsets = [0, 64], sizes = [8, 32], strides = [1, 1]} : vector<8x96xf32> to vector<8x32xf32>
    %356 = vector.extract_strided_slice %338 {offsets = [0, 64], sizes = [8, 32], strides = [1, 1]} : vector<8x96xf32> to vector<8x32xf32>
    %357 = arith.mulf %346, %356 : vector<8x32xf32>
    %358 = arith.addf %355, %357 : vector<8x32xf32>
    %359 = math.tanh %358 : vector<8x32xf32>
    %cst_83 = arith.constant 1.000000e+00 : f32
    %360 = vector.broadcast %cst_83 : f32 to vector<8x32xf32>
    %361 = arith.subf %360, %354 : vector<8x32xf32>
    %362 = arith.mulf %361, %359 : vector<8x32xf32>
    %363 = arith.mulf %354, %302 : vector<8x32xf32>
    %364 = arith.addf %362, %363 : vector<8x32xf32>
    %365 = vector.extract_strided_slice %14 {offsets = [16, 0], sizes = [8, 96], strides = [1, 1]} : vector<64x96xf32> to vector<8x96xf32>
    %cst_84 = arith.constant dense<0.000000e+00> : vector<8x96xf32>
    %366 = tpu.matmul %332, %18, %cst_84 {dimension_numbers = #tpu.dot_dimension_numbers<[1], [0], [0], [1], [0, 0, 1, 1], [], []>} : vector<8x32xf32>, vector<32x96xf32>, vector<8x96xf32> -> vector<8x96xf32>
    %367 = vector.broadcast %22 : vector<1x96xf32> to vector<8x96xf32>
    %368 = arith.addf %366, %367 : vector<8x96xf32>
    %369 = vector.extract_strided_slice %365 {offsets = [0, 0], sizes = [8, 32], strides = [1, 1]} : vector<8x96xf32> to vector<8x32xf32>
    %370 = vector.extract_strided_slice %368 {offsets = [0, 0], sizes = [8, 32], strides = [1, 1]} : vector<8x96xf32> to vector<8x32xf32>
    %371 = arith.addf %369, %370 : vector<8x32xf32>
    %372 = arith.negf %371 : vector<8x32xf32>
    %373 = math.exp %372 : vector<8x32xf32>
    %cst_85 = arith.constant 1.000000e+00 : f32
    %374 = vector.broadcast %cst_85 : f32 to vector<8x32xf32>
    %375 = arith.addf %374, %373 : vector<8x32xf32>
    %376 = arith.divf %374, %375 : vector<8x32xf32>
    %377 = vector.extract_strided_slice %365 {offsets = [0, 32], sizes = [8, 32], strides = [1, 1]} : vector<8x96xf32> to vector<8x32xf32>
    %378 = vector.extract_strided_slice %368 {offsets = [0, 32], sizes = [8, 32], strides = [1, 1]} : vector<8x96xf32> to vector<8x32xf32>
    %379 = arith.addf %377, %378 : vector<8x32xf32>
    %380 = arith.negf %379 : vector<8x32xf32>
    %381 = math.exp %380 : vector<8x32xf32>
    %cst_86 = arith.constant 1.000000e+00 : f32
    %382 = vector.broadcast %cst_86 : f32 to vector<8x32xf32>
    %383 = arith.addf %382, %381 : vector<8x32xf32>
    %384 = arith.divf %382, %383 : vector<8x32xf32>
    %385 = vector.extract_strided_slice %365 {offsets = [0, 64], sizes = [8, 32], strides = [1, 1]} : vector<8x96xf32> to vector<8x32xf32>
    %386 = vector.extract_strided_slice %368 {offsets = [0, 64], sizes = [8, 32], strides = [1, 1]} : vector<8x96xf32> to vector<8x32xf32>
    %387 = arith.mulf %376, %386 : vector<8x32xf32>
    %388 = arith.addf %385, %387 : vector<8x32xf32>
    %389 = math.tanh %388 : vector<8x32xf32>
    %cst_87 = arith.constant 1.000000e+00 : f32
    %390 = vector.broadcast %cst_87 : f32 to vector<8x32xf32>
    %391 = arith.subf %390, %384 : vector<8x32xf32>
    %392 = arith.mulf %391, %389 : vector<8x32xf32>
    %393 = arith.mulf %384, %332 : vector<8x32xf32>
    %394 = arith.addf %392, %393 : vector<8x32xf32>
    %c40_88 = arith.constant 40 : index
    %c0_89 = arith.constant 0 : index
    %395 = vector.load %arg10[%c40_88, %c0_89] : memref<64x64xf32, #tpu.memory_space<vmem>>, vector<8x32xf32>
    tpu.vector_store %arg10[%c40_88, %c0_89], %364 {strides = array<i32>} : memref<64x64xf32, #tpu.memory_space<vmem>>, vector<8x32xf32>,
    %c16_90 = arith.constant 16 : index
    %c32_91 = arith.constant 32 : index
    %396 = vector.load %arg10[%c16_90, %c32_91] : memref<64x64xf32, #tpu.memory_space<vmem>>, vector<8x32xf32>
    tpu.vector_store %arg10[%c16_90, %c32_91], %394 {strides = array<i32>} : memref<64x64xf32, #tpu.memory_space<vmem>>, vector<8x32xf32>,
    %397 = vector.extract_strided_slice %7 {offsets = [48, 0], sizes = [8, 96], strides = [1, 1]} : vector<64x96xf32> to vector<8x96xf32>
    %cst_92 = arith.constant dense<0.000000e+00> : vector<8x96xf32>
    %398 = tpu.matmul %364, %16, %cst_92 {dimension_numbers = #tpu.dot_dimension_numbers<[1], [0], [0], [1], [0, 0, 1, 1], [], []>} : vector<8x32xf32>, vector<32x96xf32>, vector<8x96xf32> -> vector<8x96xf32>
    %399 = vector.broadcast %20 : vector<1x96xf32> to vector<8x96xf32>
    %400 = arith.addf %398, %399 : vector<8x96xf32>
    %401 = vector.extract_strided_slice %397 {offsets = [0, 0], sizes = [8, 32], strides = [1, 1]} : vector<8x96xf32> to vector<8x32xf32>
    %402 = vector.extract_strided_slice %400 {offsets = [0, 0], sizes = [8, 32], strides = [1, 1]} : vector<8x96xf32> to vector<8x32xf32>
    %403 = arith.addf %401, %402 : vector<8x32xf32>
    %404 = arith.negf %403 : vector<8x32xf32>
    %405 = math.exp %404 : vector<8x32xf32>
    %cst_93 = arith.constant 1.000000e+00 : f32
    %406 = vector.broadcast %cst_93 : f32 to vector<8x32xf32>
    %407 = arith.addf %406, %405 : vector<8x32xf32>
    %408 = arith.divf %406, %407 : vector<8x32xf32>
    %409 = vector.extract_strided_slice %397 {offsets = [0, 32], sizes = [8, 32], strides = [1, 1]} : vector<8x96xf32> to vector<8x32xf32>
    %410 = vector.extract_strided_slice %400 {offsets = [0, 32], sizes = [8, 32], strides = [1, 1]} : vector<8x96xf32> to vector<8x32xf32>
    %411 = arith.addf %409, %410 : vector<8x32xf32>
    %412 = arith.negf %411 : vector<8x32xf32>
    %413 = math.exp %412 : vector<8x32xf32>
    %cst_94 = arith.constant 1.000000e+00 : f32
    %414 = vector.broadcast %cst_94 : f32 to vector<8x32xf32>
    %415 = arith.addf %414, %413 : vector<8x32xf32>
    %416 = arith.divf %414, %415 : vector<8x32xf32>
    %417 = vector.extract_strided_slice %397 {offsets = [0, 64], sizes = [8, 32], strides = [1, 1]} : vector<8x96xf32> to vector<8x32xf32>
    %418 = vector.extract_strided_slice %400 {offsets = [0, 64], sizes = [8, 32], strides = [1, 1]} : vector<8x96xf32> to vector<8x32xf32>
    %419 = arith.mulf %408, %418 : vector<8x32xf32>
    %420 = arith.addf %417, %419 : vector<8x32xf32>
    %421 = math.tanh %420 : vector<8x32xf32>
    %cst_95 = arith.constant 1.000000e+00 : f32
    %422 = vector.broadcast %cst_95 : f32 to vector<8x32xf32>
    %423 = arith.subf %422, %416 : vector<8x32xf32>
    %424 = arith.mulf %423, %421 : vector<8x32xf32>
    %425 = arith.mulf %416, %364 : vector<8x32xf32>
    %426 = arith.addf %424, %425 : vector<8x32xf32>
    %427 = vector.extract_strided_slice %14 {offsets = [8, 0], sizes = [8, 96], strides = [1, 1]} : vector<64x96xf32> to vector<8x96xf32>
    %cst_96 = arith.constant dense<0.000000e+00> : vector<8x96xf32>
    %428 = tpu.matmul %394, %18, %cst_96 {dimension_numbers = #tpu.dot_dimension_numbers<[1], [0], [0], [1], [0, 0, 1, 1], [], []>} : vector<8x32xf32>, vector<32x96xf32>, vector<8x96xf32> -> vector<8x96xf32>
    %429 = vector.broadcast %22 : vector<1x96xf32> to vector<8x96xf32>
    %430 = arith.addf %428, %429 : vector<8x96xf32>
    %431 = vector.extract_strided_slice %427 {offsets = [0, 0], sizes = [8, 32], strides = [1, 1]} : vector<8x96xf32> to vector<8x32xf32>
    %432 = vector.extract_strided_slice %430 {offsets = [0, 0], sizes = [8, 32], strides = [1, 1]} : vector<8x96xf32> to vector<8x32xf32>
    %433 = arith.addf %431, %432 : vector<8x32xf32>
    %434 = arith.negf %433 : vector<8x32xf32>
    %435 = math.exp %434 : vector<8x32xf32>
    %cst_97 = arith.constant 1.000000e+00 : f32
    %436 = vector.broadcast %cst_97 : f32 to vector<8x32xf32>
    %437 = arith.addf %436, %435 : vector<8x32xf32>
    %438 = arith.divf %436, %437 : vector<8x32xf32>
    %439 = vector.extract_strided_slice %427 {offsets = [0, 32], sizes = [8, 32], strides = [1, 1]} : vector<8x96xf32> to vector<8x32xf32>
    %440 = vector.extract_strided_slice %430 {offsets = [0, 32], sizes = [8, 32], strides = [1, 1]} : vector<8x96xf32> to vector<8x32xf32>
    %441 = arith.addf %439, %440 : vector<8x32xf32>
    %442 = arith.negf %441 : vector<8x32xf32>
    %443 = math.exp %442 : vector<8x32xf32>
    %cst_98 = arith.constant 1.000000e+00 : f32
    %444 = vector.broadcast %cst_98 : f32 to vector<8x32xf32>
    %445 = arith.addf %444, %443 : vector<8x32xf32>
    %446 = arith.divf %444, %445 : vector<8x32xf32>
    %447 = vector.extract_strided_slice %427 {offsets = [0, 64], sizes = [8, 32], strides = [1, 1]} : vector<8x96xf32> to vector<8x32xf32>
    %448 = vector.extract_strided_slice %430 {offsets = [0, 64], sizes = [8, 32], strides = [1, 1]} : vector<8x96xf32> to vector<8x32xf32>
    %449 = arith.mulf %438, %448 : vector<8x32xf32>
    %450 = arith.addf %447, %449 : vector<8x32xf32>
    %451 = math.tanh %450 : vector<8x32xf32>
    %cst_99 = arith.constant 1.000000e+00 : f32
    %452 = vector.broadcast %cst_99 : f32 to vector<8x32xf32>
    %453 = arith.subf %452, %446 : vector<8x32xf32>
    %454 = arith.mulf %453, %451 : vector<8x32xf32>
    %455 = arith.mulf %446, %394 : vector<8x32xf32>
    %456 = arith.addf %454, %455 : vector<8x32xf32>
    %c48_100 = arith.constant 48 : index
    %c0_101 = arith.constant 0 : index
    %457 = vector.load %arg10[%c48_100, %c0_101] : memref<64x64xf32, #tpu.memory_space<vmem>>, vector<8x32xf32>
    tpu.vector_store %arg10[%c48_100, %c0_101], %426 {strides = array<i32>} : memref<64x64xf32, #tpu.memory_space<vmem>>, vector<8x32xf32>,
    %c8_102 = arith.constant 8 : index
    %c32_103 = arith.constant 32 : index
    %458 = vector.load %arg10[%c8_102, %c32_103] : memref<64x64xf32, #tpu.memory_space<vmem>>, vector<8x32xf32>
    tpu.vector_store %arg10[%c8_102, %c32_103], %456 {strides = array<i32>} : memref<64x64xf32, #tpu.memory_space<vmem>>, vector<8x32xf32>,
    %459 = vector.extract_strided_slice %7 {offsets = [56, 0], sizes = [8, 96], strides = [1, 1]} : vector<64x96xf32> to vector<8x96xf32>
    %cst_104 = arith.constant dense<0.000000e+00> : vector<8x96xf32>
    %460 = tpu.matmul %426, %16, %cst_104 {dimension_numbers = #tpu.dot_dimension_numbers<[1], [0], [0], [1], [0, 0, 1, 1], [], []>} : vector<8x32xf32>, vector<32x96xf32>, vector<8x96xf32> -> vector<8x96xf32>
    %461 = vector.broadcast %20 : vector<1x96xf32> to vector<8x96xf32>
    %462 = arith.addf %460, %461 : vector<8x96xf32>
    %463 = vector.extract_strided_slice %459 {offsets = [0, 0], sizes = [8, 32], strides = [1, 1]} : vector<8x96xf32> to vector<8x32xf32>
    %464 = vector.extract_strided_slice %462 {offsets = [0, 0], sizes = [8, 32], strides = [1, 1]} : vector<8x96xf32> to vector<8x32xf32>
    %465 = arith.addf %463, %464 : vector<8x32xf32>
    %466 = arith.negf %465 : vector<8x32xf32>
    %467 = math.exp %466 : vector<8x32xf32>
    %cst_105 = arith.constant 1.000000e+00 : f32
    %468 = vector.broadcast %cst_105 : f32 to vector<8x32xf32>
    %469 = arith.addf %468, %467 : vector<8x32xf32>
    %470 = arith.divf %468, %469 : vector<8x32xf32>
    %471 = vector.extract_strided_slice %459 {offsets = [0, 32], sizes = [8, 32], strides = [1, 1]} : vector<8x96xf32> to vector<8x32xf32>
    %472 = vector.extract_strided_slice %462 {offsets = [0, 32], sizes = [8, 32], strides = [1, 1]} : vector<8x96xf32> to vector<8x32xf32>
    %473 = arith.addf %471, %472 : vector<8x32xf32>
    %474 = arith.negf %473 : vector<8x32xf32>
    %475 = math.exp %474 : vector<8x32xf32>
    %cst_106 = arith.constant 1.000000e+00 : f32
    %476 = vector.broadcast %cst_106 : f32 to vector<8x32xf32>
    %477 = arith.addf %476, %475 : vector<8x32xf32>
    %478 = arith.divf %476, %477 : vector<8x32xf32>
    %479 = vector.extract_strided_slice %459 {offsets = [0, 64], sizes = [8, 32], strides = [1, 1]} : vector<8x96xf32> to vector<8x32xf32>
    %480 = vector.extract_strided_slice %462 {offsets = [0, 64], sizes = [8, 32], strides = [1, 1]} : vector<8x96xf32> to vector<8x32xf32>
    %481 = arith.mulf %470, %480 : vector<8x32xf32>
    %482 = arith.addf %479, %481 : vector<8x32xf32>
    %483 = math.tanh %482 : vector<8x32xf32>
    %cst_107 = arith.constant 1.000000e+00 : f32
    %484 = vector.broadcast %cst_107 : f32 to vector<8x32xf32>
    %485 = arith.subf %484, %478 : vector<8x32xf32>
    %486 = arith.mulf %485, %483 : vector<8x32xf32>
    %487 = arith.mulf %478, %426 : vector<8x32xf32>
    %488 = arith.addf %486, %487 : vector<8x32xf32>
    %489 = vector.extract_strided_slice %14 {offsets = [0, 0], sizes = [8, 96], strides = [1, 1]} : vector<64x96xf32> to vector<8x96xf32>
    %cst_108 = arith.constant dense<0.000000e+00> : vector<8x96xf32>
    %490 = tpu.matmul %456, %18, %cst_108 {dimension_numbers = #tpu.dot_dimension_numbers<[1], [0], [0], [1], [0, 0, 1, 1], [], []>} : vector<8x32xf32>, vector<32x96xf32>, vector<8x96xf32> -> vector<8x96xf32>
    %491 = vector.broadcast %22 : vector<1x96xf32> to vector<8x96xf32>
    %492 = arith.addf %490, %491 : vector<8x96xf32>
    %493 = vector.extract_strided_slice %489 {offsets = [0, 0], sizes = [8, 32], strides = [1, 1]} : vector<8x96xf32> to vector<8x32xf32>
    %494 = vector.extract_strided_slice %492 {offsets = [0, 0], sizes = [8, 32], strides = [1, 1]} : vector<8x96xf32> to vector<8x32xf32>
    %495 = arith.addf %493, %494 : vector<8x32xf32>
    %496 = arith.negf %495 : vector<8x32xf32>
    %497 = math.exp %496 : vector<8x32xf32>
    %cst_109 = arith.constant 1.000000e+00 : f32
    %498 = vector.broadcast %cst_109 : f32 to vector<8x32xf32>
    %499 = arith.addf %498, %497 : vector<8x32xf32>
    %500 = arith.divf %498, %499 : vector<8x32xf32>
    %501 = vector.extract_strided_slice %489 {offsets = [0, 32], sizes = [8, 32], strides = [1, 1]} : vector<8x96xf32> to vector<8x32xf32>
    %502 = vector.extract_strided_slice %492 {offsets = [0, 32], sizes = [8, 32], strides = [1, 1]} : vector<8x96xf32> to vector<8x32xf32>
    %503 = arith.addf %501, %502 : vector<8x32xf32>
    %504 = arith.negf %503 : vector<8x32xf32>
    %505 = math.exp %504 : vector<8x32xf32>
    %cst_110 = arith.constant 1.000000e+00 : f32
    %506 = vector.broadcast %cst_110 : f32 to vector<8x32xf32>
    %507 = arith.addf %506, %505 : vector<8x32xf32>
    %508 = arith.divf %506, %507 : vector<8x32xf32>
    %509 = vector.extract_strided_slice %489 {offsets = [0, 64], sizes = [8, 32], strides = [1, 1]} : vector<8x96xf32> to vector<8x32xf32>
    %510 = vector.extract_strided_slice %492 {offsets = [0, 64], sizes = [8, 32], strides = [1, 1]} : vector<8x96xf32> to vector<8x32xf32>
    %511 = arith.mulf %500, %510 : vector<8x32xf32>
    %512 = arith.addf %509, %511 : vector<8x32xf32>
    %513 = math.tanh %512 : vector<8x32xf32>
    %cst_111 = arith.constant 1.000000e+00 : f32
    %514 = vector.broadcast %cst_111 : f32 to vector<8x32xf32>
    %515 = arith.subf %514, %508 : vector<8x32xf32>
    %516 = arith.mulf %515, %513 : vector<8x32xf32>
    %517 = arith.mulf %508, %456 : vector<8x32xf32>
    %518 = arith.addf %516, %517 : vector<8x32xf32>
    %c56_112 = arith.constant 56 : index
    %c0_113 = arith.constant 0 : index
    %519 = vector.load %arg10[%c56_112, %c0_113] : memref<64x64xf32, #tpu.memory_space<vmem>>, vector<8x32xf32>
    tpu.vector_store %arg10[%c56_112, %c0_113], %488 {strides = array<i32>} : memref<64x64xf32, #tpu.memory_space<vmem>>, vector<8x32xf32>,
    %c0_114 = arith.constant 0 : index
    %c32_115 = arith.constant 32 : index
    %520 = vector.load %arg10[%c0_114, %c32_115] : memref<64x64xf32, #tpu.memory_space<vmem>>, vector<8x32xf32>
    tpu.vector_store %arg10[%c0_114, %c32_115], %518 {strides = array<i32>} : memref<64x64xf32, #tpu.memory_space<vmem>>, vector<8x32xf32>,
    %c0_116 = arith.constant 0 : index
    %c0_117 = arith.constant 0 : index
    %c0_118 = arith.constant 0 : index
    %521 = vector.load %arg11[%c0_116, %c0_117, %c0_118] : memref<4x8x32xf32, #tpu.memory_space<vmem>>, vector<1x8x32xf32>
    %522 = vector.shape_cast %521 : vector<1x8x32xf32> to vector<8x32xf32>
    %523 = vector.shape_cast %488 : vector<8x32xf32> to vector<1x8x32xf32>
    tpu.vector_store %arg11[%c0_116, %c0_117, %c0_118], %523 {strides = array<i32>} : memref<4x8x32xf32, #tpu.memory_space<vmem>>, vector<1x8x32xf32>,
    %c1_119 = arith.constant 1 : index
    %c0_120 = arith.constant 0 : index
    %c0_121 = arith.constant 0 : index
    %524 = vector.load %arg11[%c1_119, %c0_120, %c0_121] : memref<4x8x32xf32, #tpu.memory_space<vmem>>, vector<1x8x32xf32>
    %525 = vector.shape_cast %524 : vector<1x8x32xf32> to vector<8x32xf32>
    %526 = vector.shape_cast %518 : vector<8x32xf32> to vector<1x8x32xf32>
    tpu.vector_store %arg11[%c1_119, %c0_120, %c0_121], %526 {strides = array<i32>} : memref<4x8x32xf32, #tpu.memory_space<vmem>>, vector<1x8x32xf32>,
    %c0_122 = arith.constant 0 : index
    %c0_123 = arith.constant 0 : index
    %527 = vector.load %arg10[%c0_122, %c0_123] : memref<64x64xf32, #tpu.memory_space<vmem>>, vector<64x64xf32>
    %c0_124 = arith.constant 0 : index
    %c0_125 = arith.constant 0 : index
    %c0_126 = arith.constant 0 : index
    %528 = vector.load %arg6[%c0_124, %c0_125, %c0_126] : memref<2x64x96xf32, #tpu.memory_space<vmem>>, vector<1x64x96xf32>
    %529 = vector.shape_cast %528 : vector<1x64x96xf32> to vector<64x96xf32>
    %cst_127 = arith.constant dense<0.000000e+00> : vector<64x96xf32>
    %530 = tpu.matmul %527, %529, %cst_127 {dimension_numbers = #tpu.dot_dimension_numbers<[1], [0], [0], [1], [0, 0, 1, 1], [], []>} : vector<64x64xf32>, vector<64x96xf32>, vector<64x96xf32> -> vector<64x96xf32>
    %c0_128 = arith.constant 0 : index
    %c0_129 = arith.constant 0 : index
    %c0_130 = arith.constant 0 : index
    %531 = vector.load %arg8[%c0_128, %c0_129, %c0_130] : memref<2x1x96xf32, #tpu.memory_space<vmem>>, vector<1x1x96xf32>
    %532 = vector.shape_cast %531 : vector<1x1x96xf32> to vector<1x96xf32>
    %533 = vector.broadcast %532 : vector<1x96xf32> to vector<64x96xf32>
    %534 = arith.addf %530, %533 : vector<64x96xf32>
    %c1_131 = arith.constant 1 : index
    %c0_132 = arith.constant 0 : index
    %c0_133 = arith.constant 0 : index
    %535 = vector.load %arg6[%c1_131, %c0_132, %c0_133] : memref<2x64x96xf32, #tpu.memory_space<vmem>>, vector<1x64x96xf32>
    %536 = vector.shape_cast %535 : vector<1x64x96xf32> to vector<64x96xf32>
    %cst_134 = arith.constant dense<0.000000e+00> : vector<64x96xf32>
    %537 = tpu.matmul %527, %536, %cst_134 {dimension_numbers = #tpu.dot_dimension_numbers<[1], [0], [0], [1], [0, 0, 1, 1], [], []>} : vector<64x64xf32>, vector<64x96xf32>, vector<64x96xf32> -> vector<64x96xf32>
    %c1_135 = arith.constant 1 : index
    %c0_136 = arith.constant 0 : index
    %c0_137 = arith.constant 0 : index
    %538 = vector.load %arg8[%c1_135, %c0_136, %c0_137] : memref<2x1x96xf32, #tpu.memory_space<vmem>>, vector<1x1x96xf32>
    %539 = vector.shape_cast %538 : vector<1x1x96xf32> to vector<1x96xf32>
    %540 = vector.broadcast %539 : vector<1x96xf32> to vector<64x96xf32>
    %541 = arith.addf %537, %540 : vector<64x96xf32>
    %c0_138 = arith.constant 0 : index
    %c0_139 = arith.constant 0 : index
    %c0_140 = arith.constant 0 : index
    %542 = vector.load %arg7[%c0_138, %c0_139, %c0_140] : memref<2x32x96xf32, #tpu.memory_space<vmem>>, vector<1x32x96xf32>
    %543 = vector.shape_cast %542 : vector<1x32x96xf32> to vector<32x96xf32>
    %c1_141 = arith.constant 1 : index
    %c0_142 = arith.constant 0 : index
    %c0_143 = arith.constant 0 : index
    %544 = vector.load %arg7[%c1_141, %c0_142, %c0_143] : memref<2x32x96xf32, #tpu.memory_space<vmem>>, vector<1x32x96xf32>
    %545 = vector.shape_cast %544 : vector<1x32x96xf32> to vector<32x96xf32>
    %c0_144 = arith.constant 0 : index
    %c0_145 = arith.constant 0 : index
    %c0_146 = arith.constant 0 : index
    %546 = vector.load %arg9[%c0_144, %c0_145, %c0_146] : memref<2x1x96xf32, #tpu.memory_space<vmem>>, vector<1x1x96xf32>
    %547 = vector.shape_cast %546 : vector<1x1x96xf32> to vector<1x96xf32>
    %c1_147 = arith.constant 1 : index
    %c0_148 = arith.constant 0 : index
    %c0_149 = arith.constant 0 : index
    %548 = vector.load %arg9[%c1_147, %c0_148, %c0_149] : memref<2x1x96xf32, #tpu.memory_space<vmem>>, vector<1x1x96xf32>
    %549 = vector.shape_cast %548 : vector<1x1x96xf32> to vector<1x96xf32>
    %cst_150 = arith.constant 0.000000e+00 : f32
    %550 = vector.broadcast %cst_150 : f32 to vector<8x32xf32>
    %cst_151 = arith.constant 0.000000e+00 : f32
    %551 = vector.broadcast %cst_151 : f32 to vector<8x32xf32>
    %552 = vector.extract_strided_slice %534 {offsets = [0, 0], sizes = [8, 96], strides = [1, 1]} : vector<64x96xf32> to vector<8x96xf32>
    %cst_152 = arith.constant dense<0.000000e+00> : vector<8x96xf32>
    %553 = tpu.matmul %550, %543, %cst_152 {dimension_numbers = #tpu.dot_dimension_numbers<[1], [0], [0], [1], [0, 0, 1, 1], [], []>} : vector<8x32xf32>, vector<32x96xf32>, vector<8x96xf32> -> vector<8x96xf32>
    %554 = vector.broadcast %547 : vector<1x96xf32> to vector<8x96xf32>
    %555 = arith.addf %553, %554 : vector<8x96xf32>
    %556 = vector.extract_strided_slice %552 {offsets = [0, 0], sizes = [8, 32], strides = [1, 1]} : vector<8x96xf32> to vector<8x32xf32>
    %557 = vector.extract_strided_slice %555 {offsets = [0, 0], sizes = [8, 32], strides = [1, 1]} : vector<8x96xf32> to vector<8x32xf32>
    %558 = arith.addf %556, %557 : vector<8x32xf32>
    %559 = arith.negf %558 : vector<8x32xf32>
    %560 = math.exp %559 : vector<8x32xf32>
    %cst_153 = arith.constant 1.000000e+00 : f32
    %561 = vector.broadcast %cst_153 : f32 to vector<8x32xf32>
    %562 = arith.addf %561, %560 : vector<8x32xf32>
    %563 = arith.divf %561, %562 : vector<8x32xf32>
    %564 = vector.extract_strided_slice %552 {offsets = [0, 32], sizes = [8, 32], strides = [1, 1]} : vector<8x96xf32> to vector<8x32xf32>
    %565 = vector.extract_strided_slice %555 {offsets = [0, 32], sizes = [8, 32], strides = [1, 1]} : vector<8x96xf32> to vector<8x32xf32>
    %566 = arith.addf %564, %565 : vector<8x32xf32>
    %567 = arith.negf %566 : vector<8x32xf32>
    %568 = math.exp %567 : vector<8x32xf32>
    %cst_154 = arith.constant 1.000000e+00 : f32
    %569 = vector.broadcast %cst_154 : f32 to vector<8x32xf32>
    %570 = arith.addf %569, %568 : vector<8x32xf32>
    %571 = arith.divf %569, %570 : vector<8x32xf32>
    %572 = vector.extract_strided_slice %552 {offsets = [0, 64], sizes = [8, 32], strides = [1, 1]} : vector<8x96xf32> to vector<8x32xf32>
    %573 = vector.extract_strided_slice %555 {offsets = [0, 64], sizes = [8, 32], strides = [1, 1]} : vector<8x96xf32> to vector<8x32xf32>
    %574 = arith.mulf %563, %573 : vector<8x32xf32>
    %575 = arith.addf %572, %574 : vector<8x32xf32>
    %576 = math.tanh %575 : vector<8x32xf32>
    %cst_155 = arith.constant 1.000000e+00 : f32
    %577 = vector.broadcast %cst_155 : f32 to vector<8x32xf32>
    %578 = arith.subf %577, %571 : vector<8x32xf32>
    %579 = arith.mulf %578, %576 : vector<8x32xf32>
    %580 = arith.mulf %571, %550 : vector<8x32xf32>
    %581 = arith.addf %579, %580 : vector<8x32xf32>
    %582 = vector.extract_strided_slice %541 {offsets = [56, 0], sizes = [8, 96], strides = [1, 1]} : vector<64x96xf32> to vector<8x96xf32>
    %cst_156 = arith.constant dense<0.000000e+00> : vector<8x96xf32>
    %583 = tpu.matmul %551, %545, %cst_156 {dimension_numbers = #tpu.dot_dimension_numbers<[1], [0], [0], [1], [0, 0, 1, 1], [], []>} : vector<8x32xf32>, vector<32x96xf32>, vector<8x96xf32> -> vector<8x96xf32>
    %584 = vector.broadcast %549 : vector<1x96xf32> to vector<8x96xf32>
    %585 = arith.addf %583, %584 : vector<8x96xf32>
    %586 = vector.extract_strided_slice %582 {offsets = [0, 0], sizes = [8, 32], strides = [1, 1]} : vector<8x96xf32> to vector<8x32xf32>
    %587 = vector.extract_strided_slice %585 {offsets = [0, 0], sizes = [8, 32], strides = [1, 1]} : vector<8x96xf32> to vector<8x32xf32>
    %588 = arith.addf %586, %587 : vector<8x32xf32>
    %589 = arith.negf %588 : vector<8x32xf32>
    %590 = math.exp %589 : vector<8x32xf32>
    %cst_157 = arith.constant 1.000000e+00 : f32
    %591 = vector.broadcast %cst_157 : f32 to vector<8x32xf32>
    %592 = arith.addf %591, %590 : vector<8x32xf32>
    %593 = arith.divf %591, %592 : vector<8x32xf32>
    %594 = vector.extract_strided_slice %582 {offsets = [0, 32], sizes = [8, 32], strides = [1, 1]} : vector<8x96xf32> to vector<8x32xf32>
    %595 = vector.extract_strided_slice %585 {offsets = [0, 32], sizes = [8, 32], strides = [1, 1]} : vector<8x96xf32> to vector<8x32xf32>
    %596 = arith.addf %594, %595 : vector<8x32xf32>
    %597 = arith.negf %596 : vector<8x32xf32>
    %598 = math.exp %597 : vector<8x32xf32>
    %cst_158 = arith.constant 1.000000e+00 : f32
    %599 = vector.broadcast %cst_158 : f32 to vector<8x32xf32>
    %600 = arith.addf %599, %598 : vector<8x32xf32>
    %601 = arith.divf %599, %600 : vector<8x32xf32>
    %602 = vector.extract_strided_slice %582 {offsets = [0, 64], sizes = [8, 32], strides = [1, 1]} : vector<8x96xf32> to vector<8x32xf32>
    %603 = vector.extract_strided_slice %585 {offsets = [0, 64], sizes = [8, 32], strides = [1, 1]} : vector<8x96xf32> to vector<8x32xf32>
    %604 = arith.mulf %593, %603 : vector<8x32xf32>
    %605 = arith.addf %602, %604 : vector<8x32xf32>
    %606 = math.tanh %605 : vector<8x32xf32>
    %cst_159 = arith.constant 1.000000e+00 : f32
    %607 = vector.broadcast %cst_159 : f32 to vector<8x32xf32>
    %608 = arith.subf %607, %601 : vector<8x32xf32>
    %609 = arith.mulf %608, %606 : vector<8x32xf32>
    %610 = arith.mulf %601, %551 : vector<8x32xf32>
    %611 = arith.addf %609, %610 : vector<8x32xf32>
    %c0_160 = arith.constant 0 : index
    %c0_161 = arith.constant 0 : index
    %612 = vector.load %arg10[%c0_160, %c0_161] : memref<64x64xf32, #tpu.memory_space<vmem>>, vector<8x32xf32>
    tpu.vector_store %arg10[%c0_160, %c0_161], %581 {strides = array<i32>} : memref<64x64xf32, #tpu.memory_space<vmem>>, vector<8x32xf32>,
    %c56_162 = arith.constant 56 : index
    %c32_163 = arith.constant 32 : index
    %613 = vector.load %arg10[%c56_162, %c32_163] : memref<64x64xf32, #tpu.memory_space<vmem>>, vector<8x32xf32>
    tpu.vector_store %arg10[%c56_162, %c32_163], %611 {strides = array<i32>} : memref<64x64xf32, #tpu.memory_space<vmem>>, vector<8x32xf32>,
    %614 = vector.extract_strided_slice %534 {offsets = [8, 0], sizes = [8, 96], strides = [1, 1]} : vector<64x96xf32> to vector<8x96xf32>
    %cst_164 = arith.constant dense<0.000000e+00> : vector<8x96xf32>
    %615 = tpu.matmul %581, %543, %cst_164 {dimension_numbers = #tpu.dot_dimension_numbers<[1], [0], [0], [1], [0, 0, 1, 1], [], []>} : vector<8x32xf32>, vector<32x96xf32>, vector<8x96xf32> -> vector<8x96xf32>
    %616 = vector.broadcast %547 : vector<1x96xf32> to vector<8x96xf32>
    %617 = arith.addf %615, %616 : vector<8x96xf32>
    %618 = vector.extract_strided_slice %614 {offsets = [0, 0], sizes = [8, 32], strides = [1, 1]} : vector<8x96xf32> to vector<8x32xf32>
    %619 = vector.extract_strided_slice %617 {offsets = [0, 0], sizes = [8, 32], strides = [1, 1]} : vector<8x96xf32> to vector<8x32xf32>
    %620 = arith.addf %618, %619 : vector<8x32xf32>
    %621 = arith.negf %620 : vector<8x32xf32>
    %622 = math.exp %621 : vector<8x32xf32>
    %cst_165 = arith.constant 1.000000e+00 : f32
    %623 = vector.broadcast %cst_165 : f32 to vector<8x32xf32>
    %624 = arith.addf %623, %622 : vector<8x32xf32>
    %625 = arith.divf %623, %624 : vector<8x32xf32>
    %626 = vector.extract_strided_slice %614 {offsets = [0, 32], sizes = [8, 32], strides = [1, 1]} : vector<8x96xf32> to vector<8x32xf32>
    %627 = vector.extract_strided_slice %617 {offsets = [0, 32], sizes = [8, 32], strides = [1, 1]} : vector<8x96xf32> to vector<8x32xf32>
    %628 = arith.addf %626, %627 : vector<8x32xf32>
    %629 = arith.negf %628 : vector<8x32xf32>
    %630 = math.exp %629 : vector<8x32xf32>
    %cst_166 = arith.constant 1.000000e+00 : f32
    %631 = vector.broadcast %cst_166 : f32 to vector<8x32xf32>
    %632 = arith.addf %631, %630 : vector<8x32xf32>
    %633 = arith.divf %631, %632 : vector<8x32xf32>
    %634 = vector.extract_strided_slice %614 {offsets = [0, 64], sizes = [8, 32], strides = [1, 1]} : vector<8x96xf32> to vector<8x32xf32>
    %635 = vector.extract_strided_slice %617 {offsets = [0, 64], sizes = [8, 32], strides = [1, 1]} : vector<8x96xf32> to vector<8x32xf32>
    %636 = arith.mulf %625, %635 : vector<8x32xf32>
    %637 = arith.addf %634, %636 : vector<8x32xf32>
    %638 = math.tanh %637 : vector<8x32xf32>
    %cst_167 = arith.constant 1.000000e+00 : f32
    %639 = vector.broadcast %cst_167 : f32 to vector<8x32xf32>
    %640 = arith.subf %639, %633 : vector<8x32xf32>
    %641 = arith.mulf %640, %638 : vector<8x32xf32>
    %642 = arith.mulf %633, %581 : vector<8x32xf32>
    %643 = arith.addf %641, %642 : vector<8x32xf32>
    %644 = vector.extract_strided_slice %541 {offsets = [48, 0], sizes = [8, 96], strides = [1, 1]} : vector<64x96xf32> to vector<8x96xf32>
    %cst_168 = arith.constant dense<0.000000e+00> : vector<8x96xf32>
    %645 = tpu.matmul %611, %545, %cst_168 {dimension_numbers = #tpu.dot_dimension_numbers<[1], [0], [0], [1], [0, 0, 1, 1], [], []>} : vector<8x32xf32>, vector<32x96xf32>, vector<8x96xf32> -> vector<8x96xf32>
    %646 = vector.broadcast %549 : vector<1x96xf32> to vector<8x96xf32>
    %647 = arith.addf %645, %646 : vector<8x96xf32>
    %648 = vector.extract_strided_slice %644 {offsets = [0, 0], sizes = [8, 32], strides = [1, 1]} : vector<8x96xf32> to vector<8x32xf32>
    %649 = vector.extract_strided_slice %647 {offsets = [0, 0], sizes = [8, 32], strides = [1, 1]} : vector<8x96xf32> to vector<8x32xf32>
    %650 = arith.addf %648, %649 : vector<8x32xf32>
    %651 = arith.negf %650 : vector<8x32xf32>
    %652 = math.exp %651 : vector<8x32xf32>
    %cst_169 = arith.constant 1.000000e+00 : f32
    %653 = vector.broadcast %cst_169 : f32 to vector<8x32xf32>
    %654 = arith.addf %653, %652 : vector<8x32xf32>
    %655 = arith.divf %653, %654 : vector<8x32xf32>
    %656 = vector.extract_strided_slice %644 {offsets = [0, 32], sizes = [8, 32], strides = [1, 1]} : vector<8x96xf32> to vector<8x32xf32>
    %657 = vector.extract_strided_slice %647 {offsets = [0, 32], sizes = [8, 32], strides = [1, 1]} : vector<8x96xf32> to vector<8x32xf32>
    %658 = arith.addf %656, %657 : vector<8x32xf32>
    %659 = arith.negf %658 : vector<8x32xf32>
    %660 = math.exp %659 : vector<8x32xf32>
    %cst_170 = arith.constant 1.000000e+00 : f32
    %661 = vector.broadcast %cst_170 : f32 to vector<8x32xf32>
    %662 = arith.addf %661, %660 : vector<8x32xf32>
    %663 = arith.divf %661, %662 : vector<8x32xf32>
    %664 = vector.extract_strided_slice %644 {offsets = [0, 64], sizes = [8, 32], strides = [1, 1]} : vector<8x96xf32> to vector<8x32xf32>
    %665 = vector.extract_strided_slice %647 {offsets = [0, 64], sizes = [8, 32], strides = [1, 1]} : vector<8x96xf32> to vector<8x32xf32>
    %666 = arith.mulf %655, %665 : vector<8x32xf32>
    %667 = arith.addf %664, %666 : vector<8x32xf32>
    %668 = math.tanh %667 : vector<8x32xf32>
    %cst_171 = arith.constant 1.000000e+00 : f32
    %669 = vector.broadcast %cst_171 : f32 to vector<8x32xf32>
    %670 = arith.subf %669, %663 : vector<8x32xf32>
    %671 = arith.mulf %670, %668 : vector<8x32xf32>
    %672 = arith.mulf %663, %611 : vector<8x32xf32>
    %673 = arith.addf %671, %672 : vector<8x32xf32>
    %c8_172 = arith.constant 8 : index
    %c0_173 = arith.constant 0 : index
    %674 = vector.load %arg10[%c8_172, %c0_173] : memref<64x64xf32, #tpu.memory_space<vmem>>, vector<8x32xf32>
    tpu.vector_store %arg10[%c8_172, %c0_173], %643 {strides = array<i32>} : memref<64x64xf32, #tpu.memory_space<vmem>>, vector<8x32xf32>,
    %c48_174 = arith.constant 48 : index
    %c32_175 = arith.constant 32 : index
    %675 = vector.load %arg10[%c48_174, %c32_175] : memref<64x64xf32, #tpu.memory_space<vmem>>, vector<8x32xf32>
    tpu.vector_store %arg10[%c48_174, %c32_175], %673 {strides = array<i32>} : memref<64x64xf32, #tpu.memory_space<vmem>>, vector<8x32xf32>,
    %676 = vector.extract_strided_slice %534 {offsets = [16, 0], sizes = [8, 96], strides = [1, 1]} : vector<64x96xf32> to vector<8x96xf32>
    %cst_176 = arith.constant dense<0.000000e+00> : vector<8x96xf32>
    %677 = tpu.matmul %643, %543, %cst_176 {dimension_numbers = #tpu.dot_dimension_numbers<[1], [0], [0], [1], [0, 0, 1, 1], [], []>} : vector<8x32xf32>, vector<32x96xf32>, vector<8x96xf32> -> vector<8x96xf32>
    %678 = vector.broadcast %547 : vector<1x96xf32> to vector<8x96xf32>
    %679 = arith.addf %677, %678 : vector<8x96xf32>
    %680 = vector.extract_strided_slice %676 {offsets = [0, 0], sizes = [8, 32], strides = [1, 1]} : vector<8x96xf32> to vector<8x32xf32>
    %681 = vector.extract_strided_slice %679 {offsets = [0, 0], sizes = [8, 32], strides = [1, 1]} : vector<8x96xf32> to vector<8x32xf32>
    %682 = arith.addf %680, %681 : vector<8x32xf32>
    %683 = arith.negf %682 : vector<8x32xf32>
    %684 = math.exp %683 : vector<8x32xf32>
    %cst_177 = arith.constant 1.000000e+00 : f32
    %685 = vector.broadcast %cst_177 : f32 to vector<8x32xf32>
    %686 = arith.addf %685, %684 : vector<8x32xf32>
    %687 = arith.divf %685, %686 : vector<8x32xf32>
    %688 = vector.extract_strided_slice %676 {offsets = [0, 32], sizes = [8, 32], strides = [1, 1]} : vector<8x96xf32> to vector<8x32xf32>
    %689 = vector.extract_strided_slice %679 {offsets = [0, 32], sizes = [8, 32], strides = [1, 1]} : vector<8x96xf32> to vector<8x32xf32>
    %690 = arith.addf %688, %689 : vector<8x32xf32>
    %691 = arith.negf %690 : vector<8x32xf32>
    %692 = math.exp %691 : vector<8x32xf32>
    %cst_178 = arith.constant 1.000000e+00 : f32
    %693 = vector.broadcast %cst_178 : f32 to vector<8x32xf32>
    %694 = arith.addf %693, %692 : vector<8x32xf32>
    %695 = arith.divf %693, %694 : vector<8x32xf32>
    %696 = vector.extract_strided_slice %676 {offsets = [0, 64], sizes = [8, 32], strides = [1, 1]} : vector<8x96xf32> to vector<8x32xf32>
    %697 = vector.extract_strided_slice %679 {offsets = [0, 64], sizes = [8, 32], strides = [1, 1]} : vector<8x96xf32> to vector<8x32xf32>
    %698 = arith.mulf %687, %697 : vector<8x32xf32>
    %699 = arith.addf %696, %698 : vector<8x32xf32>
    %700 = math.tanh %699 : vector<8x32xf32>
    %cst_179 = arith.constant 1.000000e+00 : f32
    %701 = vector.broadcast %cst_179 : f32 to vector<8x32xf32>
    %702 = arith.subf %701, %695 : vector<8x32xf32>
    %703 = arith.mulf %702, %700 : vector<8x32xf32>
    %704 = arith.mulf %695, %643 : vector<8x32xf32>
    %705 = arith.addf %703, %704 : vector<8x32xf32>
    %706 = vector.extract_strided_slice %541 {offsets = [40, 0], sizes = [8, 96], strides = [1, 1]} : vector<64x96xf32> to vector<8x96xf32>
    %cst_180 = arith.constant dense<0.000000e+00> : vector<8x96xf32>
    %707 = tpu.matmul %673, %545, %cst_180 {dimension_numbers = #tpu.dot_dimension_numbers<[1], [0], [0], [1], [0, 0, 1, 1], [], []>} : vector<8x32xf32>, vector<32x96xf32>, vector<8x96xf32> -> vector<8x96xf32>
    %708 = vector.broadcast %549 : vector<1x96xf32> to vector<8x96xf32>
    %709 = arith.addf %707, %708 : vector<8x96xf32>
    %710 = vector.extract_strided_slice %706 {offsets = [0, 0], sizes = [8, 32], strides = [1, 1]} : vector<8x96xf32> to vector<8x32xf32>
    %711 = vector.extract_strided_slice %709 {offsets = [0, 0], sizes = [8, 32], strides = [1, 1]} : vector<8x96xf32> to vector<8x32xf32>
    %712 = arith.addf %710, %711 : vector<8x32xf32>
    %713 = arith.negf %712 : vector<8x32xf32>
    %714 = math.exp %713 : vector<8x32xf32>
    %cst_181 = arith.constant 1.000000e+00 : f32
    %715 = vector.broadcast %cst_181 : f32 to vector<8x32xf32>
    %716 = arith.addf %715, %714 : vector<8x32xf32>
    %717 = arith.divf %715, %716 : vector<8x32xf32>
    %718 = vector.extract_strided_slice %706 {offsets = [0, 32], sizes = [8, 32], strides = [1, 1]} : vector<8x96xf32> to vector<8x32xf32>
    %719 = vector.extract_strided_slice %709 {offsets = [0, 32], sizes = [8, 32], strides = [1, 1]} : vector<8x96xf32> to vector<8x32xf32>
    %720 = arith.addf %718, %719 : vector<8x32xf32>
    %721 = arith.negf %720 : vector<8x32xf32>
    %722 = math.exp %721 : vector<8x32xf32>
    %cst_182 = arith.constant 1.000000e+00 : f32
    %723 = vector.broadcast %cst_182 : f32 to vector<8x32xf32>
    %724 = arith.addf %723, %722 : vector<8x32xf32>
    %725 = arith.divf %723, %724 : vector<8x32xf32>
    %726 = vector.extract_strided_slice %706 {offsets = [0, 64], sizes = [8, 32], strides = [1, 1]} : vector<8x96xf32> to vector<8x32xf32>
    %727 = vector.extract_strided_slice %709 {offsets = [0, 64], sizes = [8, 32], strides = [1, 1]} : vector<8x96xf32> to vector<8x32xf32>
    %728 = arith.mulf %717, %727 : vector<8x32xf32>
    %729 = arith.addf %726, %728 : vector<8x32xf32>
    %730 = math.tanh %729 : vector<8x32xf32>
    %cst_183 = arith.constant 1.000000e+00 : f32
    %731 = vector.broadcast %cst_183 : f32 to vector<8x32xf32>
    %732 = arith.subf %731, %725 : vector<8x32xf32>
    %733 = arith.mulf %732, %730 : vector<8x32xf32>
    %734 = arith.mulf %725, %673 : vector<8x32xf32>
    %735 = arith.addf %733, %734 : vector<8x32xf32>
    %c16_184 = arith.constant 16 : index
    %c0_185 = arith.constant 0 : index
    %736 = vector.load %arg10[%c16_184, %c0_185] : memref<64x64xf32, #tpu.memory_space<vmem>>, vector<8x32xf32>
    tpu.vector_store %arg10[%c16_184, %c0_185], %705 {strides = array<i32>} : memref<64x64xf32, #tpu.memory_space<vmem>>, vector<8x32xf32>,
    %c40_186 = arith.constant 40 : index
    %c32_187 = arith.constant 32 : index
    %737 = vector.load %arg10[%c40_186, %c32_187] : memref<64x64xf32, #tpu.memory_space<vmem>>, vector<8x32xf32>
    tpu.vector_store %arg10[%c40_186, %c32_187], %735 {strides = array<i32>} : memref<64x64xf32, #tpu.memory_space<vmem>>, vector<8x32xf32>,
    %738 = vector.extract_strided_slice %534 {offsets = [24, 0], sizes = [8, 96], strides = [1, 1]} : vector<64x96xf32> to vector<8x96xf32>
    %cst_188 = arith.constant dense<0.000000e+00> : vector<8x96xf32>
    %739 = tpu.matmul %705, %543, %cst_188 {dimension_numbers = #tpu.dot_dimension_numbers<[1], [0], [0], [1], [0, 0, 1, 1], [], []>} : vector<8x32xf32>, vector<32x96xf32>, vector<8x96xf32> -> vector<8x96xf32>
    %740 = vector.broadcast %547 : vector<1x96xf32> to vector<8x96xf32>
    %741 = arith.addf %739, %740 : vector<8x96xf32>
    %742 = vector.extract_strided_slice %738 {offsets = [0, 0], sizes = [8, 32], strides = [1, 1]} : vector<8x96xf32> to vector<8x32xf32>
    %743 = vector.extract_strided_slice %741 {offsets = [0, 0], sizes = [8, 32], strides = [1, 1]} : vector<8x96xf32> to vector<8x32xf32>
    %744 = arith.addf %742, %743 : vector<8x32xf32>
    %745 = arith.negf %744 : vector<8x32xf32>
    %746 = math.exp %745 : vector<8x32xf32>
    %cst_189 = arith.constant 1.000000e+00 : f32
    %747 = vector.broadcast %cst_189 : f32 to vector<8x32xf32>
    %748 = arith.addf %747, %746 : vector<8x32xf32>
    %749 = arith.divf %747, %748 : vector<8x32xf32>
    %750 = vector.extract_strided_slice %738 {offsets = [0, 32], sizes = [8, 32], strides = [1, 1]} : vector<8x96xf32> to vector<8x32xf32>
    %751 = vector.extract_strided_slice %741 {offsets = [0, 32], sizes = [8, 32], strides = [1, 1]} : vector<8x96xf32> to vector<8x32xf32>
    %752 = arith.addf %750, %751 : vector<8x32xf32>
    %753 = arith.negf %752 : vector<8x32xf32>
    %754 = math.exp %753 : vector<8x32xf32>
    %cst_190 = arith.constant 1.000000e+00 : f32
    %755 = vector.broadcast %cst_190 : f32 to vector<8x32xf32>
    %756 = arith.addf %755, %754 : vector<8x32xf32>
    %757 = arith.divf %755, %756 : vector<8x32xf32>
    %758 = vector.extract_strided_slice %738 {offsets = [0, 64], sizes = [8, 32], strides = [1, 1]} : vector<8x96xf32> to vector<8x32xf32>
    %759 = vector.extract_strided_slice %741 {offsets = [0, 64], sizes = [8, 32], strides = [1, 1]} : vector<8x96xf32> to vector<8x32xf32>
    %760 = arith.mulf %749, %759 : vector<8x32xf32>
    %761 = arith.addf %758, %760 : vector<8x32xf32>
    %762 = math.tanh %761 : vector<8x32xf32>
    %cst_191 = arith.constant 1.000000e+00 : f32
    %763 = vector.broadcast %cst_191 : f32 to vector<8x32xf32>
    %764 = arith.subf %763, %757 : vector<8x32xf32>
    %765 = arith.mulf %764, %762 : vector<8x32xf32>
    %766 = arith.mulf %757, %705 : vector<8x32xf32>
    %767 = arith.addf %765, %766 : vector<8x32xf32>
    %768 = vector.extract_strided_slice %541 {offsets = [32, 0], sizes = [8, 96], strides = [1, 1]} : vector<64x96xf32> to vector<8x96xf32>
    %cst_192 = arith.constant dense<0.000000e+00> : vector<8x96xf32>
    %769 = tpu.matmul %735, %545, %cst_192 {dimension_numbers = #tpu.dot_dimension_numbers<[1], [0], [0], [1], [0, 0, 1, 1], [], []>} : vector<8x32xf32>, vector<32x96xf32>, vector<8x96xf32> -> vector<8x96xf32>
    %770 = vector.broadcast %549 : vector<1x96xf32> to vector<8x96xf32>
    %771 = arith.addf %769, %770 : vector<8x96xf32>
    %772 = vector.extract_strided_slice %768 {offsets = [0, 0], sizes = [8, 32], strides = [1, 1]} : vector<8x96xf32> to vector<8x32xf32>
    %773 = vector.extract_strided_slice %771 {offsets = [0, 0], sizes = [8, 32], strides = [1, 1]} : vector<8x96xf32> to vector<8x32xf32>
    %774 = arith.addf %772, %773 : vector<8x32xf32>
    %775 = arith.negf %774 : vector<8x32xf32>
    %776 = math.exp %775 : vector<8x32xf32>
    %cst_193 = arith.constant 1.000000e+00 : f32
    %777 = vector.broadcast %cst_193 : f32 to vector<8x32xf32>
    %778 = arith.addf %777, %776 : vector<8x32xf32>
    %779 = arith.divf %777, %778 : vector<8x32xf32>
    %780 = vector.extract_strided_slice %768 {offsets = [0, 32], sizes = [8, 32], strides = [1, 1]} : vector<8x96xf32> to vector<8x32xf32>
    %781 = vector.extract_strided_slice %771 {offsets = [0, 32], sizes = [8, 32], strides = [1, 1]} : vector<8x96xf32> to vector<8x32xf32>
    %782 = arith.addf %780, %781 : vector<8x32xf32>
    %783 = arith.negf %782 : vector<8x32xf32>
    %784 = math.exp %783 : vector<8x32xf32>
    %cst_194 = arith.constant 1.000000e+00 : f32
    %785 = vector.broadcast %cst_194 : f32 to vector<8x32xf32>
    %786 = arith.addf %785, %784 : vector<8x32xf32>
    %787 = arith.divf %785, %786 : vector<8x32xf32>
    %788 = vector.extract_strided_slice %768 {offsets = [0, 64], sizes = [8, 32], strides = [1, 1]} : vector<8x96xf32> to vector<8x32xf32>
    %789 = vector.extract_strided_slice %771 {offsets = [0, 64], sizes = [8, 32], strides = [1, 1]} : vector<8x96xf32> to vector<8x32xf32>
    %790 = arith.mulf %779, %789 : vector<8x32xf32>
    %791 = arith.addf %788, %790 : vector<8x32xf32>
    %792 = math.tanh %791 : vector<8x32xf32>
    %cst_195 = arith.constant 1.000000e+00 : f32
    %793 = vector.broadcast %cst_195 : f32 to vector<8x32xf32>
    %794 = arith.subf %793, %787 : vector<8x32xf32>
    %795 = arith.mulf %794, %792 : vector<8x32xf32>
    %796 = arith.mulf %787, %735 : vector<8x32xf32>
    %797 = arith.addf %795, %796 : vector<8x32xf32>
    %c24_196 = arith.constant 24 : index
    %c0_197 = arith.constant 0 : index
    %798 = vector.load %arg10[%c24_196, %c0_197] : memref<64x64xf32, #tpu.memory_space<vmem>>, vector<8x32xf32>
    tpu.vector_store %arg10[%c24_196, %c0_197], %767 {strides = array<i32>} : memref<64x64xf32, #tpu.memory_space<vmem>>, vector<8x32xf32>,
    %c32_198 = arith.constant 32 : index
    %c32_199 = arith.constant 32 : index
    %799 = vector.load %arg10[%c32_198, %c32_199] : memref<64x64xf32, #tpu.memory_space<vmem>>, vector<8x32xf32>
    tpu.vector_store %arg10[%c32_198, %c32_199], %797 {strides = array<i32>} : memref<64x64xf32, #tpu.memory_space<vmem>>, vector<8x32xf32>,
    %800 = vector.extract_strided_slice %534 {offsets = [32, 0], sizes = [8, 96], strides = [1, 1]} : vector<64x96xf32> to vector<8x96xf32>
    %cst_200 = arith.constant dense<0.000000e+00> : vector<8x96xf32>
    %801 = tpu.matmul %767, %543, %cst_200 {dimension_numbers = #tpu.dot_dimension_numbers<[1], [0], [0], [1], [0, 0, 1, 1], [], []>} : vector<8x32xf32>, vector<32x96xf32>, vector<8x96xf32> -> vector<8x96xf32>
    %802 = vector.broadcast %547 : vector<1x96xf32> to vector<8x96xf32>
    %803 = arith.addf %801, %802 : vector<8x96xf32>
    %804 = vector.extract_strided_slice %800 {offsets = [0, 0], sizes = [8, 32], strides = [1, 1]} : vector<8x96xf32> to vector<8x32xf32>
    %805 = vector.extract_strided_slice %803 {offsets = [0, 0], sizes = [8, 32], strides = [1, 1]} : vector<8x96xf32> to vector<8x32xf32>
    %806 = arith.addf %804, %805 : vector<8x32xf32>
    %807 = arith.negf %806 : vector<8x32xf32>
    %808 = math.exp %807 : vector<8x32xf32>
    %cst_201 = arith.constant 1.000000e+00 : f32
    %809 = vector.broadcast %cst_201 : f32 to vector<8x32xf32>
    %810 = arith.addf %809, %808 : vector<8x32xf32>
    %811 = arith.divf %809, %810 : vector<8x32xf32>
    %812 = vector.extract_strided_slice %800 {offsets = [0, 32], sizes = [8, 32], strides = [1, 1]} : vector<8x96xf32> to vector<8x32xf32>
    %813 = vector.extract_strided_slice %803 {offsets = [0, 32], sizes = [8, 32], strides = [1, 1]} : vector<8x96xf32> to vector<8x32xf32>
    %814 = arith.addf %812, %813 : vector<8x32xf32>
    %815 = arith.negf %814 : vector<8x32xf32>
    %816 = math.exp %815 : vector<8x32xf32>
    %cst_202 = arith.constant 1.000000e+00 : f32
    %817 = vector.broadcast %cst_202 : f32 to vector<8x32xf32>
    %818 = arith.addf %817, %816 : vector<8x32xf32>
    %819 = arith.divf %817, %818 : vector<8x32xf32>
    %820 = vector.extract_strided_slice %800 {offsets = [0, 64], sizes = [8, 32], strides = [1, 1]} : vector<8x96xf32> to vector<8x32xf32>
    %821 = vector.extract_strided_slice %803 {offsets = [0, 64], sizes = [8, 32], strides = [1, 1]} : vector<8x96xf32> to vector<8x32xf32>
    %822 = arith.mulf %811, %821 : vector<8x32xf32>
    %823 = arith.addf %820, %822 : vector<8x32xf32>
    %824 = math.tanh %823 : vector<8x32xf32>
    %cst_203 = arith.constant 1.000000e+00 : f32
    %825 = vector.broadcast %cst_203 : f32 to vector<8x32xf32>
    %826 = arith.subf %825, %819 : vector<8x32xf32>
    %827 = arith.mulf %826, %824 : vector<8x32xf32>
    %828 = arith.mulf %819, %767 : vector<8x32xf32>
    %829 = arith.addf %827, %828 : vector<8x32xf32>
    %830 = vector.extract_strided_slice %541 {offsets = [24, 0], sizes = [8, 96], strides = [1, 1]} : vector<64x96xf32> to vector<8x96xf32>
    %cst_204 = arith.constant dense<0.000000e+00> : vector<8x96xf32>
    %831 = tpu.matmul %797, %545, %cst_204 {dimension_numbers = #tpu.dot_dimension_numbers<[1], [0], [0], [1], [0, 0, 1, 1], [], []>} : vector<8x32xf32>, vector<32x96xf32>, vector<8x96xf32> -> vector<8x96xf32>
    %832 = vector.broadcast %549 : vector<1x96xf32> to vector<8x96xf32>
    %833 = arith.addf %831, %832 : vector<8x96xf32>
    %834 = vector.extract_strided_slice %830 {offsets = [0, 0], sizes = [8, 32], strides = [1, 1]} : vector<8x96xf32> to vector<8x32xf32>
    %835 = vector.extract_strided_slice %833 {offsets = [0, 0], sizes = [8, 32], strides = [1, 1]} : vector<8x96xf32> to vector<8x32xf32>
    %836 = arith.addf %834, %835 : vector<8x32xf32>
    %837 = arith.negf %836 : vector<8x32xf32>
    %838 = math.exp %837 : vector<8x32xf32>
    %cst_205 = arith.constant 1.000000e+00 : f32
    %839 = vector.broadcast %cst_205 : f32 to vector<8x32xf32>
    %840 = arith.addf %839, %838 : vector<8x32xf32>
    %841 = arith.divf %839, %840 : vector<8x32xf32>
    %842 = vector.extract_strided_slice %830 {offsets = [0, 32], sizes = [8, 32], strides = [1, 1]} : vector<8x96xf32> to vector<8x32xf32>
    %843 = vector.extract_strided_slice %833 {offsets = [0, 32], sizes = [8, 32], strides = [1, 1]} : vector<8x96xf32> to vector<8x32xf32>
    %844 = arith.addf %842, %843 : vector<8x32xf32>
    %845 = arith.negf %844 : vector<8x32xf32>
    %846 = math.exp %845 : vector<8x32xf32>
    %cst_206 = arith.constant 1.000000e+00 : f32
    %847 = vector.broadcast %cst_206 : f32 to vector<8x32xf32>
    %848 = arith.addf %847, %846 : vector<8x32xf32>
    %849 = arith.divf %847, %848 : vector<8x32xf32>
    %850 = vector.extract_strided_slice %830 {offsets = [0, 64], sizes = [8, 32], strides = [1, 1]} : vector<8x96xf32> to vector<8x32xf32>
    %851 = vector.extract_strided_slice %833 {offsets = [0, 64], sizes = [8, 32], strides = [1, 1]} : vector<8x96xf32> to vector<8x32xf32>
    %852 = arith.mulf %841, %851 : vector<8x32xf32>
    %853 = arith.addf %850, %852 : vector<8x32xf32>
    %854 = math.tanh %853 : vector<8x32xf32>
    %cst_207 = arith.constant 1.000000e+00 : f32
    %855 = vector.broadcast %cst_207 : f32 to vector<8x32xf32>
    %856 = arith.subf %855, %849 : vector<8x32xf32>
    %857 = arith.mulf %856, %854 : vector<8x32xf32>
    %858 = arith.mulf %849, %797 : vector<8x32xf32>
    %859 = arith.addf %857, %858 : vector<8x32xf32>
    %c32_208 = arith.constant 32 : index
    %c0_209 = arith.constant 0 : index
    %860 = vector.load %arg10[%c32_208, %c0_209] : memref<64x64xf32, #tpu.memory_space<vmem>>, vector<8x32xf32>
    tpu.vector_store %arg10[%c32_208, %c0_209], %829 {strides = array<i32>} : memref<64x64xf32, #tpu.memory_space<vmem>>, vector<8x32xf32>,
    %c24_210 = arith.constant 24 : index
    %c32_211 = arith.constant 32 : index
    %861 = vector.load %arg10[%c24_210, %c32_211] : memref<64x64xf32, #tpu.memory_space<vmem>>, vector<8x32xf32>
    tpu.vector_store %arg10[%c24_210, %c32_211], %859 {strides = array<i32>} : memref<64x64xf32, #tpu.memory_space<vmem>>, vector<8x32xf32>,
    %862 = vector.extract_strided_slice %534 {offsets = [40, 0], sizes = [8, 96], strides = [1, 1]} : vector<64x96xf32> to vector<8x96xf32>
    %cst_212 = arith.constant dense<0.000000e+00> : vector<8x96xf32>
    %863 = tpu.matmul %829, %543, %cst_212 {dimension_numbers = #tpu.dot_dimension_numbers<[1], [0], [0], [1], [0, 0, 1, 1], [], []>} : vector<8x32xf32>, vector<32x96xf32>, vector<8x96xf32> -> vector<8x96xf32>
    %864 = vector.broadcast %547 : vector<1x96xf32> to vector<8x96xf32>
    %865 = arith.addf %863, %864 : vector<8x96xf32>
    %866 = vector.extract_strided_slice %862 {offsets = [0, 0], sizes = [8, 32], strides = [1, 1]} : vector<8x96xf32> to vector<8x32xf32>
    %867 = vector.extract_strided_slice %865 {offsets = [0, 0], sizes = [8, 32], strides = [1, 1]} : vector<8x96xf32> to vector<8x32xf32>
    %868 = arith.addf %866, %867 : vector<8x32xf32>
    %869 = arith.negf %868 : vector<8x32xf32>
    %870 = math.exp %869 : vector<8x32xf32>
    %cst_213 = arith.constant 1.000000e+00 : f32
    %871 = vector.broadcast %cst_213 : f32 to vector<8x32xf32>
    %872 = arith.addf %871, %870 : vector<8x32xf32>
    %873 = arith.divf %871, %872 : vector<8x32xf32>
    %874 = vector.extract_strided_slice %862 {offsets = [0, 32], sizes = [8, 32], strides = [1, 1]} : vector<8x96xf32> to vector<8x32xf32>
    %875 = vector.extract_strided_slice %865 {offsets = [0, 32], sizes = [8, 32], strides = [1, 1]} : vector<8x96xf32> to vector<8x32xf32>
    %876 = arith.addf %874, %875 : vector<8x32xf32>
    %877 = arith.negf %876 : vector<8x32xf32>
    %878 = math.exp %877 : vector<8x32xf32>
    %cst_214 = arith.constant 1.000000e+00 : f32
    %879 = vector.broadcast %cst_214 : f32 to vector<8x32xf32>
    %880 = arith.addf %879, %878 : vector<8x32xf32>
    %881 = arith.divf %879, %880 : vector<8x32xf32>
    %882 = vector.extract_strided_slice %862 {offsets = [0, 64], sizes = [8, 32], strides = [1, 1]} : vector<8x96xf32> to vector<8x32xf32>
    %883 = vector.extract_strided_slice %865 {offsets = [0, 64], sizes = [8, 32], strides = [1, 1]} : vector<8x96xf32> to vector<8x32xf32>
    %884 = arith.mulf %873, %883 : vector<8x32xf32>
    %885 = arith.addf %882, %884 : vector<8x32xf32>
    %886 = math.tanh %885 : vector<8x32xf32>
    %cst_215 = arith.constant 1.000000e+00 : f32
    %887 = vector.broadcast %cst_215 : f32 to vector<8x32xf32>
    %888 = arith.subf %887, %881 : vector<8x32xf32>
    %889 = arith.mulf %888, %886 : vector<8x32xf32>
    %890 = arith.mulf %881, %829 : vector<8x32xf32>
    %891 = arith.addf %889, %890 : vector<8x32xf32>
    %892 = vector.extract_strided_slice %541 {offsets = [16, 0], sizes = [8, 96], strides = [1, 1]} : vector<64x96xf32> to vector<8x96xf32>
    %cst_216 = arith.constant dense<0.000000e+00> : vector<8x96xf32>
    %893 = tpu.matmul %859, %545, %cst_216 {dimension_numbers = #tpu.dot_dimension_numbers<[1], [0], [0], [1], [0, 0, 1, 1], [], []>} : vector<8x32xf32>, vector<32x96xf32>, vector<8x96xf32> -> vector<8x96xf32>
    %894 = vector.broadcast %549 : vector<1x96xf32> to vector<8x96xf32>
    %895 = arith.addf %893, %894 : vector<8x96xf32>
    %896 = vector.extract_strided_slice %892 {offsets = [0, 0], sizes = [8, 32], strides = [1, 1]} : vector<8x96xf32> to vector<8x32xf32>
    %897 = vector.extract_strided_slice %895 {offsets = [0, 0], sizes = [8, 32], strides = [1, 1]} : vector<8x96xf32> to vector<8x32xf32>
    %898 = arith.addf %896, %897 : vector<8x32xf32>
    %899 = arith.negf %898 : vector<8x32xf32>
    %900 = math.exp %899 : vector<8x32xf32>
    %cst_217 = arith.constant 1.000000e+00 : f32
    %901 = vector.broadcast %cst_217 : f32 to vector<8x32xf32>
    %902 = arith.addf %901, %900 : vector<8x32xf32>
    %903 = arith.divf %901, %902 : vector<8x32xf32>
    %904 = vector.extract_strided_slice %892 {offsets = [0, 32], sizes = [8, 32], strides = [1, 1]} : vector<8x96xf32> to vector<8x32xf32>
    %905 = vector.extract_strided_slice %895 {offsets = [0, 32], sizes = [8, 32], strides = [1, 1]} : vector<8x96xf32> to vector<8x32xf32>
    %906 = arith.addf %904, %905 : vector<8x32xf32>
    %907 = arith.negf %906 : vector<8x32xf32>
    %908 = math.exp %907 : vector<8x32xf32>
    %cst_218 = arith.constant 1.000000e+00 : f32
    %909 = vector.broadcast %cst_218 : f32 to vector<8x32xf32>
    %910 = arith.addf %909, %908 : vector<8x32xf32>
    %911 = arith.divf %909, %910 : vector<8x32xf32>
    %912 = vector.extract_strided_slice %892 {offsets = [0, 64], sizes = [8, 32], strides = [1, 1]} : vector<8x96xf32> to vector<8x32xf32>
    %913 = vector.extract_strided_slice %895 {offsets = [0, 64], sizes = [8, 32], strides = [1, 1]} : vector<8x96xf32> to vector<8x32xf32>
    %914 = arith.mulf %903, %913 : vector<8x32xf32>
    %915 = arith.addf %912, %914 : vector<8x32xf32>
    %916 = math.tanh %915 : vector<8x32xf32>
    %cst_219 = arith.constant 1.000000e+00 : f32
    %917 = vector.broadcast %cst_219 : f32 to vector<8x32xf32>
    %918 = arith.subf %917, %911 : vector<8x32xf32>
    %919 = arith.mulf %918, %916 : vector<8x32xf32>
    %920 = arith.mulf %911, %859 : vector<8x32xf32>
    %921 = arith.addf %919, %920 : vector<8x32xf32>
    %c40_220 = arith.constant 40 : index
    %c0_221 = arith.constant 0 : index
    %922 = vector.load %arg10[%c40_220, %c0_221] : memref<64x64xf32, #tpu.memory_space<vmem>>, vector<8x32xf32>
    tpu.vector_store %arg10[%c40_220, %c0_221], %891 {strides = array<i32>} : memref<64x64xf32, #tpu.memory_space<vmem>>, vector<8x32xf32>,
    %c16_222 = arith.constant 16 : index
    %c32_223 = arith.constant 32 : index
    %923 = vector.load %arg10[%c16_222, %c32_223] : memref<64x64xf32, #tpu.memory_space<vmem>>, vector<8x32xf32>
    tpu.vector_store %arg10[%c16_222, %c32_223], %921 {strides = array<i32>} : memref<64x64xf32, #tpu.memory_space<vmem>>, vector<8x32xf32>,
    %924 = vector.extract_strided_slice %534 {offsets = [48, 0], sizes = [8, 96], strides = [1, 1]} : vector<64x96xf32> to vector<8x96xf32>
    %cst_224 = arith.constant dense<0.000000e+00> : vector<8x96xf32>
    %925 = tpu.matmul %891, %543, %cst_224 {dimension_numbers = #tpu.dot_dimension_numbers<[1], [0], [0], [1], [0, 0, 1, 1], [], []>} : vector<8x32xf32>, vector<32x96xf32>, vector<8x96xf32> -> vector<8x96xf32>
    %926 = vector.broadcast %547 : vector<1x96xf32> to vector<8x96xf32>
    %927 = arith.addf %925, %926 : vector<8x96xf32>
    %928 = vector.extract_strided_slice %924 {offsets = [0, 0], sizes = [8, 32], strides = [1, 1]} : vector<8x96xf32> to vector<8x32xf32>
    %929 = vector.extract_strided_slice %927 {offsets = [0, 0], sizes = [8, 32], strides = [1, 1]} : vector<8x96xf32> to vector<8x32xf32>
    %930 = arith.addf %928, %929 : vector<8x32xf32>
    %931 = arith.negf %930 : vector<8x32xf32>
    %932 = math.exp %931 : vector<8x32xf32>
    %cst_225 = arith.constant 1.000000e+00 : f32
    %933 = vector.broadcast %cst_225 : f32 to vector<8x32xf32>
    %934 = arith.addf %933, %932 : vector<8x32xf32>
    %935 = arith.divf %933, %934 : vector<8x32xf32>
    %936 = vector.extract_strided_slice %924 {offsets = [0, 32], sizes = [8, 32], strides = [1, 1]} : vector<8x96xf32> to vector<8x32xf32>
    %937 = vector.extract_strided_slice %927 {offsets = [0, 32], sizes = [8, 32], strides = [1, 1]} : vector<8x96xf32> to vector<8x32xf32>
    %938 = arith.addf %936, %937 : vector<8x32xf32>
    %939 = arith.negf %938 : vector<8x32xf32>
    %940 = math.exp %939 : vector<8x32xf32>
    %cst_226 = arith.constant 1.000000e+00 : f32
    %941 = vector.broadcast %cst_226 : f32 to vector<8x32xf32>
    %942 = arith.addf %941, %940 : vector<8x32xf32>
    %943 = arith.divf %941, %942 : vector<8x32xf32>
    %944 = vector.extract_strided_slice %924 {offsets = [0, 64], sizes = [8, 32], strides = [1, 1]} : vector<8x96xf32> to vector<8x32xf32>
    %945 = vector.extract_strided_slice %927 {offsets = [0, 64], sizes = [8, 32], strides = [1, 1]} : vector<8x96xf32> to vector<8x32xf32>
    %946 = arith.mulf %935, %945 : vector<8x32xf32>
    %947 = arith.addf %944, %946 : vector<8x32xf32>
    %948 = math.tanh %947 : vector<8x32xf32>
    %cst_227 = arith.constant 1.000000e+00 : f32
    %949 = vector.broadcast %cst_227 : f32 to vector<8x32xf32>
    %950 = arith.subf %949, %943 : vector<8x32xf32>
    %951 = arith.mulf %950, %948 : vector<8x32xf32>
    %952 = arith.mulf %943, %891 : vector<8x32xf32>
    %953 = arith.addf %951, %952 : vector<8x32xf32>
    %954 = vector.extract_strided_slice %541 {offsets = [8, 0], sizes = [8, 96], strides = [1, 1]} : vector<64x96xf32> to vector<8x96xf32>
    %cst_228 = arith.constant dense<0.000000e+00> : vector<8x96xf32>
    %955 = tpu.matmul %921, %545, %cst_228 {dimension_numbers = #tpu.dot_dimension_numbers<[1], [0], [0], [1], [0, 0, 1, 1], [], []>} : vector<8x32xf32>, vector<32x96xf32>, vector<8x96xf32> -> vector<8x96xf32>
    %956 = vector.broadcast %549 : vector<1x96xf32> to vector<8x96xf32>
    %957 = arith.addf %955, %956 : vector<8x96xf32>
    %958 = vector.extract_strided_slice %954 {offsets = [0, 0], sizes = [8, 32], strides = [1, 1]} : vector<8x96xf32> to vector<8x32xf32>
    %959 = vector.extract_strided_slice %957 {offsets = [0, 0], sizes = [8, 32], strides = [1, 1]} : vector<8x96xf32> to vector<8x32xf32>
    %960 = arith.addf %958, %959 : vector<8x32xf32>
    %961 = arith.negf %960 : vector<8x32xf32>
    %962 = math.exp %961 : vector<8x32xf32>
    %cst_229 = arith.constant 1.000000e+00 : f32
    %963 = vector.broadcast %cst_229 : f32 to vector<8x32xf32>
    %964 = arith.addf %963, %962 : vector<8x32xf32>
    %965 = arith.divf %963, %964 : vector<8x32xf32>
    %966 = vector.extract_strided_slice %954 {offsets = [0, 32], sizes = [8, 32], strides = [1, 1]} : vector<8x96xf32> to vector<8x32xf32>
    %967 = vector.extract_strided_slice %957 {offsets = [0, 32], sizes = [8, 32], strides = [1, 1]} : vector<8x96xf32> to vector<8x32xf32>
    %968 = arith.addf %966, %967 : vector<8x32xf32>
    %969 = arith.negf %968 : vector<8x32xf32>
    %970 = math.exp %969 : vector<8x32xf32>
    %cst_230 = arith.constant 1.000000e+00 : f32
    %971 = vector.broadcast %cst_230 : f32 to vector<8x32xf32>
    %972 = arith.addf %971, %970 : vector<8x32xf32>
    %973 = arith.divf %971, %972 : vector<8x32xf32>
    %974 = vector.extract_strided_slice %954 {offsets = [0, 64], sizes = [8, 32], strides = [1, 1]} : vector<8x96xf32> to vector<8x32xf32>
    %975 = vector.extract_strided_slice %957 {offsets = [0, 64], sizes = [8, 32], strides = [1, 1]} : vector<8x96xf32> to vector<8x32xf32>
    %976 = arith.mulf %965, %975 : vector<8x32xf32>
    %977 = arith.addf %974, %976 : vector<8x32xf32>
    %978 = math.tanh %977 : vector<8x32xf32>
    %cst_231 = arith.constant 1.000000e+00 : f32
    %979 = vector.broadcast %cst_231 : f32 to vector<8x32xf32>
    %980 = arith.subf %979, %973 : vector<8x32xf32>
    %981 = arith.mulf %980, %978 : vector<8x32xf32>
    %982 = arith.mulf %973, %921 : vector<8x32xf32>
    %983 = arith.addf %981, %982 : vector<8x32xf32>
    %c48_232 = arith.constant 48 : index
    %c0_233 = arith.constant 0 : index
    %984 = vector.load %arg10[%c48_232, %c0_233] : memref<64x64xf32, #tpu.memory_space<vmem>>, vector<8x32xf32>
    tpu.vector_store %arg10[%c48_232, %c0_233], %953 {strides = array<i32>} : memref<64x64xf32, #tpu.memory_space<vmem>>, vector<8x32xf32>,
    %c8_234 = arith.constant 8 : index
    %c32_235 = arith.constant 32 : index
    %985 = vector.load %arg10[%c8_234, %c32_235] : memref<64x64xf32, #tpu.memory_space<vmem>>, vector<8x32xf32>
    tpu.vector_store %arg10[%c8_234, %c32_235], %983 {strides = array<i32>} : memref<64x64xf32, #tpu.memory_space<vmem>>, vector<8x32xf32>,
    %986 = vector.extract_strided_slice %534 {offsets = [56, 0], sizes = [8, 96], strides = [1, 1]} : vector<64x96xf32> to vector<8x96xf32>
    %cst_236 = arith.constant dense<0.000000e+00> : vector<8x96xf32>
    %987 = tpu.matmul %953, %543, %cst_236 {dimension_numbers = #tpu.dot_dimension_numbers<[1], [0], [0], [1], [0, 0, 1, 1], [], []>} : vector<8x32xf32>, vector<32x96xf32>, vector<8x96xf32> -> vector<8x96xf32>
    %988 = vector.broadcast %547 : vector<1x96xf32> to vector<8x96xf32>
    %989 = arith.addf %987, %988 : vector<8x96xf32>
    %990 = vector.extract_strided_slice %986 {offsets = [0, 0], sizes = [8, 32], strides = [1, 1]} : vector<8x96xf32> to vector<8x32xf32>
    %991 = vector.extract_strided_slice %989 {offsets = [0, 0], sizes = [8, 32], strides = [1, 1]} : vector<8x96xf32> to vector<8x32xf32>
    %992 = arith.addf %990, %991 : vector<8x32xf32>
    %993 = arith.negf %992 : vector<8x32xf32>
    %994 = math.exp %993 : vector<8x32xf32>
    %cst_237 = arith.constant 1.000000e+00 : f32
    %995 = vector.broadcast %cst_237 : f32 to vector<8x32xf32>
    %996 = arith.addf %995, %994 : vector<8x32xf32>
    %997 = arith.divf %995, %996 : vector<8x32xf32>
    %998 = vector.extract_strided_slice %986 {offsets = [0, 32], sizes = [8, 32], strides = [1, 1]} : vector<8x96xf32> to vector<8x32xf32>
    %999 = vector.extract_strided_slice %989 {offsets = [0, 32], sizes = [8, 32], strides = [1, 1]} : vector<8x96xf32> to vector<8x32xf32>
    %1000 = arith.addf %998, %999 : vector<8x32xf32>
    %1001 = arith.negf %1000 : vector<8x32xf32>
    %1002 = math.exp %1001 : vector<8x32xf32>
    %cst_238 = arith.constant 1.000000e+00 : f32
    %1003 = vector.broadcast %cst_238 : f32 to vector<8x32xf32>
    %1004 = arith.addf %1003, %1002 : vector<8x32xf32>
    %1005 = arith.divf %1003, %1004 : vector<8x32xf32>
    %1006 = vector.extract_strided_slice %986 {offsets = [0, 64], sizes = [8, 32], strides = [1, 1]} : vector<8x96xf32> to vector<8x32xf32>
    %1007 = vector.extract_strided_slice %989 {offsets = [0, 64], sizes = [8, 32], strides = [1, 1]} : vector<8x96xf32> to vector<8x32xf32>
    %1008 = arith.mulf %997, %1007 : vector<8x32xf32>
    %1009 = arith.addf %1006, %1008 : vector<8x32xf32>
    %1010 = math.tanh %1009 : vector<8x32xf32>
    %cst_239 = arith.constant 1.000000e+00 : f32
    %1011 = vector.broadcast %cst_239 : f32 to vector<8x32xf32>
    %1012 = arith.subf %1011, %1005 : vector<8x32xf32>
    %1013 = arith.mulf %1012, %1010 : vector<8x32xf32>
    %1014 = arith.mulf %1005, %953 : vector<8x32xf32>
    %1015 = arith.addf %1013, %1014 : vector<8x32xf32>
    %1016 = vector.extract_strided_slice %541 {offsets = [0, 0], sizes = [8, 96], strides = [1, 1]} : vector<64x96xf32> to vector<8x96xf32>
    %cst_240 = arith.constant dense<0.000000e+00> : vector<8x96xf32>
    %1017 = tpu.matmul %983, %545, %cst_240 {dimension_numbers = #tpu.dot_dimension_numbers<[1], [0], [0], [1], [0, 0, 1, 1], [], []>} : vector<8x32xf32>, vector<32x96xf32>, vector<8x96xf32> -> vector<8x96xf32>
    %1018 = vector.broadcast %549 : vector<1x96xf32> to vector<8x96xf32>
    %1019 = arith.addf %1017, %1018 : vector<8x96xf32>
    %1020 = vector.extract_strided_slice %1016 {offsets = [0, 0], sizes = [8, 32], strides = [1, 1]} : vector<8x96xf32> to vector<8x32xf32>
    %1021 = vector.extract_strided_slice %1019 {offsets = [0, 0], sizes = [8, 32], strides = [1, 1]} : vector<8x96xf32> to vector<8x32xf32>
    %1022 = arith.addf %1020, %1021 : vector<8x32xf32>
    %1023 = arith.negf %1022 : vector<8x32xf32>
    %1024 = math.exp %1023 : vector<8x32xf32>
    %cst_241 = arith.constant 1.000000e+00 : f32
    %1025 = vector.broadcast %cst_241 : f32 to vector<8x32xf32>
    %1026 = arith.addf %1025, %1024 : vector<8x32xf32>
    %1027 = arith.divf %1025, %1026 : vector<8x32xf32>
    %1028 = vector.extract_strided_slice %1016 {offsets = [0, 32], sizes = [8, 32], strides = [1, 1]} : vector<8x96xf32> to vector<8x32xf32>
    %1029 = vector.extract_strided_slice %1019 {offsets = [0, 32], sizes = [8, 32], strides = [1, 1]} : vector<8x96xf32> to vector<8x32xf32>
    %1030 = arith.addf %1028, %1029 : vector<8x32xf32>
    %1031 = arith.negf %1030 : vector<8x32xf32>
    %1032 = math.exp %1031 : vector<8x32xf32>
    %cst_242 = arith.constant 1.000000e+00 : f32
    %1033 = vector.broadcast %cst_242 : f32 to vector<8x32xf32>
    %1034 = arith.addf %1033, %1032 : vector<8x32xf32>
    %1035 = arith.divf %1033, %1034 : vector<8x32xf32>
    %1036 = vector.extract_strided_slice %1016 {offsets = [0, 64], sizes = [8, 32], strides = [1, 1]} : vector<8x96xf32> to vector<8x32xf32>
    %1037 = vector.extract_strided_slice %1019 {offsets = [0, 64], sizes = [8, 32], strides = [1, 1]} : vector<8x96xf32> to vector<8x32xf32>
    %1038 = arith.mulf %1027, %1037 : vector<8x32xf32>
    %1039 = arith.addf %1036, %1038 : vector<8x32xf32>
    %1040 = math.tanh %1039 : vector<8x32xf32>
    %cst_243 = arith.constant 1.000000e+00 : f32
    %1041 = vector.broadcast %cst_243 : f32 to vector<8x32xf32>
    %1042 = arith.subf %1041, %1035 : vector<8x32xf32>
    %1043 = arith.mulf %1042, %1040 : vector<8x32xf32>
    %1044 = arith.mulf %1035, %983 : vector<8x32xf32>
    %1045 = arith.addf %1043, %1044 : vector<8x32xf32>
    %c56_244 = arith.constant 56 : index
    %c0_245 = arith.constant 0 : index
    %1046 = vector.load %arg10[%c56_244, %c0_245] : memref<64x64xf32, #tpu.memory_space<vmem>>, vector<8x32xf32>
    tpu.vector_store %arg10[%c56_244, %c0_245], %1015 {strides = array<i32>} : memref<64x64xf32, #tpu.memory_space<vmem>>, vector<8x32xf32>,
    %c0_246 = arith.constant 0 : index
    %c32_247 = arith.constant 32 : index
    %1047 = vector.load %arg10[%c0_246, %c32_247] : memref<64x64xf32, #tpu.memory_space<vmem>>, vector<8x32xf32>
    tpu.vector_store %arg10[%c0_246, %c32_247], %1045 {strides = array<i32>} : memref<64x64xf32, #tpu.memory_space<vmem>>, vector<8x32xf32>,
    %c2 = arith.constant 2 : index
    %c0_248 = arith.constant 0 : index
    %c0_249 = arith.constant 0 : index
    %1048 = vector.load %arg11[%c2, %c0_248, %c0_249] : memref<4x8x32xf32, #tpu.memory_space<vmem>>, vector<1x8x32xf32>
    %1049 = vector.shape_cast %1048 : vector<1x8x32xf32> to vector<8x32xf32>
    %1050 = vector.shape_cast %1015 : vector<8x32xf32> to vector<1x8x32xf32>
    tpu.vector_store %arg11[%c2, %c0_248, %c0_249], %1050 {strides = array<i32>} : memref<4x8x32xf32, #tpu.memory_space<vmem>>, vector<1x8x32xf32>,
    %c3 = arith.constant 3 : index
    %c0_250 = arith.constant 0 : index
    %c0_251 = arith.constant 0 : index
    %1051 = vector.load %arg11[%c3, %c0_250, %c0_251] : memref<4x8x32xf32, #tpu.memory_space<vmem>>, vector<1x8x32xf32>
    %1052 = vector.shape_cast %1051 : vector<1x8x32xf32> to vector<8x32xf32>
    %1053 = vector.shape_cast %1045 : vector<8x32xf32> to vector<1x8x32xf32>
    tpu.vector_store %arg11[%c3, %c0_250, %c0_251], %1053 {strides = array<i32>} : memref<4x8x32xf32, #tpu.memory_space<vmem>>, vector<1x8x32xf32>,
    return
  }
  func.func @transform_0(%arg0: i32) -> (i32, i32) {
    %c0_i32 = arith.constant 0 : i32
    %c0_i32_0 = arith.constant 0 : i32
    %c0_i32_1 = arith.constant 0 : i32
    return %c0_i32, %c0_i32_0 : i32, i32
  }
  func.func @transform_1(%arg0: i32) -> (i32, i32, i32) {
    %c0_i32 = arith.constant 0 : i32
    %c0_i32_0 = arith.constant 0 : i32
    %c0_i32_1 = arith.constant 0 : i32
    %c0_i32_2 = arith.constant 0 : i32
    return %c0_i32, %c0_i32_0, %c0_i32_1 : i32, i32, i32
  }
  func.func @transform_2(%arg0: i32) -> (i32, i32, i32) {
    %c0_i32 = arith.constant 0 : i32
    %c0_i32_0 = arith.constant 0 : i32
    %c0_i32_1 = arith.constant 0 : i32
    %c0_i32_2 = arith.constant 0 : i32
    return %c0_i32, %c0_i32_0, %c0_i32_1 : i32, i32, i32
  }
  func.func @transform_3(%arg0: i32) -> (i32, i32, i32) {
    %c0_i32 = arith.constant 0 : i32
    %c0_i32_0 = arith.constant 0 : i32
    %c0_i32_1 = arith.constant 0 : i32
    %c0_i32_2 = arith.constant 0 : i32
    return %c0_i32, %c0_i32_0, %c0_i32_1 : i32, i32, i32
  }
  func.func @transform_4(%arg0: i32) -> (i32, i32, i32) {
    %c0_i32 = arith.constant 0 : i32
    %c0_i32_0 = arith.constant 0 : i32
    %c0_i32_1 = arith.constant 0 : i32
    %c0_i32_2 = arith.constant 0 : i32
    return %c0_i32, %c0_i32_0, %c0_i32_1 : i32, i32, i32
  }
  func.func @transform_5(%arg0: i32) -> (i32, i32, i32) {
    %c0_i32 = arith.constant 0 : i32
    %c0_i32_0 = arith.constant 0 : i32
    %c0_i32_1 = arith.constant 0 : i32
    %c0_i32_2 = arith.constant 0 : i32
    return %c0_i32, %c0_i32_0, %c0_i32_1 : i32, i32, i32
  }
  func.func @transform_6(%arg0: i32) -> (i32, i32, i32) {
    %c0_i32 = arith.constant 0 : i32
    %c0_i32_0 = arith.constant 0 : i32
    %c0_i32_1 = arith.constant 0 : i32
    %c0_i32_2 = arith.constant 0 : i32
    return %c0_i32, %c0_i32_0, %c0_i32_1 : i32, i32, i32
  }
  func.func @transform_7(%arg0: i32) -> (i32, i32, i32) {
    %c0_i32 = arith.constant 0 : i32
    %c0_i32_0 = arith.constant 0 : i32
    %c0_i32_1 = arith.constant 0 : i32
    %c0_i32_2 = arith.constant 0 : i32
    return %c0_i32, %c0_i32_0, %c0_i32_1 : i32, i32, i32
  }
  func.func @transform_8(%arg0: i32) -> (i32, i32, i32) {
    %c0_i32 = arith.constant 0 : i32
    %c0_i32_0 = arith.constant 0 : i32
    %c0_i32_1 = arith.constant 0 : i32
    %c0_i32_2 = arith.constant 0 : i32
    return %c0_i32, %c0_i32_0, %c0_i32_1 : i32, i32, i32
  }
  func.func @transform_9(%arg0: i32) -> (i32, i32) {
    %c0_i32 = arith.constant 0 : i32
    %c0_i32_0 = arith.constant 0 : i32
    %c0_i32_1 = arith.constant 0 : i32
    return %c0_i32, %c0_i32_0 : i32, i32
  }
  func.func @transform_10(%arg0: i32) -> (i32, i32, i32) {
    %c0_i32 = arith.constant 0 : i32
    %c0_i32_0 = arith.constant 0 : i32
    %c0_i32_1 = arith.constant 0 : i32
    %c0_i32_2 = arith.constant 0 : i32
    return %c0_i32, %c0_i32_0, %c0_i32_1 : i32, i32, i32
  }
}

</mosaic_0001>

<bundles_post_ra>
// kernel: encoder_forward.1
= control target key start
LH: loop header
LB: loop body
LE: loop exit
PB: predicated region body
PF: predicated region fallthrough
CT: control target
= control target key end

     0   :  { %vm51_vm0 = vcmask 261120   ;;  %v2839_v17 = vmov 0.0   ;;  %s3909_s0 = inlined_call_operand.vmem [shape: f32[64,32], index: 0, kind: input, shape index: {}]   ;;  %s3910_s1 = inlined_call_operand.vmem [shape: f32[2,32,96], index: 1, kind: input, shape index: {}]   ;;  %s3911_s2 = inlined_call_operand.vmem [shape: f32[2,32,96], index: 2, kind: input, shape index: {}]   ;;  %s3912_s3 = inlined_call_operand.vmem [shape: f32[2,1,96], index: 3, kind: input, shape index: {}]   ;;  %s3913_s4 = inlined_call_operand.vmem [shape: f32[2,1,96], index: 4, kind: input, shape index: {}]   ;;  %s3914_s5 = inlined_call_operand.vmem [shape: f32[2,64,96], index: 5, kind: input, shape index: {}]   ;;  %s3915_s6 = inlined_call_operand.vmem [shape: f32[2,32,96], index: 6, kind: input, shape index: {}]   ;;  %s3916_s7 = inlined_call_operand.vmem [shape: f32[2,1,96], index: 7, kind: input, shape index: {}]   ;;  %s3917_s8 = inlined_call_operand.vmem [shape: f32[2,1,96], index: 8, kind: input, shape index: {}]   ;;  %s3918_s9 = inlined_call_operand.vmem [shape: f32[64,64], index: 9, kind: output, shape index: {0}]   ;;  %s3919_s10 = inlined_call_operand.hbm [shape: f32[4,8,32], index: 10, kind: output, shape index: {1}]  }
   0x1   :  { %v2479_v0 = vld [vmem:[%s3910_s1 + $0x38] sm:$0xff]  ;;  %v2478_v3 = vld [vmem:[%s3910_s1 + $0x30] sm:$0xff]  ;;  %v2477_v6 = vld [vmem:[%s3910_s1 + $0x28] sm:$0xff] }
   0x2   :  { %v2906_v1 = vld [vmem:[%s3911_s2 + $0x18] sm:$0xff]  ;;  %139 = vmatpush.msra.mxu1 %v2479_v0  ;;  %v2920_v4 = vld [vmem:[%s3911_s2 + $0x10] sm:$0xff]  ;;  %v2934_v7 = vld [vmem:[%s3911_s2 + $0x8] sm:$0xff] }
   0x3   :  { %v2911_v2 = vld [vmem:[%s3911_s2 + $0x38] sm:$0xff]  ;;  %198 = vmatpush.msra.mxu2 %v2906_v1  ;;  %v2925_v5 = vld [vmem:[%s3911_s2 + $0x30] sm:$0xff]  ;;  %v2940_v8 = vld [vmem:[%s3911_s2 + $0x28] sm:$0xff] }
   0x4   :  { %260 = vmatpush.msra.mxu3 %v2911_v2  ;;  %140 = vmatpush.msra.mxu1 %v2478_v3  ;;  %v46_v9 = vld [vmem:[%s3910_s1 + $0x18] sm:$0xff]  ;;  %v2476_v10 = vld [vmem:[%s3910_s1 + $0x20] sm:$0xff]  ;;  %v45_v12 = vld [vmem:[%s3910_s1 + $0x10] sm:$0xff] }
   0x5   :  { %199 = vmatpush.msra.mxu2 %v2920_v4  ;;  %88 = vmatpush.msra.mxu0 %v46_v9  ;;  %v2952_v11 = vld [vmem:[%s3911_s2] sm:$0xff]  ;;  %v44_v15 = vld [vmem:[%s3910_s1 + $0x8] sm:$0xff] }
   0x6   :  { %261 = vmatpush.msra.mxu3 %v2925_v5  ;;  %141 = vmatpush.msra.mxu1 %v2477_v6  ;;  %v2961_v13 = vld [vmem:[%s3911_s2 + $0x20] sm:$0xff] }
   0x7   :  { %200 = vmatpush.msra.mxu2 %v2934_v7  ;;  %v35_v14 = vld [vmem:[%s3909_s0] sm:$0xff]  ;;  %89 = vmatpush.msra.mxu0 %v45_v12 }
   0x8   :  { %262 = vmatpush.msra.mxu3 %v2940_v8  ;;  %142 = vmatpush.msra.mxu1 %v2476_v10  ;;  %v43_v16 = vld [vmem:[%s3910_s1] sm:$0xff] }
   0x9   :  { %201 = vmatpush.msra.mxu2 %v2952_v11  ;;  %2481 = vmatmul.msk.f32.vlgmr.msra.gmra.mxu1 %vm51_vm0, %v35_v14 }
   0xa   :  { %263 = vmatpush.msra.mxu3 %v2961_v13  ;;  %202 = vmatmul.f32.vlgmr.msra.gmra.mxu2 %v2839_v17 }
   0xb   :  { %264 = vmatmul.f32.vlgmr.msra.gmra.mxu3 %v2839_v17  ;;  %90 = vmatpush.msra.mxu0 %v44_v15 }
   0xc   :  { %392 = vmatpush.msrb.mxu3 %v2911_v2 }
   0xd   :  { %16 = vsyncpa [#allocation3], 0  ;;  %328 = vmatpush.msrb.mxu2 %v2906_v1  ;;  %91 = vmatpush.msra.mxu0 %v43_v16  ;;  %v36_v18 = vld [vmem:[%s3909_s0 + $0x8] sm:$0xff]  ;;  %v37_v19 = vld [vmem:[%s3909_s0 + $0x10] sm:$0xff]  ;;  %s2841_s28 = smov 96   ;;  %vm312_vm9 = vcmask 523520  }
   0xe   :  { %393 = vmatpush.msrb.mxu3 %v2925_v5  ;;  %2468 = vmatmul.msk.f32.vlgmr.msra.gmra.mxu0 %vm51_vm0, %v35_v14  ;;  %v38_v20 = vld [vmem:[%s3909_s0 + $0x18] sm:$0xff]  ;;  %v39_v21 = vld [vmem:[%s3909_s0 + $0x20] sm:$0xff]  ;;  %v40_v22 = vld [vmem:[%s3909_s0 + $0x28] sm:$0xff]  ;;  %s2454_s27 = sshll.u32 %s3919_s10, 4  ;;  %s2844_s1 = smov 8   ;;  %s2455_s27 = int_to_ptr.hbm [resolvable:$true] %s2454_s27 }
   0xf   :  { %329 = vmatpush.msrb.mxu2 %v2920_v4  ;;  %v41_v23 = vld [vmem:[%s3909_s0 + $0x30] sm:$0xff]  ;;  %v42_v24 = vld [vmem:[%s3909_s0 + $0x38] sm:$0xff]  ;;  %v2590_v25 = vld [vmem:[%s3912_s3 + $0x1] ss:$0 sm:$0xff]  ;;  %s2840_s0 = smov 64  }
  0x10   :  { %394 = vmatpush.msrb.mxu3 %v2940_v8  ;;  %v3038_v28 = vld [vmem:[%s3913_s4 + $0x1] ss:$0 sm:$0xff]  ;;  %v3047_v33 = vld [vmem:[%s3913_s4] ss:$0 sm:$0xff] }
  0x11   :  { %330 = vmatpush.msrb.mxu2 %v2934_v7  ;;  %2482 = vmatmul.msk.f32.gmra.mxu1 %vm51_vm0, %v36_v18  ;;  %v3064_v48 = vld [vmem:[%s3912_s3] ss:$0 sm:$0xff] }
  0x12   :  { %395 = vmatpush.msrb.mxu3 %v2961_v13 }
  0x13   :  { %331 = vmatpush.msrb.mxu2 %v2952_v11 }
  0x14   :  { %523 = vmatpush.msra.mxu3 %v2911_v2 }
  0x15   :  { %459 = vmatpush.msra.mxu2 %v2906_v1 }
  0x16   :  { %524 = vmatpush.msra.mxu3 %v2925_v5  ;;  %2469 = vmatmul.msk.f32.gmra.mxu0 %vm51_vm0, %v36_v18 }
  0x17   :  { %460 = vmatpush.msra.mxu2 %v2920_v4 }
  0x18   :  { %525 = vmatpush.msra.mxu3 %v2940_v8 }
  0x19   :  { %461 = vmatpush.msra.mxu2 %v2934_v7  ;;  %2483 = vmatmul.msk.f32.gmra.mxu1 %vm51_vm0, %v37_v19 }
  0x1a   :  { %526 = vmatpush.msra.mxu3 %v2961_v13 }
  0x1b   :  { %462 = vmatpush.msra.mxu2 %v2952_v11 }
  0x1e   :  { %2470 = vmatmul.msk.f32.gmra.mxu0 %vm51_vm0, %v37_v19 }
  0x21   :  { %2484 = vmatmul.msk.f32.gmra.mxu1 %vm51_vm0, %v38_v20 }
  0x26   :  { %2471 = vmatmul.msk.f32.gmra.mxu0 %vm51_vm0, %v38_v20 }
  0x29   :  { %2485 = vmatmul.msk.f32.gmra.mxu1 %vm51_vm0, %v39_v21 }
  0x2e   :  { %2472 = vmatmul.msk.f32.gmra.mxu0 %vm51_vm0, %v39_v21 }
  0x31   :  { %2486 = vmatmul.msk.f32.gmra.mxu1 %vm51_vm0, %v40_v22 }
  0x36   :  { %2473 = vmatmul.msk.f32.gmra.mxu0 %vm51_vm0, %v40_v22 }
  0x39   :  { %2487 = vmatmul.msk.f32.gmra.mxu1 %vm51_vm0, %v41_v23 }
  0x3e   :  { %2474 = vmatmul.msk.f32.gmra.mxu0 %vm51_vm0, %v41_v23 }
  0x41   :  { %2488 = vmatmul.msk.f32.gmra.mxu1 %vm51_vm0, %v42_v24 }
  0x46   :  { %2475 = vmatmul.msk.f32.gmra.mxu0 %vm51_vm0, %v42_v24 }
  0x86   :  { %v144_v26 = vpop.f32.mrf.mxu1 }
  0x87   :  { %v3033_v27 = vadd.f32 %v2590_v25, %v144_v26 }
  0x8b   :  { %v93_v50 = vpop.f32.mrf.mxu0 }
  0x8c   :  { %v94_v51 = vadd.f32 %v3064_v48, %v93_v50 }
  0x8d   :  { %v203_v34 = vpop.f32.mrf.mxu2 }
  0x8e   :  { %v265_v29 = vpop.f32.mrf.mxu3  ;;  %v147_v31 = vpop.f32.mrf.mxu1  ;;  %v204_v35 = vadd.f32 %v3047_v33, %v203_v34 }
  0x8f   :  { %v266_v30 = vadd.f32 %v3038_v28, %v265_v29  ;;  %v3041_v32 = vadd.f32 %v2590_v25, %v147_v31 }
  0x90   :  { %v206_v53 = vadd.f32 %v204_v35, %v94_v51 }
  0x91   :  { %289 = vrot.lane.b32.xlu0 %v266_v30, %s2840_s0 }
  0x92   :  { %v2494_v54 = vmul.f32 -1.442695, %v206_v53 }
  0x96   :  { %v150_v36 = vpop.f32.mrf.mxu1 }
  0x97   :  { %v3050_v37 = vadd.f32 %v2590_v25, %v150_v36 }
  0x99   :  { %227 = vrot.lane.b32.xlu0 %v204_v35, %s2840_s0 }
  0x9e   :  { %v153_v38 = vpop.f32.mrf.mxu1 }
  0x9f   :  { %v3053_v39 = vadd.f32 %v2590_v25, %v153_v38 }
  0xa6   :  { %v156_v40 = vpop.f32.mrf.mxu1 }
  0xa7   :  { %v3055_v41 = vadd.f32 %v2590_v25, %v156_v40 }
  0xae   :  { %v159_v42 = vpop.f32.mrf.mxu1 }
  0xaf   :  { %v3057_v43 = vadd.f32 %v2590_v25, %v159_v42 }
  0xb6   :  { %v162_v44 = vpop.f32.mrf.mxu1 }
  0xb7   :  { %v3059_v45 = vadd.f32 %v2590_v25, %v162_v44 }
  0xbe   :  { %v165_v46 = vpop.f32.mrf.mxu1 }
  0xbf   :  { %v166_v47 = vadd.f32 %v2590_v25, %v165_v46 }
  0xc1   :  { %v268_v49 = vadd.f32 %v266_v30, %v166_v47 }
  0xc3   :  { %v2495_v52 = vmul.f32 -1.442695, %v268_v49 }
  0xc5   :  { %2598 = vpow2.f32 %v2495_v52 }
  0xc6   :  { %2600 = vpow2.f32 %v2494_v54 }
  0xcb   :  { %v2599_v55 = vpop.eup %2598 }
  0xcc   :  { %v272_v56 = vadd.f32 1.0, %v2599_v55  ;;  %v2601_v57 = vpop.eup %2600 }
  0xcd   :  { %v210_v58 = vadd.f32 1.0, %v2601_v57 }
  0xce   :  { %2602 = vrcp.f32 %v272_v56  ;;  %v284_v9 = vand.u32 2147483648, %v272_v56  ;;  %vm278_vm2 = vweird.f32 %v272_v56  ;;  %v282_v10 = vand.u32 2147483647, %v272_v56 }
  0xcf   :  { %2604 = vrcp.f32 %v210_v58  ;;  %vm216_vm5 = vweird.f32 %v210_v58  ;;  %v222_v21 = vand.u32 2147483648, %v210_v58  ;;  %v220_v22 = vand.u32 2147483647, %v210_v58 }
  0xd0   :  { %v285_v15 = vor.u32 1.1754944e-38, %v284_v9  ;;  %vm283_vm4 = vcmp.eq.f32.partialorder %v282_v10, 8.507059e+37 }
  0xd1   :  { %v223_v24 = vor.u32 1.1754944e-38, %v222_v21  ;;  %vm221_vm8 = vcmp.eq.f32.partialorder %v220_v22, 8.507059e+37 }
  0xd4   :  { %v2603_v59 = vpop.eup %2602 }
  0xd5   :  { %v274_v60 = vmul.f32 %v2603_v59, %v272_v56  ;;  %v2605_v62 = vpop.eup %2604  ;;  %vm279_vm1 = vweird.f32 %v2603_v59 }
  0xd6   :  { %v212_v0 = vmul.f32 %v2605_v62, %v210_v58  ;;  %vm280_vm3 = vmor %vm278_vm2, %vm279_vm1  ;;  %vm217_vm6 = vweird.f32 %v2605_v62 }
  0xd7   :  { %v275_v61 = vsub.f32 1.0, %v274_v60  ;;  %vm218_vm7 = vmor %vm216_vm5, %vm217_vm6 }
  0xd8   :  { %v213_v6 = vsub.f32 1.0, %v212_v0  ;;  %v96_v0 = vpop.f32.mrf.mxu0 }
  0xd9   :  { %v276_v63 = vmul.f32 %v2603_v59, %v275_v61 }
  0xda   :  { %v214_v14 = vmul.f32 %v2605_v62, %v213_v6  ;;  %v97_v6 = vadd.f32 %v3064_v48, %v96_v0 }
  0xdb   :  { %v277_v3 = vadd.f32 %v2603_v59, %v276_v63 }
  0xdc   :  { %v215_v20 = vadd.f32 %v2605_v62, %v214_v14 }
  0xdd   :  { %v281_v12 = vsel %vm280_vm3, %v2603_v59, %v277_v3 }
  0xde   :  { %v286_v18 = vsel %vm283_vm4, %v285_v15, %v281_v12  ;;  %v219_v23 = vsel %vm218_vm7, %v2605_v62, %v215_v20 }
  0xdf   :  { %v224_v26 = vsel %vm221_vm8, %v223_v24, %v219_v23  ;;  %v299_v40 = vsub.f32 1.0, %v286_v18  ;;  %v305_v44 = vmul.f32 0.0, %v286_v18 }
 0x103   :  { %v290_v16 = vpop.permute.xlu0 %289 }
 0x104   :  { %v292_v19 = vmul.f32 %v290_v16, %v286_v18 }
 0x106   :  { %294 = vrot.lane.b32.xlu1 %v292_v19, %s2840_s0 }
 0x10b   :  { %v228_v25 = vpop.permute.xlu0 %227 }
 0x10c   :  { %v230_v29 = vmul.f32 %v228_v25, %v224_v26 }
 0x10e   :  { %232 = vrot.lane.b32.xlu1 %v230_v29, %s2840_s0 }
 0x178   :  { %v295_v30 = vpop.permute.xlu1 %294 }
 0x179   :  { %v297_v31 = vadd.f32 %v295_v30, %v166_v47  ;;  %v237_v47 = vsub.f32 1.0, %v224_v26 }
 0x17b   :  { %2606 = vtanh.f32 %v297_v31 }
 0x180   :  { %v233_v34 = vpop.permute.xlu1 %232 }
 0x181   :  { %v2607_v35 = vpop.eup %2606  ;;  %v235_v36 = vadd.f32 %v233_v34, %v94_v51  ;;  %v243_v51 = vmul.f32 0.0, %v224_v26 }
 0x182   :  { %301 = vrot.lane.b32.xlu2 %v2607_v35, %s2841_s28 }
 0x183   :  { %2608 = vtanh.f32 %v235_v36 }
 0x189   :  { %v2609_v38 = vpop.eup %2608 }
 0x18a   :  { %239 = vrot.lane.b32.xlu2 %v2609_v38, %s2841_s28 }
 0x1dc   :  { %v302_v42 = vpop.permute.xlu2 %301 }
 0x1dd   :  { %v304_v46 = vmul.f32 %v302_v42, %v299_v40 }
 0x1df   :  { %v3071_v49 = vadd.f32 %v305_v44, %v304_v46 }
 0x1e1   :  { %376 = vrot.lane.b32.xlu0 %v3071_v49, %s2841_s28  ;;  %313 = vst.msk [vmem:[%s3918_s9 + $0x38] sm:$0xff] %vm312_vm9, %v3071_v49 }
 0x1e4   :  { %v240_v50 = vpop.permute.xlu2 %239 }
 0x1e5   :  { %v242_v52 = vmul.f32 %v240_v50, %v237_v47 }
 0x1e7   :  { %v3080_v53 = vadd.f32 %v243_v51, %v242_v52 }
 0x1e9   :  { %308 = vrot.lane.b32.xlu1 %v3080_v53, %s2841_s28 }
 0x253   :  { %v377_v54 = vpop.permute.xlu0 %376 }
 0x254   :  { %2498 = vmatmul.msk.f32.vlgmr.msrb.gmra.mxu3 %vm51_vm0, %v377_v54 }
 0x255   :  { %654 = vmatpush.msrb.mxu3 %v2911_v2 }
 0x257   :  { %655 = vmatpush.msrb.mxu3 %v2925_v5 }
 0x259   :  { %656 = vmatpush.msrb.mxu3 %v2940_v8 }
 0x25b   :  { %v309_v55 = vpop.permute.xlu1 %308  ;;  %657 = vmatpush.msrb.mxu3 %v2961_v13 }
 0x25c   :  { %311 = vst.msk [vmem:[%s3918_s9] sm:$0xff] %vm51_vm0, %v309_v55  ;;  %2496 = vmatmul.msk.f32.vlgmr.msrb.gmra.mxu2 %vm51_vm0, %v309_v55 }
 0x25d   :  { %590 = vmatpush.msrb.mxu2 %v2906_v1 }
 0x25f   :  { %591 = vmatpush.msrb.mxu2 %v2920_v4 }
 0x261   :  { %592 = vmatpush.msrb.mxu2 %v2934_v7 }
 0x263   :  { %593 = vmatpush.msrb.mxu2 %v2952_v11 }
 0x2d7   :  { %v397_v56 = vpop.f32.mrf.mxu3 }
 0x2d8   :  { %v398_v57 = vadd.f32 %v3038_v28, %v397_v56 }
 0x2da   :  { %421 = vrot.lane.b32.xlu2 %v398_v57, %s2840_s0  ;;  %v400_v60 = vadd.f32 %v398_v57, %v3059_v45 }
 0x2dc   :  { %v2499_v61 = vmul.f32 -1.442695, %v400_v60 }
 0x2de   :  { %2610 = vpow2.f32 %v2499_v61 }
 0x2df   :  { %v333_v58 = vpop.f32.mrf.mxu2 }
 0x2e0   :  { %v334_v59 = vadd.f32 %v3047_v33, %v333_v58 }
 0x2e2   :  { %357 = vrot.lane.b32.xlu0 %v334_v59, %s2840_s0  ;;  %v336_v10 = vadd.f32 %v334_v59, %v97_v6 }
 0x2e4   :  { %v2611_v62 = vpop.eup %2610  ;;  %v2497_v14 = vmul.f32 -1.442695, %v336_v10 }
 0x2e5   :  { %v404_v63 = vadd.f32 1.0, %v2611_v62 }
 0x2e7   :  { %2612 = vrcp.f32 %v404_v63  ;;  %v416_v18 = vand.u32 2147483648, %v404_v63  ;;  %vm410_vm11 = vweird.f32 %v404_v63  ;;  %v414_v19 = vand.u32 2147483647, %v404_v63 }
 0x2e8   :  { %2614 = vpow2.f32 %v2497_v14 }
 0x2e9   :  { %v417_v22 = vor.u32 1.1754944e-38, %v416_v18  ;;  %vm415_vm13 = vcmp.eq.f32.partialorder %v414_v19, 8.507059e+37 }
 0x2ed   :  { %v2613_v3 = vpop.eup %2612 }
 0x2ee   :  { %v406_v9 = vmul.f32 %v2613_v3, %v404_v63  ;;  %vm411_vm10 = vweird.f32 %v2613_v3  ;;  %v2615_v20 = vpop.eup %2614 }
 0x2ef   :  { %vm412_vm12 = vmor %vm410_vm11, %vm411_vm10  ;;  %v340_v23 = vadd.f32 1.0, %v2615_v20 }
 0x2f0   :  { %v407_v12 = vsub.f32 1.0, %v406_v9 }
 0x2f1   :  { %2616 = vrcp.f32 %v340_v23  ;;  %v352_v36 = vand.u32 2147483648, %v340_v23  ;;  %vm346_vm15 = vweird.f32 %v340_v23  ;;  %v350_v38 = vand.u32 2147483647, %v340_v23 }
 0x2f2   :  { %v408_v15 = vmul.f32 %v2613_v3, %v407_v12 }
 0x2f3   :  { %v353_v42 = vor.u32 1.1754944e-38, %v352_v36  ;;  %vm351_vm2 = vcmp.eq.f32.partialorder %v350_v38, 8.507059e+37 }
 0x2f4   :  { %v409_v16 = vadd.f32 %v2613_v3, %v408_v15  ;;  %v99_v15 = vpop.f32.mrf.mxu0 }
 0x2f5   :  { %v100_v18 = vadd.f32 %v3064_v48, %v99_v15 }
 0x2f6   :  { %v413_v21 = vsel %vm412_vm12, %v2613_v3, %v409_v16 }
 0x2f7   :  { %v418_v24 = vsel %vm415_vm13, %v417_v22, %v413_v21  ;;  %v2617_v29 = vpop.eup %2616 }
 0x2f8   :  { %v342_v30 = vmul.f32 %v2617_v29, %v340_v23  ;;  %vm347_vm14 = vweird.f32 %v2617_v29  ;;  %v431_v57 = vsub.f32 1.0, %v418_v24  ;;  %v437_v59 = vmul.f32 %v418_v24, %v3071_v49 }
 0x2f9   :  { %vm348_vm1 = vmor %vm346_vm15, %vm347_vm14 }
 0x2fa   :  { %v343_v31 = vsub.f32 1.0, %v342_v30 }
 0x2fc   :  { %v344_v34 = vmul.f32 %v2617_v29, %v343_v31 }
 0x2fe   :  { %v345_v35 = vadd.f32 %v2617_v29, %v344_v34 }
 0x300   :  { %v349_v40 = vsel %vm348_vm1, %v2617_v29, %v345_v35 }
 0x301   :  { %v354_v46 = vsel %vm351_vm2, %v353_v42, %v349_v40 }
 0x302   :  { %v373_v63 = vmul.f32 %v354_v46, %v3080_v53 }
 0x334   :  { %v422_v25 = vpop.permute.xlu2 %421 }
 0x335   :  { %v424_v26 = vmul.f32 %v422_v25, %v418_v24 }
 0x337   :  { %426 = vrot.lane.b32.xlu1 %v424_v26, %s2840_s0 }
 0x354   :  { %v358_v44 = vpop.permute.xlu0 %357 }
 0x355   :  { %v360_v47 = vmul.f32 %v358_v44, %v354_v46 }
 0x357   :  { %362 = vrot.lane.b32.xlu2 %v360_v47, %s2840_s0 }
 0x3a9   :  { %v427_v50 = vpop.permute.xlu1 %426 }
 0x3aa   :  { %v429_v51 = vadd.f32 %v427_v50, %v3059_v45  ;;  %v367_v45 = vsub.f32 1.0, %v354_v46 }
 0x3ac   :  { %2618 = vtanh.f32 %v429_v51 }
 0x3b1   :  { %v363_v52 = vpop.permute.xlu2 %362 }
 0x3b2   :  { %v2619_v54 = vpop.eup %2618  ;;  %v365_v55 = vadd.f32 %v363_v52, %v97_v6 }
 0x3b3   :  { %433 = vrot.lane.b32.xlu0 %v2619_v54, %s2841_s28 }
 0x3b4   :  { %2620 = vtanh.f32 %v365_v55 }
 0x3ba   :  { %v2621_v56 = vpop.eup %2620 }
 0x3bb   :  { %369 = vrot.lane.b32.xlu1 %v2621_v56, %s2841_s28 }
 0x425   :  { %v434_v58 = vpop.permute.xlu0 %433 }
 0x426   :  { %v436_v60 = vmul.f32 %v434_v58, %v431_v57 }
 0x428   :  { %v3110_v61 = vadd.f32 %v437_v59, %v436_v60 }
 0x42a   :  { %507 = vrot.lane.b32.xlu2 %v3110_v61, %s2841_s28  ;;  %444 = vst.msk [vmem:[%s3918_s9 + $0x30] sm:$0xff] %vm312_vm9, %v3110_v61 }
 0x42d   :  { %v370_v62 = vpop.permute.xlu1 %369 }
 0x42e   :  { %v372_v0 = vmul.f32 %v370_v62, %v367_v45 }
 0x430   :  { %v3120_v3 = vadd.f32 %v373_v63, %v372_v0 }
 0x432   :  { %440 = vrot.lane.b32.xlu0 %v3120_v3, %s2841_s28 }
 0x484   :  { %v508_v49 = vpop.permute.xlu2 %507 }
 0x485   :  { %2502 = vmatmul.msk.f32.vlgmr.msra.gmra.mxu3 %vm51_vm0, %v508_v49 }
 0x486   :  { %785 = vmatpush.msra.mxu3 %v2911_v2 }
 0x488   :  { %786 = vmatpush.msra.mxu3 %v2925_v5 }
 0x48a   :  { %787 = vmatpush.msra.mxu3 %v2940_v8 }
 0x48c   :  { %788 = vmatpush.msra.mxu3 %v2961_v13 }
 0x4a4   :  { %v441_v6 = vpop.permute.xlu0 %440 }
 0x4a5   :  { %443 = vst.msk [vmem:[%s3918_s9 + $0x8] sm:$0xff] %vm51_vm0, %v441_v6  ;;  %2500 = vmatmul.msk.f32.vlgmr.msra.gmra.mxu2 %vm51_vm0, %v441_v6 }
 0x4a6   :  { %721 = vmatpush.msra.mxu2 %v2906_v1 }
 0x4a8   :  { %722 = vmatpush.msra.mxu2 %v2920_v4 }
 0x4aa   :  { %723 = vmatpush.msra.mxu2 %v2934_v7 }
 0x4ac   :  { %724 = vmatpush.msra.mxu2 %v2952_v11 }
 0x508   :  { %v528_v53 = vpop.f32.mrf.mxu3 }
 0x509   :  { %v529_v9 = vadd.f32 %v3038_v28, %v528_v53 }
 0x50b   :  { %552 = vrot.lane.b32.xlu1 %v529_v9, %s2840_s0  ;;  %v531_v14 = vadd.f32 %v529_v9, %v3057_v43 }
 0x50d   :  { %v2503_v16 = vmul.f32 -1.442695, %v531_v14 }
 0x50f   :  { %2622 = vpow2.f32 %v2503_v16 }
 0x515   :  { %v2623_v21 = vpop.eup %2622 }
 0x516   :  { %v535_v22 = vadd.f32 1.0, %v2623_v21 }
 0x518   :  { %v547_v38 = vand.u32 2147483648, %v535_v22  ;;  %vm541_vm4 = vweird.f32 %v535_v22  ;;  %v545_v40 = vand.u32 2147483647, %v535_v22 }
 0x51a   :  { %v548_v46 = vor.u32 1.1754944e-38, %v547_v38  ;;  %vm546_vm6 = vcmp.eq.f32.partialorder %v545_v40, 8.507059e+37 }
 0x528   :  { %v464_v10 = vpop.f32.mrf.mxu2 }
 0x529   :  { %v465_v12 = vadd.f32 %v3047_v33, %v464_v10 }
 0x52b   :  { %488 = vrot.lane.b32.xlu2 %v465_v12, %s2840_s0  ;;  %v467_v19 = vadd.f32 %v465_v12, %v100_v18 }
 0x52d   :  { %v2501_v20 = vmul.f32 -1.442695, %v467_v19 }
 0x52f   :  { %2624 = vpow2.f32 %v2501_v20 }
 0x530   :  { %2626 = vrcp.f32 %v535_v22 }
 0x535   :  { %v2625_v23 = vpop.eup %2624 }
 0x536   :  { %v471_v24 = vadd.f32 1.0, %v2625_v23  ;;  %v2627_v25 = vpop.eup %2626 }
 0x537   :  { %v537_v26 = vmul.f32 %v2627_v25, %v535_v22  ;;  %vm542_vm3 = vweird.f32 %v2627_v25 }
 0x538   :  { %2628 = vrcp.f32 %v471_v24  ;;  %vm543_vm5 = vmor %vm541_vm4, %vm542_vm3  ;;  %v483_v54 = vand.u32 2147483648, %v471_v24  ;;  %vm477_vm8 = vweird.f32 %v471_v24  ;;  %v481_v55 = vand.u32 2147483647, %v471_v24 }
 0x539   :  { %v538_v29 = vsub.f32 1.0, %v537_v26 }
 0x53a   :  { %v484_v57 = vor.u32 1.1754944e-38, %v483_v54  ;;  %vm482_vm11 = vcmp.eq.f32.partialorder %v481_v55, 8.507059e+37 }
 0x53b   :  { %v539_v31 = vmul.f32 %v2627_v25, %v538_v29 }
 0x53d   :  { %v540_v35 = vadd.f32 %v2627_v25, %v539_v31 }
 0x53e   :  { %v2629_v30 = vpop.eup %2628 }
 0x53f   :  { %v473_v34 = vmul.f32 %v2629_v30, %v471_v24  ;;  %v544_v42 = vsel %vm543_vm5, %v2627_v25, %v540_v35  ;;  %vm478_vm7 = vweird.f32 %v2629_v30  ;;  %v102_v25 = vpop.f32.mrf.mxu0 }
 0x540   :  { %v549_v50 = vsel %vm546_vm6, %v548_v46, %v544_v42  ;;  %vm479_vm10 = vmor %vm477_vm8, %vm478_vm7  ;;  %v103_v29 = vadd.f32 %v3064_v48, %v102_v25 }
 0x541   :  { %v474_v36 = vsub.f32 1.0, %v473_v34  ;;  %v562_v53 = vsub.f32 1.0, %v549_v50  ;;  %v568_v10 = vmul.f32 %v549_v50, %v3110_v61 }
 0x543   :  { %v475_v44 = vmul.f32 %v2629_v30, %v474_v36 }
 0x545   :  { %v476_v52 = vadd.f32 %v2629_v30, %v475_v44 }
 0x547   :  { %v480_v56 = vsel %vm479_vm10, %v2629_v30, %v476_v52 }
 0x548   :  { %v485_v58 = vsel %vm482_vm11, %v484_v57, %v480_v56 }
 0x549   :  { %v504_v16 = vmul.f32 %v485_v58, %v3120_v3 }
 0x57d   :  { %v553_v47 = vpop.permute.xlu1 %552 }
 0x57e   :  { %v555_v51 = vmul.f32 %v553_v47, %v549_v50 }
 0x580   :  { %557 = vrot.lane.b32.xlu0 %v555_v51, %s2840_s0 }
 0x585   :  { %v489_v59 = vpop.permute.xlu2 %488 }
 0x586   :  { %v491_v60 = vmul.f32 %v489_v59, %v485_v58 }
 0x588   :  { %493 = vrot.lane.b32.xlu1 %v491_v60, %s2840_s0 }
 0x5f2   :  { %v558_v45 = vpop.permute.xlu0 %557 }
 0x5f3   :  { %v560_v62 = vadd.f32 %v558_v45, %v3057_v43  ;;  %v498_v43 = vsub.f32 1.0, %v485_v58 }
 0x5f5   :  { %2630 = vtanh.f32 %v560_v62 }
 0x5fa   :  { %v494_v63 = vpop.permute.xlu1 %493 }
 0x5fb   :  { %v2631_v0 = vpop.eup %2630  ;;  %v496_v49 = vadd.f32 %v494_v63, %v100_v18 }
 0x5fc   :  { %564 = vrot.lane.b32.xlu2 %v2631_v0, %s2841_s28 }
 0x5fd   :  { %2632 = vtanh.f32 %v496_v49 }
 0x603   :  { %v2633_v6 = vpop.eup %2632 }
 0x604   :  { %500 = vrot.lane.b32.xlu0 %v2633_v6, %s2841_s28 }
 0x656   :  { %v565_v9 = vpop.permute.xlu2 %564 }
 0x657   :  { %v567_v12 = vmul.f32 %v565_v9, %v562_v53 }
 0x659   :  { %v3150_v14 = vadd.f32 %v568_v10, %v567_v12 }
 0x65b   :  { %638 = vrot.lane.b32.xlu1 %v3150_v14, %s2841_s28  ;;  %575 = vst.msk [vmem:[%s3918_s9 + $0x28] sm:$0xff] %vm312_vm9, %v3150_v14 }
 0x676   :  { %v501_v15 = vpop.permute.xlu0 %500 }
 0x677   :  { %v503_v18 = vmul.f32 %v501_v15, %v498_v43 }
 0x679   :  { %v3160_v19 = vadd.f32 %v504_v16, %v503_v18 }
 0x67b   :  { %571 = vrot.lane.b32.xlu2 %v3160_v19, %s2841_s28 }
 0x6cd   :  { %v639_v61 = vpop.permute.xlu1 %638 }
 0x6ce   :  { %2506 = vmatmul.msk.f32.vlgmr.msrb.gmra.mxu3 %vm51_vm0, %v639_v61 }
 0x6cf   :  { %916 = vmatpush.msrb.mxu3 %v2911_v2 }
 0x6d1   :  { %917 = vmatpush.msrb.mxu3 %v2925_v5 }
 0x6d3   :  { %918 = vmatpush.msrb.mxu3 %v2940_v8 }
 0x6d5   :  { %v572_v20 = vpop.permute.xlu2 %571  ;;  %919 = vmatpush.msrb.mxu3 %v2961_v13 }
 0x6d6   :  { %574 = vst.msk [vmem:[%s3918_s9 + $0x10] sm:$0xff] %vm51_vm0, %v572_v20  ;;  %2504 = vmatmul.msk.f32.vlgmr.msrb.gmra.mxu2 %vm51_vm0, %v572_v20 }
 0x6d7   :  { %852 = vmatpush.msrb.mxu2 %v2906_v1 }
 0x6d9   :  { %853 = vmatpush.msrb.mxu2 %v2920_v4 }
 0x6db   :  { %854 = vmatpush.msrb.mxu2 %v2934_v7 }
 0x6dd   :  { %855 = vmatpush.msrb.mxu2 %v2952_v11 }
 0x751   :  { %v659_v3 = vpop.f32.mrf.mxu3 }
 0x752   :  { %v660_v21 = vadd.f32 %v3038_v28, %v659_v3 }
 0x754   :  { %683 = vrot.lane.b32.xlu0 %v660_v21, %s2840_s0  ;;  %v662_v24 = vadd.f32 %v660_v21, %v3055_v41 }
 0x756   :  { %v2507_v26 = vmul.f32 -1.442695, %v662_v24 }
 0x758   :  { %2634 = vpow2.f32 %v2507_v26 }
 0x759   :  { %v595_v22 = vpop.f32.mrf.mxu2 }
 0x75a   :  { %v596_v23 = vadd.f32 %v3047_v33, %v595_v22 }
 0x75c   :  { %619 = vrot.lane.b32.xlu1 %v596_v23, %s2840_s0  ;;  %v598_v30 = vadd.f32 %v596_v23, %v103_v29 }
 0x75e   :  { %v2505_v31 = vmul.f32 -1.442695, %v598_v30  ;;  %v2635_v34 = vpop.eup %2634 }
 0x75f   :  { %v666_v35 = vadd.f32 1.0, %v2635_v34 }
 0x760   :  { %2636 = vpow2.f32 %v2505_v31 }
 0x761   :  { %2638 = vrcp.f32 %v666_v35  ;;  %v678_v54 = vand.u32 2147483648, %v666_v35  ;;  %vm672_vm13 = vweird.f32 %v666_v35  ;;  %v676_v55 = vand.u32 2147483647, %v666_v35 }
 0x763   :  { %v679_v58 = vor.u32 1.1754944e-38, %v678_v54  ;;  %vm677_vm15 = vcmp.eq.f32.partialorder %v676_v55, 8.507059e+37 }
 0x766   :  { %v2637_v36 = vpop.eup %2636 }
 0x767   :  { %v602_v38 = vadd.f32 1.0, %v2637_v36  ;;  %v2639_v40 = vpop.eup %2638 }
 0x768   :  { %v668_v42 = vmul.f32 %v2639_v40, %v666_v35  ;;  %vm673_vm12 = vweird.f32 %v2639_v40 }
 0x769   :  { %2640 = vrcp.f32 %v602_v38  ;;  %vm674_vm14 = vmor %vm672_vm13, %vm673_vm12  ;;  %v614_v63 = vand.u32 2147483648, %v602_v38  ;;  %vm608_vm2 = vweird.f32 %v602_v38  ;;  %v612_v0 = vand.u32 2147483647, %v602_v38 }
 0x76a   :  { %v669_v44 = vsub.f32 1.0, %v668_v42 }
 0x76b   :  { %v615_v6 = vor.u32 1.1754944e-38, %v614_v63  ;;  %vm613_vm4 = vcmp.eq.f32.partialorder %v612_v0, 8.507059e+37 }
 0x76c   :  { %v670_v47 = vmul.f32 %v2639_v40, %v669_v44 }
 0x76e   :  { %v671_v51 = vadd.f32 %v2639_v40, %v670_v47 }
 0x76f   :  { %v2641_v46 = vpop.eup %2640 }
 0x770   :  { %v604_v50 = vmul.f32 %v2641_v46, %v602_v38  ;;  %v675_v56 = vsel %vm674_vm14, %v2639_v40, %v671_v51  ;;  %vm609_vm1 = vweird.f32 %v2641_v46 }
 0x771   :  { %v680_v60 = vsel %vm677_vm15, %v679_v58, %v675_v56  ;;  %vm610_vm3 = vmor %vm608_vm2, %vm609_vm1 }
 0x772   :  { %v605_v52 = vsub.f32 1.0, %v604_v50  ;;  %v693_v20 = vsub.f32 1.0, %v680_v60  ;;  %v699_v21 = vmul.f32 %v680_v60, %v3150_v14 }
 0x774   :  { %v606_v57 = vmul.f32 %v2641_v46, %v605_v52 }
 0x776   :  { %v607_v62 = vadd.f32 %v2641_v46, %v606_v57 }
 0x778   :  { %v611_v49 = vsel %vm610_vm3, %v2641_v46, %v607_v62 }
 0x779   :  { %v616_v9 = vsel %vm613_vm4, %v615_v6, %v611_v49 }
 0x77a   :  { %v635_v25 = vmul.f32 %v616_v9, %v3160_v19 }
 0x7c6   :  { %v684_v59 = vpop.permute.xlu0 %683 }
 0x7c7   :  { %v686_v45 = vmul.f32 %v684_v59, %v680_v60 }
 0x7c9   :  { %688 = vrot.lane.b32.xlu2 %v686_v45, %s2840_s0 }
 0x7ce   :  { %v620_v53 = vpop.permute.xlu1 %619 }
 0x7cf   :  { %v622_v10 = vmul.f32 %v620_v53, %v616_v9 }
 0x7d1   :  { %624 = vrot.lane.b32.xlu0 %v622_v10, %s2840_s0 }
 0x823   :  { %v689_v12 = vpop.permute.xlu2 %688 }
 0x824   :  { %v691_v43 = vadd.f32 %v689_v12, %v3055_v41  ;;  %v629_v41 = vsub.f32 1.0, %v616_v9 }
 0x826   :  { %2642 = vtanh.f32 %v691_v43 }
 0x82c   :  { %v2643_v15 = vpop.eup %2642 }
 0x82d   :  { %695 = vrot.lane.b32.xlu1 %v2643_v15, %s2841_s28 }
 0x843   :  { %v625_v16 = vpop.permute.xlu0 %624 }
 0x844   :  { %v627_v18 = vadd.f32 %v625_v16, %v103_v29 }
 0x846   :  { %2644 = vtanh.f32 %v627_v18 }
 0x84c   :  { %v2645_v61 = vpop.eup %2644 }
 0x84d   :  { %631 = vrot.lane.b32.xlu2 %v2645_v61, %s2841_s28 }
 0x89f   :  { %v696_v3 = vpop.permute.xlu1 %695 }
 0x8a0   :  { %v698_v22 = vmul.f32 %v696_v3, %v693_v20 }
 0x8a2   :  { %v3190_v23 = vadd.f32 %v699_v21, %v698_v22 }
 0x8a4   :  { %769 = vrot.lane.b32.xlu0 %v3190_v23, %s2841_s28  ;;  %706 = vst.msk [vmem:[%s3918_s9 + $0x20] sm:$0xff] %vm312_vm9, %v3190_v23 }
 0x8a7   :  { %v632_v24 = vpop.permute.xlu2 %631 }
 0x8a8   :  { %v634_v26 = vmul.f32 %v632_v24, %v629_v41 }
 0x8aa   :  { %v3200_v29 = vadd.f32 %v635_v25, %v634_v26 }
 0x8ac   :  { %702 = vrot.lane.b32.xlu1 %v3200_v29, %s2841_s28 }
 0x916   :  { %v770_v14 = vpop.permute.xlu0 %769 }
 0x917   :  { %2510 = vmatmul.msk.f32.vlgmr.msra.gmra.mxu3 %vm51_vm0, %v770_v14 }
 0x918   :  { %1047 = vmatpush.msra.mxu3 %v2911_v2 }
 0x91a   :  { %1048 = vmatpush.msra.mxu3 %v2925_v5 }
 0x91c   :  { %1049 = vmatpush.msra.mxu3 %v2940_v8 }
 0x91e   :  { %v703_v30 = vpop.permute.xlu1 %702  ;;  %1050 = vmatpush.msra.mxu3 %v2961_v13 }
 0x91f   :  { %705 = vst.msk [vmem:[%s3918_s9 + $0x18] sm:$0xff] %vm51_vm0, %v703_v30  ;;  %2508 = vmatmul.msk.f32.vlgmr.msra.gmra.mxu2 %vm51_vm0, %v703_v30  ;;  %v2790_v30 = vld [vmem:[%s3911_s2 + $0x38] sm:$0xff] }
 0x920   :  { %983 = vmatpush.msra.mxu2 %v2906_v1 }
 0x922   :  { %984 = vmatpush.msra.mxu2 %v2920_v4 }
 0x924   :  { %985 = vmatpush.msra.mxu2 %v2934_v7  ;;  %v105_v7 = vpop.f32.mrf.mxu0 }
 0x926   :  { %986 = vmatpush.msra.mxu2 %v2952_v11  ;;  %v106_v11 = vadd.f32 %v3064_v48, %v105_v7 }
 0x99a   :  { %v790_v2 = vpop.f32.mrf.mxu3 }
 0x99b   :  { %v791_v5 = vadd.f32 %v3038_v28, %v790_v2  ;;  %v2791_v2 = vld [vmem:[%s3911_s2 + $0x30] sm:$0xff] }
 0x99d   :  { %814 = vrot.lane.b32.xlu2 %v791_v5, %s2840_s0  ;;  %v793_v19 = vadd.f32 %v791_v5, %v3053_v39  ;;  %v2793_v5 = vld [vmem:[%s3911_s2 + $0x20] sm:$0xff] }
 0x99f   :  { %v2511_v31 = vmul.f32 -1.442695, %v793_v19  ;;  %v2795_v19 = vld [vmem:[%s3911_s2 + $0x10] sm:$0xff] }
 0x9a1   :  { %2646 = vpow2.f32 %v2511_v31  ;;  %v2796_v31 = vld [vmem:[%s3911_s2 + $0x8] sm:$0xff] }
 0x9a2   :  { %v726_v8 = vpop.f32.mrf.mxu2 }
 0x9a3   :  { %v727_v13 = vadd.f32 %v3047_v33, %v726_v8 }
 0x9a5   :  { %750 = vrot.lane.b32.xlu0 %v727_v13, %s2840_s0  ;;  %v729_v36 = vadd.f32 %v727_v13, %v106_v11  ;;  %v2794_v13 = vld [vmem:[%s3911_s2 + $0x18] sm:$0xff] }
 0x9a7   :  { %v2647_v1 = vpop.eup %2646  ;;  %v2509_v40 = vmul.f32 -1.442695, %v729_v36  ;;  %v108_v36 = vpop.f32.mrf.mxu0 }
 0x9a8   :  { %v797_v4 = vadd.f32 1.0, %v2647_v1  ;;  %v2797_v1 = vld [vmem:[%s3911_s2] sm:$0xff] }
 0x9aa   :  { %2648 = vrcp.f32 %v797_v4  ;;  %v809_v46 = vand.u32 2147483648, %v797_v4  ;;  %vm803_vm6 = vweird.f32 %v797_v4  ;;  %v807_v47 = vand.u32 2147483647, %v797_v4 }
 0x9ab   :  { %2650 = vpow2.f32 %v2509_v40  ;;  %v109_v40 = vadd.f32 %v3064_v48, %v108_v36 }
 0x9ac   :  { %v810_v52 = vor.u32 1.1754944e-38, %v809_v46  ;;  %vm808_vm8 = vcmp.eq.f32.partialorder %v807_v47, 8.507059e+37 }
 0x9b0   :  { %v2649_v34 = vpop.eup %2648 }
 0x9b1   :  { %v799_v35 = vmul.f32 %v2649_v34, %v797_v4  ;;  %vm804_vm5 = vweird.f32 %v2649_v34  ;;  %v2651_v50 = vpop.eup %2650 }
 0x9b2   :  { %vm805_vm7 = vmor %vm803_vm6, %vm804_vm5  ;;  %v733_v54 = vadd.f32 1.0, %v2651_v50 }
 0x9b3   :  { %v800_v38 = vsub.f32 1.0, %v799_v35 }
 0x9b4   :  { %2652 = vrcp.f32 %v733_v54  ;;  %v745_v63 = vand.u32 2147483648, %v733_v54  ;;  %vm739_vm11 = vweird.f32 %v733_v54  ;;  %v743_v0 = vand.u32 2147483647, %v733_v54 }
 0x9b5   :  { %v801_v42 = vmul.f32 %v2649_v34, %v800_v38 }
 0x9b6   :  { %v746_v6 = vor.u32 1.1754944e-38, %v745_v63  ;;  %vm744_vm13 = vcmp.eq.f32.partialorder %v743_v0, 8.507059e+37 }
 0x9b7   :  { %v802_v44 = vadd.f32 %v2649_v34, %v801_v42 }
 0x9b9   :  { %v806_v51 = vsel %vm805_vm7, %v2649_v34, %v802_v44 }
 0x9ba   :  { %v811_v55 = vsel %vm808_vm8, %v810_v52, %v806_v51  ;;  %v2653_v58 = vpop.eup %2652 }
 0x9bb   :  { %v735_v59 = vmul.f32 %v2653_v58, %v733_v54  ;;  %vm740_vm10 = vweird.f32 %v2653_v58  ;;  %v824_v20 = vsub.f32 1.0, %v811_v55  ;;  %v830_v21 = vmul.f32 %v811_v55, %v3190_v23 }
 0x9bc   :  { %vm741_vm12 = vmor %vm739_vm11, %vm740_vm10 }
 0x9bd   :  { %v736_v60 = vsub.f32 1.0, %v735_v59 }
 0x9bf   :  { %v737_v45 = vmul.f32 %v2653_v58, %v736_v60 }
 0x9c1   :  { %v738_v62 = vadd.f32 %v2653_v58, %v737_v45 }
 0x9c3   :  { %v742_v49 = vsel %vm741_vm12, %v2653_v58, %v738_v62 }
 0x9c4   :  { %v747_v9 = vsel %vm744_vm13, %v746_v6, %v742_v49 }
 0x9c5   :  { %v766_v25 = vmul.f32 %v747_v9, %v3200_v29  ;;  %v2792_v29 = vld [vmem:[%s3911_s2 + $0x28] sm:$0xff]  ;;  %s2842_s2 = smov [#allocation2]  }
 0x9c6   :  { %s2452_s24 = sshll.u32 %s2842_s2, 4  ;;  %s2453_s24 = int_to_ptr.vmem [resolvable:$true] %s2452_s24 }
 0x9f7   :  { %v815_v56 = vpop.permute.xlu2 %814 }
 0x9f8   :  { %v817_v57 = vmul.f32 %v815_v56, %v811_v55 }
 0x9fa   :  { %819 = vrot.lane.b32.xlu1 %v817_v57, %s2840_s0 }
 0xa17   :  { %v751_v53 = vpop.permute.xlu0 %750 }
 0xa18   :  { %v753_v10 = vmul.f32 %v751_v53, %v747_v9 }
 0xa1a   :  { %755 = vrot.lane.b32.xlu2 %v753_v10, %s2840_s0 }
 0xa6c   :  { %v820_v12 = vpop.permute.xlu1 %819 }
 0xa6d   :  { %v822_v43 = vadd.f32 %v820_v12, %v3053_v39  ;;  %v760_v39 = vsub.f32 1.0, %v747_v9 }
 0xa6f   :  { %2654 = vtanh.f32 %v822_v43 }
 0xa74   :  { %v756_v15 = vpop.permute.xlu2 %755 }
 0xa75   :  { %v2655_v16 = vpop.eup %2654  ;;  %v758_v18 = vadd.f32 %v756_v15, %v106_v11 }
 0xa76   :  { %826 = vrot.lane.b32.xlu0 %v2655_v16, %s2841_s28 }
 0xa77   :  { %2656 = vtanh.f32 %v758_v18 }
 0xa7d   :  { %v2657_v61 = vpop.eup %2656 }
 0xa7e   :  { %762 = vrot.lane.b32.xlu1 %v2657_v61, %s2841_s28 }
 0xae8   :  { %v827_v3 = vpop.permute.xlu0 %826 }
 0xae9   :  { %v829_v22 = vmul.f32 %v827_v3, %v824_v20 }
 0xaeb   :  { %v3230_v41 = vadd.f32 %v830_v21, %v829_v22 }
 0xaed   :  { %837 = vst.msk [vmem:[%s3918_s9 + $0x18] sm:$0xff] %vm312_vm9, %v3230_v41  ;;  %900 = vrot.lane.b32.xlu2 %v3230_v41, %s2841_s28 }
 0xaf0   :  { %v763_v24 = vpop.permute.xlu1 %762 }
 0xaf1   :  { %v765_v26 = vmul.f32 %v763_v24, %v760_v39 }
 0xaf3   :  { %v3240_v14 = vadd.f32 %v766_v25, %v765_v26 }
 0xaf5   :  { %833 = vrot.lane.b32.xlu0 %v3240_v14, %s2841_s28 }
 0xb47   :  { %v901_v23 = vpop.permute.xlu2 %900 }
 0xb48   :  { %2514 = vmatmul.msk.f32.vlgmr.msrb.gmra.mxu3 %vm51_vm0, %v901_v23 }
 0xb49   :  { %1178 = vmatpush.msrb.mxu3 %v2790_v30 }
 0xb4b   :  { %1179 = vmatpush.msrb.mxu3 %v2791_v2 }
 0xb4d   :  { %1180 = vmatpush.msrb.mxu3 %v2792_v29 }
 0xb4f   :  { %1181 = vmatpush.msrb.mxu3 %v2793_v5 }
 0xb67   :  { %v834_v8 = vpop.permute.xlu0 %833 }
 0xb68   :  { %836 = vst.msk [vmem:[%s3918_s9 + $0x20] sm:$0xff] %vm51_vm0, %v834_v8  ;;  %2512 = vmatmul.msk.f32.vlgmr.msrb.gmra.mxu2 %vm51_vm0, %v834_v8 }
 0xb69   :  { %1114 = vmatpush.msrb.mxu2 %v2794_v13 }
 0xb6b   :  { %1115 = vmatpush.msrb.mxu2 %v2795_v19 }
 0xb6d   :  { %1116 = vmatpush.msrb.mxu2 %v2796_v31 }
 0xb6f   :  { %1117 = vmatpush.msrb.mxu2 %v2797_v1  ;;  %v3316_v1 = vld [vmem:[%s3913_s4] ss:$0 sm:$0xff] }
 0xbcb   :  { %v921_v4 = vpop.f32.mrf.mxu3 }
 0xbcc   :  { %v922_v7 = vadd.f32 %v3038_v28, %v921_v4 }
 0xbce   :  { %945 = vrot.lane.b32.xlu1 %v922_v7, %s2840_s0  ;;  %v924_v35 = vadd.f32 %v922_v7, %v3050_v37 }
 0xbd0   :  { %v2515_v38 = vmul.f32 -1.442695, %v924_v35  ;;  %v3324_v35 = vld [vmem:[%s3912_s3] ss:$0 sm:$0xff] }
 0xbd2   :  { %2658 = vpow2.f32 %v2515_v38 }
 0xbd8   :  { %v2659_v46 = vpop.eup %2658 }
 0xbd9   :  { %v928_v47 = vadd.f32 1.0, %v2659_v46 }
 0xbdb   :  { %v940_v48 = vand.u32 2147483648, %v928_v47  ;;  %vm934_vm15 = vweird.f32 %v928_v47  ;;  %v938_v59 = vand.u32 2147483647, %v928_v47 }
 0xbdd   :  { %v941_v62 = vor.u32 1.1754944e-38, %v940_v48  ;;  %vm939_vm2 = vcmp.eq.f32.partialorder %v938_v59, 8.507059e+37 }
 0xbeb   :  { %v857_v34 = vpop.f32.mrf.mxu2 }
 0xbec   :  { %v858_v11 = vadd.f32 %v3047_v33, %v857_v34  ;;  %v111_v34 = vpop.f32.mrf.mxu0 }
 0xbed   :  { %v112_v36 = vadd.f32 %v3324_v35, %v111_v34 }
 0xbee   :  { %881 = vrot.lane.b32.xlu2 %v858_v11, %s2840_s0  ;;  %v860_v42 = vadd.f32 %v858_v11, %v109_v40 }
 0xbf0   :  { %v2513_v44 = vmul.f32 -1.442695, %v860_v42 }
 0xbf2   :  { %2660 = vpow2.f32 %v2513_v44 }
 0xbf3   :  { %2662 = vrcp.f32 %v928_v47 }
 0xbf4   :  { %v114_v34 = vpop.f32.mrf.mxu0 }
 0xbf8   :  { %v2661_v28 = vpop.eup %2660 }
 0xbf9   :  { %v864_v50 = vadd.f32 1.0, %v2661_v28  ;;  %v2663_v51 = vpop.eup %2662 }
 0xbfa   :  { %v930_v33 = vmul.f32 %v2663_v51, %v928_v47  ;;  %vm935_vm14 = vweird.f32 %v2663_v51 }
 0xbfb   :  { %2664 = vrcp.f32 %v864_v50  ;;  %vm936_vm1 = vmor %vm934_vm15, %vm935_vm14  ;;  %v876_v53 = vand.u32 2147483648, %v864_v50  ;;  %vm870_vm4 = vweird.f32 %v864_v50  ;;  %v874_v9 = vand.u32 2147483647, %v864_v50 }
 0xbfc   :  { %v931_v52 = vsub.f32 1.0, %v930_v33 }
 0xbfd   :  { %v877_v12 = vor.u32 1.1754944e-38, %v876_v53  ;;  %vm875_vm6 = vcmp.eq.f32.partialorder %v874_v9, 8.507059e+37 }
 0xbfe   :  { %v932_v55 = vmul.f32 %v2663_v51, %v931_v52 }
 0xc00   :  { %v933_v57 = vadd.f32 %v2663_v51, %v932_v55 }
 0xc01   :  { %v2665_v54 = vpop.eup %2664 }
 0xc02   :  { %v866_v56 = vmul.f32 %v2665_v54, %v864_v50  ;;  %v937_v60 = vsel %vm936_vm1, %v2663_v51, %v933_v57  ;;  %vm871_vm3 = vweird.f32 %v2665_v54 }
 0xc03   :  { %v942_v0 = vsel %vm939_vm2, %v941_v62, %v937_v60  ;;  %vm872_vm5 = vmor %vm870_vm4, %vm871_vm3 }
 0xc04   :  { %v867_v58 = vsub.f32 1.0, %v866_v56  ;;  %v955_v39 = vsub.f32 1.0, %v942_v0  ;;  %v961_v25 = vmul.f32 %v942_v0, %v3230_v41 }
 0xc06   :  { %v868_v45 = vmul.f32 %v2665_v54, %v867_v58 }
 0xc08   :  { %v869_v6 = vadd.f32 %v2665_v54, %v868_v45 }
 0xc0a   :  { %v873_v10 = vsel %vm872_vm5, %v2665_v54, %v869_v6 }
 0xc0b   :  { %v878_v43 = vsel %vm875_vm6, %v877_v12, %v873_v10 }
 0xc0c   :  { %v897_v2 = vmul.f32 %v878_v43, %v3240_v14  ;;  %v3309_v14 = vld [vmem:[%s3913_s4 + $0x1] ss:$0 sm:$0xff] }
 0xc40   :  { %v946_v63 = vpop.permute.xlu1 %945 }
 0xc41   :  { %v948_v49 = vmul.f32 %v946_v63, %v942_v0 }
 0xc43   :  { %950 = vrot.lane.b32.xlu0 %v948_v49, %s2840_s0 }
 0xc48   :  { %v882_v15 = vpop.permute.xlu2 %881 }
 0xc49   :  { %v884_v16 = vmul.f32 %v882_v15, %v878_v43 }
 0xc4b   :  { %886 = vrot.lane.b32.xlu1 %v884_v16, %s2840_s0 }
 0xcb5   :  { %v951_v18 = vpop.permute.xlu0 %950 }
 0xcb6   :  { %v953_v61 = vadd.f32 %v951_v18, %v3050_v37  ;;  %v891_v37 = vsub.f32 1.0, %v878_v43 }
 0xcb8   :  { %2666 = vtanh.f32 %v953_v61 }
 0xcbd   :  { %v887_v20 = vpop.permute.xlu1 %886 }
 0xcbe   :  { %v2667_v3 = vpop.eup %2666  ;;  %v889_v21 = vadd.f32 %v887_v20, %v109_v40 }
 0xcbf   :  { %957 = vrot.lane.b32.xlu2 %v2667_v3, %s2841_s28 }
 0xcc0   :  { %2668 = vtanh.f32 %v889_v21 }
 0xcc6   :  { %v2669_v22 = vpop.eup %2668 }
 0xcc7   :  { %893 = vrot.lane.b32.xlu0 %v2669_v22, %s2841_s28 }
 0xd19   :  { %v958_v24 = vpop.permute.xlu2 %957 }
 0xd1a   :  { %v960_v26 = vmul.f32 %v958_v24, %v955_v39 }
 0xd1c   :  { %v3286_v23 = vadd.f32 %v961_v25, %v960_v26 }
 0xd1e   :  { %968 = vst.msk [vmem:[%s3918_s9 + $0x10] sm:$0xff] %vm312_vm9, %v3286_v23  ;;  %1031 = vrot.lane.b32.xlu1 %v3286_v23, %s2841_s28 }
 0xd39   :  { %v894_v30 = vpop.permute.xlu0 %893 }
 0xd3a   :  { %v896_v29 = vmul.f32 %v894_v30, %v891_v37 }
 0xd3c   :  { %v3296_v5 = vadd.f32 %v897_v2, %v896_v29 }
 0xd3e   :  { %964 = vrot.lane.b32.xlu2 %v3296_v5, %s2841_s28 }
 0xd90   :  { %v1032_v41 = vpop.permute.xlu1 %1031 }
 0xd91   :  { %2518 = vmatmul.msk.f32.vlgmr.msra.gmra.mxu3 %vm51_vm0, %v1032_v41 }
 0xd98   :  { %v965_v8 = vpop.permute.xlu2 %964 }
 0xd99   :  { %967 = vst.msk [vmem:[%s3918_s9 + $0x28] sm:$0xff] %vm51_vm0, %v965_v8  ;;  %2516 = vmatmul.msk.f32.vlgmr.msra.gmra.mxu2 %vm51_vm0, %v965_v8 }
 0xe14   :  { %v1052_v13 = vpop.f32.mrf.mxu3 }
 0xe15   :  { %v1053_v19 = vadd.f32 %v3309_v14, %v1052_v13 }
 0xe17   :  { %1076 = vrot.lane.b32.xlu0 %v1053_v19, %s2840_s0  ;;  %v1055_v7 = vadd.f32 %v1053_v19, %v3041_v32 }
 0xe19   :  { %v2519_v11 = vmul.f32 -1.442695, %v1055_v7 }
 0xe1b   :  { %2670 = vpow2.f32 %v2519_v11 }
 0xe1c   :  { %v988_v31 = vpop.f32.mrf.mxu2 }
 0xe1d   :  { %v989_v4 = vadd.f32 %v3316_v1, %v988_v31 }
 0xe1f   :  { %1012 = vrot.lane.b32.xlu1 %v989_v4, %s2840_s0  ;;  %v991_v38 = vadd.f32 %v989_v4, %v112_v36 }
 0xe21   :  { %v2517_v40 = vmul.f32 -1.442695, %v991_v38  ;;  %v2671_v42 = vpop.eup %2670 }
 0xe22   :  { %v1059_v44 = vadd.f32 1.0, %v2671_v42 }
 0xe23   :  { %2672 = vpow2.f32 %v2517_v40 }
 0xe24   :  { %2674 = vrcp.f32 %v1059_v44  ;;  %v1071_v57 = vand.u32 2147483648, %v1059_v44  ;;  %vm1065_vm8 = vweird.f32 %v1059_v44  ;;  %v1069_v58 = vand.u32 2147483647, %v1059_v44 }
 0xe26   :  { %v1072_v60 = vor.u32 1.1754944e-38, %v1071_v57  ;;  %vm1070_vm11 = vcmp.eq.f32.partialorder %v1069_v58, 8.507059e+37 }
 0xe29   :  { %v2673_v46 = vpop.eup %2672 }
 0xe2a   :  { %v995_v47 = vadd.f32 1.0, %v2673_v46  ;;  %v2675_v28 = vpop.eup %2674 }
 0xe2b   :  { %v1061_v50 = vmul.f32 %v2675_v28, %v1059_v44  ;;  %vm1066_vm7 = vweird.f32 %v2675_v28 }
 0xe2c   :  { %2676 = vrcp.f32 %v995_v47  ;;  %vm1067_vm10 = vmor %vm1065_vm8, %vm1066_vm7  ;;  %v1007_v49 = vand.u32 2147483648, %v995_v47  ;;  %vm1001_vm13 = vweird.f32 %v995_v47  ;;  %v1005_v6 = vand.u32 2147483647, %v995_v47 }
 0xe2d   :  { %v1062_v51 = vsub.f32 1.0, %v1061_v50 }
 0xe2e   :  { %v1008_v9 = vor.u32 1.1754944e-38, %v1007_v49  ;;  %vm1006_vm15 = vcmp.eq.f32.partialorder %v1005_v6, 8.507059e+37  ;;  %v3373_v6 = vld [vmem:[%s3915_s6 + $0x18] sm:$0xff] }
 0xe2f   :  { %v1063_v52 = vmul.f32 %v2675_v28, %v1062_v51  ;;  %1406 = vmatpush.msra.mxu2 %v3373_v6 }
 0xe31   :  { %v1064_v55 = vadd.f32 %v2675_v28, %v1063_v52 }
 0xe32   :  { %v2677_v33 = vpop.eup %2676 }
 0xe33   :  { %v997_v54 = vmul.f32 %v2677_v33, %v995_v47  ;;  %v1068_v48 = vsel %vm1067_vm10, %v2675_v28, %v1064_v55  ;;  %vm1002_vm12 = vweird.f32 %v2677_v33  ;;  %vm1258_vm10 = vcmask 523264  }
 0xe34   :  { %v1073_v62 = vsel %vm1070_vm11, %v1072_v60, %v1068_v48  ;;  %vm1003_vm14 = vmor %vm1001_vm13, %vm1002_vm12 }
 0xe35   :  { %v998_v56 = vsub.f32 1.0, %v997_v54  ;;  %v1086_v21 = vsub.f32 1.0, %v1073_v62  ;;  %v1092_v39 = vmul.f32 %v1073_v62, %v3286_v23 }
 0xe37   :  { %v999_v59 = vmul.f32 %v2677_v33, %v998_v56 }
 0xe39   :  { %v1000_v0 = vadd.f32 %v2677_v33, %v999_v59 }
 0xe3b   :  { %v1004_v53 = vsel %vm1003_vm14, %v2677_v33, %v1000_v0 }
 0xe3c   :  { %v1009_v12 = vsel %vm1006_vm15, %v1008_v9, %v1004_v53  ;;  %v3378_v53 = vld [vmem:[%s3915_s6 + $0x10] sm:$0xff]  ;;  %v2539_v9 = vld [vmem:[%s3914_s5 + $0x78] sm:$0xff] }
 0xe3d   :  { %v1028_v37 = vmul.f32 %v1009_v12, %v3296_v5  ;;  %1346 = vmatpush.msrb.mxu1 %v2539_v9  ;;  %1407 = vmatpush.msra.mxu2 %v3378_v53 }
 0xe89   :  { %v1077_v45 = vpop.permute.xlu0 %1076 }
 0xe8a   :  { %v1079_v63 = vmul.f32 %v1077_v45, %v1073_v62 }
 0xe8c   :  { %1081 = vrot.lane.b32.xlu2 %v1079_v63, %s2840_s0 }
 0xe91   :  { %v1013_v10 = vpop.permute.xlu1 %1012 }
 0xe92   :  { %v1015_v43 = vmul.f32 %v1013_v10, %v1009_v12  ;;  %v1253_v10 = vld [vmem:[%s3914_s5 + $0x38] sm:$0xff] }
 0xe93   :  { %1291 = vmatpush.msrb.mxu0 %v1253_v10 }
 0xe94   :  { %1017 = vrot.lane.b32.xlu0 %v1015_v43, %s2840_s0  ;;  %v1252_v43 = vld [vmem:[%s3914_s5 + $0x30] sm:$0xff] }
 0xe95   :  { %1292 = vmatpush.msrb.mxu0 %v1252_v43 }
 0xee6   :  { %v1082_v15 = vpop.permute.xlu2 %1081 }
 0xee7   :  { %v1084_v16 = vadd.f32 %v1082_v15, %v3041_v32  ;;  %v1022_v32 = vsub.f32 1.0, %v1009_v12  ;;  %v3390_v12 = vld [vmem:[%s3915_s6 + $0x8] sm:$0xff]  ;;  %v2538_v15 = vld [vmem:[%s3914_s5 + $0x70] sm:$0xff] }
 0xee8   :  { %1347 = vmatpush.msrb.mxu1 %v2538_v15  ;;  %1408 = vmatpush.msra.mxu2 %v3390_v12 }
 0xee9   :  { %2678 = vtanh.f32 %v1084_v16  ;;  %v3402_v16 = vld [vmem:[%s3915_s6] sm:$0xff] }
 0xeea   :  { %1409 = vmatpush.msra.mxu2 %v3402_v16 }
 0xeef   :  { %v2679_v18 = vpop.eup %2678 }
 0xef0   :  { %1088 = vrot.lane.b32.xlu1 %v2679_v18, %s2841_s28 }
 0xf06   :  { %v1018_v61 = vpop.permute.xlu0 %1017 }
 0xf07   :  { %v1020_v20 = vadd.f32 %v1018_v61, %v112_v36  ;;  %v3359_v36 = vadd.f32 %v3324_v35, %v114_v34 }
 0xf09   :  { %2680 = vtanh.f32 %v1020_v20 }
 0xf0f   :  { %v2681_v3 = vpop.eup %2680 }
 0xf10   :  { %1024 = vrot.lane.b32.xlu2 %v2681_v3, %s2841_s28 }
 0xf62   :  { %v1089_v22 = vpop.permute.xlu1 %1088 }
 0xf63   :  { %v1091_v24 = vmul.f32 %v1089_v22, %v1086_v21 }
 0xf65   :  { %v3333_v25 = vadd.f32 %v1092_v39, %v1091_v24  ;;  %v2537_v39 = vld [vmem:[%s3914_s5 + $0x68] sm:$0xff]  ;;  %v1250_v24 = vld [vmem:[%s3914_s5 + $0x20] sm:$0xff] }
 0xf66   :  { %1348 = vmatpush.msrb.mxu1 %v2537_v39 }
 0xf67   :  { %1099 = vst.msk [vmem:[%s3918_s9 + $0x8] sm:$0xff] %vm312_vm9, %v3333_v25  ;;  %1162 = vrot.lane.b32.xlu0 %v3333_v25, %s2841_s28 }
 0xf6a   :  { %v1025_v26 = vpop.permute.xlu2 %1024 }
 0xf6b   :  { %v1027_v30 = vmul.f32 %v1025_v26, %v1022_v32  ;;  %v2536_v32 = vld [vmem:[%s3914_s5 + $0x60] sm:$0xff]  ;;  %v1249_v26 = vld [vmem:[%s3914_s5 + $0x18] sm:$0xff] }
 0xf6c   :  { %1349 = vmatpush.msrb.mxu1 %v2536_v32 }
 0xf6d   :  { %v3343_v2 = vadd.f32 %v1028_v37, %v1027_v30  ;;  %v2535_v37 = vld [vmem:[%s3914_s5 + $0x58] sm:$0xff]  ;;  %v1248_v30 = vld [vmem:[%s3914_s5 + $0x10] sm:$0xff] }
 0xf6e   :  { %1350 = vmatpush.msrb.mxu1 %v2535_v37 }
 0xf6f   :  { %1095 = vrot.lane.b32.xlu1 %v3343_v2, %s2841_s28 }
 0xfd9   :  { %v1163_v23 = vpop.permute.xlu0 %1162 }
 0xfda   :  { %2522 = vmatmul.msk.f32.vlgmr.msrb.gmra.mxu3 %vm51_vm0, %v1163_v23  ;;  %v2534_v23 = vld [vmem:[%s3914_s5 + $0x50] sm:$0xff] }
 0xfdb   :  { %1351 = vmatpush.msrb.mxu1 %v2534_v23  ;;  %v3585_v23 = vld [vmem:[%s3916_s7 + $0x1] ss:$0 sm:$0xff] }
 0xfe1   :  { %v1096_v29 = vpop.permute.xlu1 %1095 }
 0xfe2   :  { %1098 = vst.msk [vmem:[%s3918_s9 + $0x30] sm:$0xff] %vm51_vm0, %v1096_v29  ;;  %2520 = vmatmul.msk.f32.vlgmr.msrb.gmra.mxu2 %vm51_vm0, %v1096_v29  ;;  %v1247_v29 = vld [vmem:[%s3914_s5 + $0x8] sm:$0xff] }
 0xfe3   :  { %1535 = vmatpush.msrb.mxu2 %v3373_v6 }
 0xfe5   :  { %1536 = vmatpush.msrb.mxu2 %v3378_v53 }
 0xfe7   :  { %1537 = vmatpush.msrb.mxu2 %v3390_v12 }
 0xfe9   :  { %1538 = vmatpush.msrb.mxu2 %v3402_v16 }
 0xfea   :  { %1410 = vmatmul.f32.vlgmr.msra.gmra.mxu2 %v2839_v17 }
 0xfeb   :  { %1666 = vmatpush.msra.mxu2 %v3373_v6 }
 0xfed   :  { %1667 = vmatpush.msra.mxu2 %v3378_v53 }
 0xfef   :  { %1668 = vmatpush.msra.mxu2 %v3390_v12 }
 0xff1   :  { %1669 = vmatpush.msra.mxu2 %v3402_v16 }
0x105d   :  { %v1183_v41 = vpop.f32.mrf.mxu3 }
0x105e   :  { %v1184_v5 = vadd.f32 %v3309_v14, %v1183_v41  ;;  %v2533_v41 = vld [vmem:[%s3914_s5 + $0x48] sm:$0xff] }
0x105f   :  { %1352 = vmatpush.msrb.mxu1 %v2533_v41 }
0x1060   :  { %1207 = vrot.lane.b32.xlu2 %v1184_v5, %s2840_s0  ;;  %v1186_v19 = vadd.f32 %v1184_v5, %v3033_v27  ;;  %v1246_v5 = vld [vmem:[%s3914_s5] sm:$0xff] }
0x1062   :  { %v2523_v31 = vmul.f32 -1.442695, %v1186_v19  ;;  %v3464_v19 = vld [vmem:[%s3915_s6 + $0x30] sm:$0xff] }
0x1064   :  { %2682 = vpow2.f32 %v2523_v31  ;;  %v3469_v31 = vld [vmem:[%s3915_s6 + $0x28] sm:$0xff] }
0x1065   :  { %v1119_v8 = vpop.f32.mrf.mxu2 }
0x1066   :  { %v1120_v13 = vadd.f32 %v3316_v1, %v1119_v8  ;;  %v2532_v8 = vld [vmem:[%s3914_s5 + $0x40] sm:$0xff] }
0x1067   :  { %1353 = vmatpush.msrb.mxu1 %v2532_v8 }
0x1068   :  { %1143 = vrot.lane.b32.xlu0 %v1120_v13, %s2840_s0  ;;  %v1122_v38 = vadd.f32 %v1120_v13, %v3359_v36  ;;  %v3458_v13 = vld [vmem:[%s3915_s6 + $0x38] sm:$0xff] }
0x1069   :  { %1468 = vmatpush.msra.mxu3 %v3458_v13 }
0x106a   :  { %v2683_v4 = vpop.eup %2682  ;;  %v2521_v42 = vmul.f32 -1.442695, %v1122_v38 }
0x106b   :  { %v1190_v7 = vadd.f32 1.0, %v2683_v4  ;;  %1469 = vmatpush.msra.mxu3 %v3464_v19  ;;  %v3475_v4 = vld [vmem:[%s3915_s6 + $0x20] sm:$0xff] }
0x106d   :  { %2684 = vrcp.f32 %v1190_v7  ;;  %v1202_v46 = vand.u32 2147483648, %v1190_v7  ;;  %vm1196_vm2 = vweird.f32 %v1190_v7  ;;  %v1200_v47 = vand.u32 2147483647, %v1190_v7  ;;  %1470 = vmatpush.msra.mxu3 %v3469_v31 }
0x106e   :  { %2686 = vpow2.f32 %v2521_v42 }
0x106f   :  { %v1203_v51 = vor.u32 1.1754944e-38, %v1202_v46  ;;  %vm1201_vm4 = vcmp.eq.f32.partialorder %v1200_v47, 8.507059e+37  ;;  %1471 = vmatpush.msra.mxu3 %v3475_v4  ;;  %v1411_v46 = vpop.f32.mrf.mxu2 }
0x1070   :  { %1472 = vmatmul.f32.vlgmr.msra.gmra.mxu3 %v2839_v17 }
0x1071   :  { %1599 = vmatpush.msrb.mxu3 %v3458_v13 }
0x1073   :  { %v2685_v11 = vpop.eup %2684  ;;  %1600 = vmatpush.msrb.mxu3 %v3464_v19 }
0x1074   :  { %v1192_v14 = vmul.f32 %v2685_v11, %v1190_v7  ;;  %vm1197_vm1 = vweird.f32 %v2685_v11  ;;  %v2687_v28 = vpop.eup %2686 }
0x1075   :  { %vm1198_vm3 = vmor %vm1196_vm2, %vm1197_vm1  ;;  %v1126_v33 = vadd.f32 1.0, %v2687_v28  ;;  %1601 = vmatpush.msrb.mxu3 %v3469_v31  ;;  %v1240_v28 = vld [vmem:[%s3918_s9 + $0x10] sm:$0xff] }
0x1076   :  { %v1193_v40 = vsub.f32 1.0, %v1192_v14 }
0x1077   :  { %2688 = vrcp.f32 %v1126_v33  ;;  %v1138_v59 = vand.u32 2147483648, %v1126_v33  ;;  %vm1132_vm6 = vweird.f32 %v1126_v33  ;;  %v1136_v60 = vand.u32 2147483647, %v1126_v33  ;;  %1602 = vmatpush.msrb.mxu3 %v3475_v4 }
0x1078   :  { %v1194_v1 = vmul.f32 %v2685_v11, %v1193_v40 }
0x1079   :  { %v1139_v62 = vor.u32 1.1754944e-38, %v1138_v59  ;;  %vm1137_vm8 = vcmp.eq.f32.partialorder %v1136_v60, 8.507059e+37  ;;  %1730 = vmatpush.msra.mxu3 %v3458_v13 }
0x107a   :  { %v1195_v44 = vadd.f32 %v2685_v11, %v1194_v1 }
0x107b   :  { %1731 = vmatpush.msra.mxu3 %v3464_v19 }
0x107c   :  { %v1199_v50 = vsel %vm1198_vm3, %v2685_v11, %v1195_v44  ;;  %v1239_v44 = vld [vmem:[%s3918_s9 + $0x8] sm:$0xff] }
0x107d   :  { %v3362_v35 = vsel %vm1201_vm4, %v1203_v51, %v1199_v50  ;;  %v2689_v55 = vpop.eup %2688  ;;  %1732 = vmatpush.msra.mxu3 %v3469_v31  ;;  %v1241_v50 = vld [vmem:[%s3918_s9 + $0x18] sm:$0xff]  ;;  %v1242_v51 = vld [vmem:[%s3918_s9 + $0x20] sm:$0xff] }
0x107e   :  { %v1128_v56 = vmul.f32 %v2689_v55, %v1126_v33  ;;  %vm1133_vm5 = vweird.f32 %v2689_v55  ;;  %v1217_v7 = vsub.f32 1.0, %v3362_v35  ;;  %v1223_v11 = vmul.f32 %v3362_v35, %v3333_v25  ;;  %v1243_v33 = vld [vmem:[%s3918_s9 + $0x28] sm:$0xff] }
0x107f   :  { %vm1134_vm7 = vmor %vm1132_vm6, %vm1133_vm5  ;;  %1733 = vmatpush.msra.mxu3 %v3475_v4 }
0x1080   :  { %v1129_v57 = vsub.f32 1.0, %v1128_v56 }
0x1082   :  { %v1130_v58 = vmul.f32 %v2689_v55, %v1129_v57 }
0x1084   :  { %v1131_v48 = vadd.f32 %v2689_v55, %v1130_v58  ;;  %v3564_v58 = vld [vmem:[%s3916_s7] ss:$0 sm:$0xff] }
0x1086   :  { %v1135_v45 = vsel %vm1134_vm7, %v2689_v55, %v1131_v48  ;;  %v3557_v55 = vld [vmem:[%s3917_s8 + $0x1] ss:$0 sm:$0xff] }
0x1087   :  { %v3366_v0 = vsel %vm1137_vm8, %v1139_v62, %v1135_v45 }
0x1088   :  { %v1153_v14 = vsub.f32 1.0, %v3366_v0  ;;  %v1159_v40 = vmul.f32 %v3366_v0, %v3343_v2  ;;  %v3515_v2 = vld [vmem:[%s3917_s8] ss:$0 sm:$0xff] }
0x1089   :  { %v1412_v47 = vadd.f32 %v3515_v2, %v1411_v46 }
0x10ba   :  { %v1208_v52 = vpop.permute.xlu2 %1207 }
0x10bb   :  { %v1210_v54 = vmul.f32 %v1208_v52, %v3362_v35  ;;  %v1244_v35 = vld [vmem:[%s3918_s9 + $0x30] sm:$0xff] }
0x10bd   :  { %1212 = vrot.lane.b32.xlu1 %v1210_v54, %s2840_s0 }
0x10da   :  { %v1144_v63 = vpop.permute.xlu0 %1143 }
0x10db   :  { %v1146_v49 = vmul.f32 %v1144_v63, %v3366_v0 }
0x10dd   :  { %1148 = vrot.lane.b32.xlu2 %v1146_v49, %s2840_s0 }
0x10f3   :  { %v1473_v56 = vpop.f32.mrf.mxu3 }
0x10f4   :  { %v1474_v57 = vadd.f32 %v3557_v55, %v1473_v56 }
0x112f   :  { %v1213_v18 = vpop.permute.xlu1 %1212 }
0x1130   :  { %v1215_v61 = vadd.f32 %v1213_v18, %v3033_v27  ;;  %v1251_v27 = vld [vmem:[%s3914_s5 + $0x28] sm:$0xff] }
0x1131   :  { %1293 = vmatpush.msrb.mxu0 %v1251_v27 }
0x1132   :  { %2690 = vtanh.f32 %v1215_v61 }
0x1133   :  { %1294 = vmatpush.msrb.mxu0 %v1250_v24 }
0x1135   :  { %1295 = vmatpush.msrb.mxu0 %v1249_v26 }
0x1137   :  { %v1149_v20 = vpop.permute.xlu2 %1148  ;;  %1296 = vmatpush.msrb.mxu0 %v1248_v30 }
0x1138   :  { %v2691_v3 = vpop.eup %2690  ;;  %v1151_v21 = vadd.f32 %v1149_v20, %v3359_v36 }
0x1139   :  { %1219 = vrot.lane.b32.xlu0 %v2691_v3, %s2841_s28  ;;  %1297 = vmatpush.msrb.mxu0 %v1247_v29 }
0x113a   :  { %2692 = vtanh.f32 %v1151_v21 }
0x113b   :  { %1298 = vmatpush.msrb.mxu0 %v1246_v5 }
0x1140   :  { %v2693_v22 = vpop.eup %2692 }
0x1141   :  { %1155 = vrot.lane.b32.xlu1 %v2693_v22, %s2841_s28  ;;  %1435 = vrot.lane.b32.xlu0 %v1412_v47, %s2840_s0 }
0x1149   :  { %1497 = vrot.lane.b32.xlu1 %v1474_v57, %s2840_s0 }
0x11ab   :  { %v1220_v34 = vpop.permute.xlu0 %1219 }
0x11ac   :  { %v1222_v36 = vmul.f32 %v1220_v34, %v1217_v7 }
0x11ae   :  { %v3490_v17 = vadd.f32 %v1223_v11, %v1222_v36 }
0x11b0   :  { %1230 = vst.msk [vmem:[%s3918_s9] sm:$0xff] %vm312_vm9, %v3490_v17 }
0x11b3   :  { %v1156_v38 = vpop.permute.xlu1 %1155  ;;  %v1436_v20 = vpop.permute.xlu0 %1435 }
0x11b4   :  { %v1158_v25 = vmul.f32 %v1156_v38, %v1153_v14 }
0x11b6   :  { %v1160_v42 = vadd.f32 %v1159_v40, %v1158_v25 }
0x11b7   :  { %v1238_v1 = vld [vmem:[%s3918_s9] sm:$0xff] }
0x11b8   :  { %2524 = vmatmul.msk.f32.vlgmr.msrb.gmra.mxu0 %vm1258_vm10, %v1238_v1  ;;  %2541 = vmatmul.msk.f32.vlgmr.msrb.gmra.mxu1 %vm1258_vm10, %v1238_v1 }
0x11b9   :  { %1226 = vrot.lane.b32.xlu2 %v1160_v42, %s2841_s28 }
0x11c0   :  { %2525 = vmatmul.msk.f32.gmra.mxu0 %vm1258_vm10, %v1239_v44  ;;  %2542 = vmatmul.msk.f32.gmra.mxu1 %vm1258_vm10, %v1239_v44 }
0x11c8   :  { %2526 = vmatmul.msk.f32.gmra.mxu0 %vm1258_vm10, %v1240_v28  ;;  %2543 = vmatmul.msk.f32.gmra.mxu1 %vm1258_vm10, %v1240_v28 }
0x11d0   :  { %2527 = vmatmul.msk.f32.gmra.mxu0 %vm1258_vm10, %v1241_v50  ;;  %2544 = vmatmul.msk.f32.gmra.mxu1 %vm1258_vm10, %v1241_v50 }
0x11d8   :  { %2528 = vmatmul.msk.f32.gmra.mxu0 %vm1258_vm10, %v1242_v51  ;;  %2545 = vmatmul.msk.f32.gmra.mxu1 %vm1258_vm10, %v1242_v51 }
0x11e0   :  { %2529 = vmatmul.msk.f32.gmra.mxu0 %vm1258_vm10, %v1243_v33  ;;  %2546 = vmatmul.msk.f32.gmra.mxu1 %vm1258_vm10, %v1243_v33 }
0x11e8   :  { %2530 = vmatmul.msk.f32.gmra.mxu0 %vm1258_vm10, %v1244_v35  ;;  %2547 = vmatmul.msk.f32.gmra.mxu1 %vm1258_vm10, %v1244_v35 }
0x1213   :  { %v1227_v52 = vpop.permute.xlu2 %1226 }
0x1214   :  { %1229 = vst.msk [vmem:[%s3918_s9 + $0x38] sm:$0xff] %vm51_vm0, %v1227_v52 }
0x1215   :  { %1231 = vst.msk [vmem:[#allocation2] sm:$0xff] %vm51_vm0, %v1227_v52 }
0x121b   :  { %v1245_v54 = vld [vmem:[%s3918_s9 + $0x38] sm:$0xff] }
0x121c   :  { %2531 = vmatmul.msk.f32.gmra.mxu0 %vm1258_vm10, %v1245_v54  ;;  %2548 = vmatmul.msk.f32.gmra.mxu1 %vm1258_vm10, %v1245_v54 }
0x1235   :  { %v1300_v48 = vpop.f32.mrf.mxu0  ;;  %v3567_v21 = vpop.f32.mrf.mxu1 }
0x1236   :  { %v1301_v59 = vadd.f32 %v3564_v58, %v1300_v48 }
0x1238   :  { %v1414_v60 = vadd.f32 %v1412_v47, %v1301_v59  ;;  %v1498_v47 = vpop.permute.xlu1 %1497 }
0x123a   :  { %v2554_v45 = vmul.f32 -1.442695, %v1414_v60 }
0x123c   :  { %2694 = vpow2.f32 %v2554_v45 }
0x123d   :  { %v3570_v39 = vpop.f32.mrf.mxu1 }
0x1242   :  { %v2695_v62 = vpop.eup %2694 }
0x1243   :  { %v1418_v63 = vadd.f32 1.0, %v2695_v62 }
0x1245   :  { %2696 = vrcp.f32 %v1418_v63  ;;  %v1430_v10 = vand.u32 2147483648, %v1418_v63  ;;  %v1428_v15 = vand.u32 2147483647, %v1418_v63  ;;  %vm1424_vm12 = vweird.f32 %v1418_v63  ;;  %v3572_v24 = vpop.f32.mrf.mxu1 }
0x1247   :  { %v1431_v61 = vor.u32 1.1754944e-38, %v1430_v10  ;;  %vm1429_vm14 = vcmp.eq.f32.partialorder %v1428_v15, 8.507059e+37 }
0x124b   :  { %v2697_v0 = vpop.eup %2696 }
0x124c   :  { %v1420_v49 = vmul.f32 %v2697_v0, %v1418_v63  ;;  %vm1425_vm11 = vweird.f32 %v2697_v0 }
0x124d   :  { %vm1426_vm13 = vmor %vm1424_vm12, %vm1425_vm11  ;;  %v3574_v32 = vpop.f32.mrf.mxu1 }
0x124e   :  { %v1421_v9 = vsub.f32 1.0, %v1420_v49 }
0x1250   :  { %v1422_v43 = vmul.f32 %v2697_v0, %v1421_v9 }
0x1252   :  { %v1423_v18 = vadd.f32 %v2697_v0, %v1422_v43 }
0x1254   :  { %v1427_v3 = vsel %vm1426_vm13, %v2697_v0, %v1423_v18  ;;  %v1303_v18 = vpop.f32.mrf.mxu0 }
0x1255   :  { %v1432_v22 = vsel %vm1429_vm14, %v1431_v61, %v1427_v3  ;;  %v3576_v26 = vpop.f32.mrf.mxu1  ;;  %v1304_v61 = vadd.f32 %v3564_v58, %v1303_v18 }
0x1256   :  { %v1438_v27 = vmul.f32 %v1436_v20, %v1432_v22  ;;  %v1445_v35 = vsub.f32 1.0, %v1432_v22 }
0x1258   :  { %1440 = vrot.lane.b32.xlu2 %v1438_v27, %s2840_s0 }
0x125d   :  { %v3578_v37 = vpop.f32.mrf.mxu1 }
0x1265   :  { %v3580_v30 = vpop.f32.mrf.mxu1 }
0x1299   :  { %v1376_v29 = vpop.f32.mrf.mxu1 }
0x129a   :  { %v1377_v41 = vadd.f32 %v3585_v23, %v1376_v29 }
0x129c   :  { %v1476_v5 = vadd.f32 %v1474_v57, %v1377_v41  ;;  %v1451_v57 = vmul.f32 0.0, %v1432_v22 }
0x129e   :  { %v2555_v8 = vmul.f32 -1.442695, %v1476_v5 }
0x12a0   :  { %2698 = vpow2.f32 %v2555_v8 }
0x12a6   :  { %v2699_v7 = vpop.eup %2698 }
0x12a7   :  { %v1480_v34 = vadd.f32 1.0, %v2699_v7 }
0x12a9   :  { %2700 = vrcp.f32 %v1480_v34  ;;  %v1492_v25 = vand.u32 2147483648, %v1480_v34  ;;  %v1490_v1 = vand.u32 2147483647, %v1480_v34  ;;  %vm1486_vm1 = vweird.f32 %v1480_v34 }
0x12ab   :  { %v1493_v46 = vor.u32 1.1754944e-38, %v1492_v25  ;;  %vm1491_vm3 = vcmp.eq.f32.partialorder %v1490_v1, 8.507059e+37 }
0x12af   :  { %v2701_v11 = vpop.eup %2700 }
0x12b0   :  { %v1482_v36 = vmul.f32 %v2701_v11, %v1480_v34  ;;  %vm1487_vm15 = vweird.f32 %v2701_v11 }
0x12b1   :  { %vm1488_vm2 = vmor %vm1486_vm1, %vm1487_vm15 }
0x12b2   :  { %v1441_v14 = vpop.permute.xlu2 %1440  ;;  %v1483_v38 = vsub.f32 1.0, %v1482_v36 }
0x12b3   :  { %v1443_v40 = vadd.f32 %v1441_v14, %v1301_v59 }
0x12b4   :  { %v1484_v42 = vmul.f32 %v2701_v11, %v1483_v38 }
0x12b5   :  { %2702 = vtanh.f32 %v1443_v40 }
0x12b6   :  { %v1485_v44 = vadd.f32 %v2701_v11, %v1484_v42 }
0x12b8   :  { %v1489_v28 = vsel %vm1488_vm2, %v2701_v11, %v1485_v44  ;;  %v1374_v44 = vadd.f32 %v3585_v23, %v3580_v30 }
0x12b9   :  { %v1494_v50 = vsel %vm1491_vm3, %v1493_v46, %v1489_v28 }
0x12ba   :  { %v1500_v51 = vmul.f32 %v1498_v47, %v1494_v50  ;;  %v1507_v45 = vsub.f32 1.0, %v1494_v50  ;;  %v1513_v63 = vmul.f32 0.0, %v1494_v50 }
0x12bb   :  { %v2703_v33 = vpop.eup %2702 }
0x12bc   :  { %1502 = vrot.lane.b32.xlu0 %v1500_v51, %s2840_s0  ;;  %1447 = vrot.lane.b32.xlu1 %v2703_v33, %s2841_s28 }
0x132e   :  { %v1503_v52 = vpop.permute.xlu0 %1502  ;;  %v1448_v54 = vpop.permute.xlu1 %1447 }
0x132f   :  { %v1505_v56 = vadd.f32 %v1503_v52, %v1377_v41  ;;  %v1450_v48 = vmul.f32 %v1448_v54, %v1445_v35 }
0x1331   :  { %2704 = vtanh.f32 %v1505_v56  ;;  %v3590_v59 = vadd.f32 %v1451_v57, %v1450_v48 }
0x1333   :  { %1516 = vrot.lane.b32.xlu0 %v3590_v59, %s2841_s28 }
0x1337   :  { %v2705_v60 = vpop.eup %2704 }
0x1338   :  { %1509 = vrot.lane.b32.xlu2 %v2705_v60, %s2841_s28 }
0x1392   :  { %v1510_v62 = vpop.permute.xlu2 %1509 }
0x1393   :  { %v1512_v0 = vmul.f32 %v1510_v62, %v1507_v45 }
0x1395   :  { %v3595_v49 = vadd.f32 %v1513_v63, %v1512_v0 }
0x1397   :  { %1520 = vst.msk [vmem:[%s3918_s9 + $0x38] sm:$0xff] %vm312_vm9, %v3595_v49  ;;  %1583 = vrot.lane.b32.xlu1 %v3595_v49, %s2841_s28 }
0x13a5   :  { %v1517_v9 = vpop.permute.xlu0 %1516 }
0x13a6   :  { %1519 = vst.msk [vmem:[%s3918_s9] sm:$0xff] %vm51_vm0, %v1517_v9  ;;  %2556 = vmatmul.msk.f32.vlgmr.msrb.gmra.mxu2 %vm51_vm0, %v1517_v9 }
0x13a7   :  { %1797 = vmatpush.msrb.mxu2 %v3373_v6 }
0x13a9   :  { %1798 = vmatpush.msrb.mxu2 %v3378_v53 }
0x13ab   :  { %1799 = vmatpush.msrb.mxu2 %v3390_v12 }
0x13ad   :  { %1800 = vmatpush.msrb.mxu2 %v3402_v16 }
0x1409   :  { %v1584_v10 = vpop.permute.xlu1 %1583 }
0x140a   :  { %2558 = vmatmul.msk.f32.vlgmr.msrb.gmra.mxu3 %vm51_vm0, %v1584_v10 }
0x140b   :  { %1861 = vmatpush.msrb.mxu3 %v3458_v13 }
0x140d   :  { %1862 = vmatpush.msrb.mxu3 %v3464_v19 }
0x140f   :  { %1863 = vmatpush.msrb.mxu3 %v3469_v31 }
0x1411   :  { %1864 = vmatpush.msrb.mxu3 %v3475_v4 }
0x1429   :  { %v1540_v43 = vpop.f32.mrf.mxu2 }
0x142a   :  { %v1541_v15 = vadd.f32 %v3515_v2, %v1540_v43 }
0x142c   :  { %1564 = vrot.lane.b32.xlu2 %v1541_v15, %s2840_s0  ;;  %v1543_v20 = vadd.f32 %v1541_v15, %v1304_v61 }
0x142e   :  { %v2557_v3 = vmul.f32 -1.442695, %v1543_v20 }
0x1430   :  { %2706 = vpow2.f32 %v2557_v3 }
0x1436   :  { %v2707_v22 = vpop.eup %2706 }
0x1437   :  { %v1547_v27 = vadd.f32 1.0, %v2707_v22 }
0x1439   :  { %2708 = vrcp.f32 %v1547_v27  ;;  %v1559_v34 = vand.u32 2147483648, %v1547_v27  ;;  %vm1553_vm5 = vweird.f32 %v1547_v27  ;;  %v1557_v11 = vand.u32 2147483647, %v1547_v27 }
0x143b   :  { %v1560_v14 = vor.u32 1.1754944e-38, %v1559_v34  ;;  %vm1558_vm7 = vcmp.eq.f32.partialorder %v1557_v11, 8.507059e+37  ;;  %v1306_v11 = vpop.f32.mrf.mxu0 }
0x143f   :  { %v2709_v29 = vpop.eup %2708 }
0x1440   :  { %v1549_v41 = vmul.f32 %v2709_v29, %v1547_v27  ;;  %vm1554_vm4 = vweird.f32 %v2709_v29 }
0x1441   :  { %vm1555_vm6 = vmor %vm1553_vm5, %vm1554_vm4 }
0x1442   :  { %v1550_v5 = vsub.f32 1.0, %v1549_v41 }
0x1444   :  { %v1551_v8 = vmul.f32 %v2709_v29, %v1550_v5 }
0x1446   :  { %v1552_v7 = vadd.f32 %v2709_v29, %v1551_v8 }
0x1448   :  { %v1556_v36 = vsel %vm1555_vm6, %v2709_v29, %v1552_v7 }
0x1449   :  { %v1561_v40 = vsel %vm1558_vm7, %v1560_v14, %v1556_v36  ;;  %v1307_v36 = vadd.f32 %v3564_v58, %v1306_v11 }
0x144a   :  { %v1574_v18 = vsub.f32 1.0, %v1561_v40  ;;  %v1580_v20 = vmul.f32 %v1561_v40, %v3590_v59 }
0x1486   :  { %v1565_v38 = vpop.permute.xlu2 %1564 }
0x1487   :  { %v1567_v25 = vmul.f32 %v1565_v38, %v1561_v40 }
0x1489   :  { %1569 = vrot.lane.b32.xlu1 %v1567_v25, %s2840_s0 }
0x148d   :  { %v1604_v42 = vpop.f32.mrf.mxu3 }
0x148e   :  { %v1605_v1 = vadd.f32 %v3557_v55, %v1604_v42 }
0x1490   :  { %1628 = vrot.lane.b32.xlu0 %v1605_v1, %s2840_s0  ;;  %v1607_v46 = vadd.f32 %v1605_v1, %v1374_v44 }
0x1492   :  { %v2559_v47 = vmul.f32 -1.442695, %v1607_v46 }
0x1494   :  { %2710 = vpow2.f32 %v2559_v47 }
0x149a   :  { %v2711_v28 = vpop.eup %2710 }
0x149b   :  { %v1611_v50 = vadd.f32 1.0, %v2711_v28 }
0x149d   :  { %2712 = vrcp.f32 %v1611_v50  ;;  %v1623_v48 = vand.u32 2147483648, %v1611_v50  ;;  %vm1617_vm10 = vweird.f32 %v1611_v50  ;;  %v1621_v60 = vand.u32 2147483647, %v1611_v50 }
0x149f   :  { %v1624_v45 = vor.u32 1.1754944e-38, %v1623_v48  ;;  %vm1622_vm12 = vcmp.eq.f32.partialorder %v1621_v60, 8.507059e+37  ;;  %v1371_v48 = vadd.f32 %v3585_v23, %v3578_v37 }
0x14a3   :  { %v2713_v51 = vpop.eup %2712 }
0x14a4   :  { %v1613_v33 = vmul.f32 %v2713_v51, %v1611_v50  ;;  %vm1618_vm8 = vweird.f32 %v2713_v51 }
0x14a5   :  { %vm1619_vm11 = vmor %vm1617_vm10, %vm1618_vm8 }
0x14a6   :  { %v1614_v35 = vsub.f32 1.0, %v1613_v33 }
0x14a8   :  { %v1615_v52 = vmul.f32 %v2713_v51, %v1614_v35 }
0x14aa   :  { %v1616_v56 = vadd.f32 %v2713_v51, %v1615_v52 }
0x14ac   :  { %v1620_v30 = vsel %vm1619_vm11, %v2713_v51, %v1616_v56 }
0x14ad   :  { %v1625_v63 = vsel %vm1622_vm12, %v1624_v45, %v1620_v30 }
0x14ae   :  { %v1638_v29 = vsub.f32 1.0, %v1625_v63  ;;  %v1644_v41 = vmul.f32 %v1625_v63, %v3595_v49 }
0x14fb   :  { %v1570_v54 = vpop.permute.xlu1 %1569 }
0x14fc   :  { %v1572_v57 = vadd.f32 %v1570_v54, %v1304_v61 }
0x14fe   :  { %2714 = vtanh.f32 %v1572_v57 }
0x1502   :  { %v1629_v62 = vpop.permute.xlu0 %1628 }
0x1503   :  { %v1631_v0 = vmul.f32 %v1629_v62, %v1625_v63 }
0x1504   :  { %v2715_v9 = vpop.eup %2714 }
0x1505   :  { %1633 = vrot.lane.b32.xlu2 %v1631_v0, %s2840_s0  ;;  %1576 = vrot.lane.b32.xlu0 %v2715_v9, %s2841_s28 }
0x155f   :  { %v1634_v10 = vpop.permute.xlu2 %1633 }
0x1560   :  { %v1636_v43 = vadd.f32 %v1634_v10, %v1374_v44 }
0x1562   :  { %2716 = vtanh.f32 %v1636_v43 }
0x1568   :  { %v2717_v15 = vpop.eup %2716 }
0x1569   :  { %1640 = vrot.lane.b32.xlu1 %v2717_v15, %s2841_s28 }
0x1577   :  { %v1577_v61 = vpop.permute.xlu0 %1576 }
0x1578   :  { %v1579_v3 = vmul.f32 %v1577_v61, %v1574_v18 }
0x157a   :  { %v3630_v22 = vadd.f32 %v1580_v20, %v1579_v3 }
0x157c   :  { %1647 = vrot.lane.b32.xlu2 %v3630_v22, %s2841_s28 }
0x15d6   :  { %v1648_v27 = vpop.permute.xlu2 %1647 }
0x15d7   :  { %1650 = vst.msk [vmem:[%s3918_s9 + $0x8] sm:$0xff] %vm51_vm0, %v1648_v27  ;;  %2560 = vmatmul.msk.f32.vlgmr.msra.gmra.mxu2 %vm51_vm0, %v1648_v27 }
0x15d8   :  { %1928 = vmatpush.msra.mxu2 %v3373_v6 }
0x15da   :  { %1929 = vmatpush.msra.mxu2 %v3378_v53 }
0x15db   :  { %v1641_v59 = vpop.permute.xlu1 %1640 }
0x15dc   :  { %v1643_v5 = vmul.f32 %v1641_v59, %v1638_v29  ;;  %1930 = vmatpush.msra.mxu2 %v3390_v12 }
0x15de   :  { %v3643_v8 = vadd.f32 %v1644_v41, %v1643_v5  ;;  %1931 = vmatpush.msra.mxu2 %v3402_v16 }
0x15e0   :  { %1651 = vst.msk [vmem:[%s3918_s9 + $0x30] sm:$0xff] %vm312_vm9, %v3643_v8  ;;  %1714 = vrot.lane.b32.xlu0 %v3643_v8, %s2841_s28 }
0x1652   :  { %v1715_v7 = vpop.permute.xlu0 %1714 }
0x1653   :  { %2562 = vmatmul.msk.f32.vlgmr.msra.gmra.mxu3 %vm51_vm0, %v1715_v7 }
0x1654   :  { %1992 = vmatpush.msra.mxu3 %v3458_v13 }
0x1656   :  { %1993 = vmatpush.msra.mxu3 %v3464_v19 }
0x1658   :  { %1994 = vmatpush.msra.mxu3 %v3469_v31 }
0x165a   :  { %v1671_v49 = vpop.f32.mrf.mxu2  ;;  %1995 = vmatpush.msra.mxu3 %v3475_v4 }
0x165b   :  { %v1672_v34 = vadd.f32 %v3515_v2, %v1671_v49 }
0x165d   :  { %1695 = vrot.lane.b32.xlu1 %v1672_v34, %s2840_s0  ;;  %v1674_v14 = vadd.f32 %v1672_v34, %v1307_v36 }
0x165f   :  { %v2561_v38 = vmul.f32 -1.442695, %v1674_v14 }
0x1661   :  { %2718 = vpow2.f32 %v2561_v38 }
0x1667   :  { %v2719_v40 = vpop.eup %2718 }
0x1668   :  { %v1678_v25 = vadd.f32 1.0, %v2719_v40 }
0x166a   :  { %2720 = vrcp.f32 %v1678_v25  ;;  %v1690_v28 = vand.u32 2147483648, %v1678_v25  ;;  %vm1684_vm14 = vweird.f32 %v1678_v25  ;;  %v1688_v50 = vand.u32 2147483647, %v1678_v25 }
0x166c   :  { %v1691_v33 = vor.u32 1.1754944e-38, %v1690_v28  ;;  %vm1689_vm1 = vcmp.eq.f32.partialorder %v1688_v50, 8.507059e+37  ;;  %v1309_v28 = vpop.f32.mrf.mxu0 }
0x166d   :  { %v1310_v50 = vadd.f32 %v3564_v58, %v1309_v28 }
0x1670   :  { %v2721_v42 = vpop.eup %2720 }
0x1671   :  { %v1680_v1 = vmul.f32 %v2721_v42, %v1678_v25  ;;  %vm1685_vm13 = vweird.f32 %v2721_v42 }
0x1672   :  { %vm1686_vm15 = vmor %vm1684_vm14, %vm1685_vm13 }
0x1673   :  { %v1681_v44 = vsub.f32 1.0, %v1680_v1 }
0x1675   :  { %v1682_v46 = vmul.f32 %v2721_v42, %v1681_v44 }
0x1677   :  { %v1683_v47 = vadd.f32 %v2721_v42, %v1682_v46 }
0x1679   :  { %v1687_v51 = vsel %vm1686_vm15, %v2721_v42, %v1683_v47 }
0x167a   :  { %v1692_v35 = vsel %vm1689_vm1, %v1691_v33, %v1687_v51 }
0x167b   :  { %v1705_v5 = vsub.f32 1.0, %v1692_v35  ;;  %v1711_v11 = vmul.f32 %v1692_v35, %v3630_v22 }
0x16cf   :  { %v1696_v52 = vpop.permute.xlu1 %1695 }
0x16d0   :  { %v1698_v54 = vmul.f32 %v1696_v52, %v1692_v35 }
0x16d2   :  { %1700 = vrot.lane.b32.xlu0 %v1698_v54, %s2840_s0 }
0x16d6   :  { %v1735_v56 = vpop.f32.mrf.mxu3 }
0x16d7   :  { %v1736_v57 = vadd.f32 %v3557_v55, %v1735_v56 }
0x16d9   :  { %1759 = vrot.lane.b32.xlu2 %v1736_v57, %s2840_s0  ;;  %v1738_v60 = vadd.f32 %v1736_v57, %v1371_v48 }
0x16db   :  { %v2563_v30 = vmul.f32 -1.442695, %v1738_v60 }
0x16dd   :  { %2722 = vpow2.f32 %v2563_v30 }
0x16e3   :  { %v2723_v45 = vpop.eup %2722 }
0x16e4   :  { %v1742_v62 = vadd.f32 1.0, %v2723_v45 }
0x16e6   :  { %2724 = vrcp.f32 %v1742_v62  ;;  %v1754_v15 = vand.u32 2147483648, %v1742_v62  ;;  %vm1748_vm3 = vweird.f32 %v1742_v62  ;;  %v1752_v18 = vand.u32 2147483647, %v1742_v62 }
0x16e8   :  { %v1755_v20 = vor.u32 1.1754944e-38, %v1754_v15  ;;  %vm1753_vm5 = vcmp.eq.f32.partialorder %v1752_v18, 8.507059e+37  ;;  %v1368_v18 = vadd.f32 %v3585_v23, %v3576_v26 }
0x16ec   :  { %v2725_v63 = vpop.eup %2724 }
0x16ed   :  { %v1744_v0 = vmul.f32 %v2725_v63, %v1742_v62  ;;  %vm1749_vm2 = vweird.f32 %v2725_v63 }
0x16ee   :  { %vm1750_vm4 = vmor %vm1748_vm3, %vm1749_vm2 }
0x16ef   :  { %v1745_v9 = vsub.f32 1.0, %v1744_v0 }
0x16f1   :  { %v1746_v10 = vmul.f32 %v2725_v63, %v1745_v9 }
0x16f3   :  { %v1747_v43 = vadd.f32 %v2725_v63, %v1746_v10 }
0x16f5   :  { %v1751_v61 = vsel %vm1750_vm4, %v2725_v63, %v1747_v43 }
0x16f6   :  { %v1756_v3 = vsel %vm1753_vm5, %v1755_v20, %v1751_v61 }
0x16f7   :  { %v1769_v22 = vsub.f32 1.0, %v1756_v3  ;;  %v1775_v42 = vmul.f32 %v1756_v3, %v3643_v8 }
0x1733   :  { %v1760_v37 = vpop.permute.xlu2 %1759 }
0x1734   :  { %v1762_v27 = vmul.f32 %v1760_v37, %v1756_v3 }
0x1736   :  { %1764 = vrot.lane.b32.xlu1 %v1762_v27, %s2840_s0 }
0x1744   :  { %v1701_v29 = vpop.permute.xlu0 %1700 }
0x1745   :  { %v1703_v59 = vadd.f32 %v1701_v29, %v1307_v36 }
0x1747   :  { %2726 = vtanh.f32 %v1703_v59 }
0x174d   :  { %v2727_v41 = vpop.eup %2726 }
0x174e   :  { %1707 = vrot.lane.b32.xlu2 %v2727_v41, %s2841_s28 }
0x17a8   :  { %v1765_v7 = vpop.permute.xlu1 %1764  ;;  %v1708_v49 = vpop.permute.xlu2 %1707 }
0x17a9   :  { %v1767_v34 = vadd.f32 %v1765_v7, %v1371_v48  ;;  %v1710_v14 = vmul.f32 %v1708_v49, %v1705_v5 }
0x17ab   :  { %2728 = vtanh.f32 %v1767_v34  ;;  %v3669_v38 = vadd.f32 %v1711_v11, %v1710_v14 }
0x17ad   :  { %1778 = vrot.lane.b32.xlu1 %v3669_v38, %s2841_s28 }
0x17b1   :  { %v2729_v40 = vpop.eup %2728 }
0x17b2   :  { %1771 = vrot.lane.b32.xlu0 %v2729_v40, %s2841_s28 }
0x181f   :  { %v1779_v36 = vpop.permute.xlu1 %1778 }
0x1820   :  { %1781 = vst.msk [vmem:[%s3918_s9 + $0x10] sm:$0xff] %vm51_vm0, %v1779_v36  ;;  %2564 = vmatmul.msk.f32.vlgmr.msrb.gmra.mxu2 %vm51_vm0, %v1779_v36 }
0x1821   :  { %2059 = vmatpush.msrb.mxu2 %v3373_v6 }
0x1823   :  { %2060 = vmatpush.msrb.mxu2 %v3378_v53 }
0x1824   :  { %v1772_v25 = vpop.permute.xlu0 %1771 }
0x1825   :  { %v1774_v1 = vmul.f32 %v1772_v25, %v1769_v22  ;;  %2061 = vmatpush.msrb.mxu2 %v3390_v12 }
0x1827   :  { %v3683_v44 = vadd.f32 %v1775_v42, %v1774_v1  ;;  %2062 = vmatpush.msrb.mxu2 %v3402_v16 }
0x1829   :  { %1782 = vst.msk [vmem:[%s3918_s9 + $0x28] sm:$0xff] %vm312_vm9, %v3683_v44  ;;  %1845 = vrot.lane.b32.xlu2 %v3683_v44, %s2841_s28 }
0x1883   :  { %v1846_v46 = vpop.permute.xlu2 %1845 }
0x1884   :  { %2566 = vmatmul.msk.f32.vlgmr.msrb.gmra.mxu3 %vm51_vm0, %v1846_v46 }
0x1885   :  { %2123 = vmatpush.msrb.mxu3 %v3458_v13 }
0x1887   :  { %2124 = vmatpush.msrb.mxu3 %v3464_v19 }
0x1889   :  { %2125 = vmatpush.msrb.mxu3 %v3469_v31 }
0x188b   :  { %2126 = vmatpush.msrb.mxu3 %v3475_v4 }
0x18a3   :  { %v1802_v8 = vpop.f32.mrf.mxu2 }
0x18a4   :  { %v1803_v47 = vadd.f32 %v3515_v2, %v1802_v8 }
0x18a6   :  { %1826 = vrot.lane.b32.xlu0 %v1803_v47, %s2840_s0  ;;  %v1805_v51 = vadd.f32 %v1803_v47, %v1310_v50 }
0x18a8   :  { %v2565_v33 = vmul.f32 -1.442695, %v1805_v51 }
0x18aa   :  { %2730 = vpow2.f32 %v2565_v33 }
0x18b0   :  { %v2731_v35 = vpop.eup %2730 }
0x18b1   :  { %v1809_v52 = vadd.f32 1.0, %v2731_v35 }
0x18b3   :  { %2732 = vrcp.f32 %v1809_v52  ;;  %v1821_v62 = vand.u32 2147483648, %v1809_v52  ;;  %vm1815_vm7 = vweird.f32 %v1809_v52  ;;  %v1819_v63 = vand.u32 2147483647, %v1809_v52 }
0x18b5   :  { %v1822_v9 = vor.u32 1.1754944e-38, %v1821_v62  ;;  %vm1820_vm10 = vcmp.eq.f32.partialorder %v1819_v63, 8.507059e+37 }
0x18b9   :  { %v2733_v54 = vpop.eup %2732 }
0x18ba   :  { %v1811_v56 = vmul.f32 %v2733_v54, %v1809_v52  ;;  %vm1816_vm6 = vweird.f32 %v2733_v54 }
0x18bb   :  { %vm1817_vm8 = vmor %vm1815_vm7, %vm1816_vm6 }
0x18bc   :  { %v1812_v60 = vsub.f32 1.0, %v1811_v56 }
0x18be   :  { %v1813_v30 = vmul.f32 %v2733_v54, %v1812_v60 }
0x18c0   :  { %v1814_v45 = vadd.f32 %v2733_v54, %v1813_v30 }
0x18c2   :  { %v1818_v0 = vsel %vm1817_vm8, %v2733_v54, %v1814_v45 }
0x18c3   :  { %v1823_v43 = vsel %vm1820_vm10, %v1822_v9, %v1818_v0 }
0x18c4   :  { %v1836_v42 = vsub.f32 1.0, %v1823_v43  ;;  %v1842_v47 = vmul.f32 %v1823_v43, %v3669_v38 }
0x1907   :  { %v1866_v57 = vpop.f32.mrf.mxu3 }
0x1908   :  { %v1867_v48 = vadd.f32 %v3557_v55, %v1866_v57 }
0x190a   :  { %1890 = vrot.lane.b32.xlu1 %v1867_v48, %s2840_s0  ;;  %v1869_v61 = vadd.f32 %v1867_v48, %v1368_v18 }
0x190c   :  { %v2567_v20 = vmul.f32 -1.442695, %v1869_v61 }
0x190e   :  { %2734 = vpow2.f32 %v2567_v20  ;;  %v1365_v20 = vadd.f32 %v3585_v23, %v3574_v32 }
0x1914   :  { %v2735_v37 = vpop.eup %2734 }
0x1915   :  { %v1873_v3 = vadd.f32 1.0, %v2735_v37 }
0x1917   :  { %2736 = vrcp.f32 %v1873_v3  ;;  %v1885_v34 = vand.u32 2147483648, %v1873_v3  ;;  %vm1879_vm12 = vweird.f32 %v1873_v3  ;;  %v1883_v11 = vand.u32 2147483647, %v1873_v3 }
0x1918   :  { %v1827_v10 = vpop.permute.xlu0 %1826 }
0x1919   :  { %v1829_v15 = vmul.f32 %v1827_v10, %v1823_v43  ;;  %v1886_v14 = vor.u32 1.1754944e-38, %v1885_v34  ;;  %vm1884_vm14 = vcmp.eq.f32.partialorder %v1883_v11, 8.507059e+37 }
0x191b   :  { %1831 = vrot.lane.b32.xlu2 %v1829_v15, %s2840_s0 }
0x191d   :  { %v2737_v27 = vpop.eup %2736 }
0x191e   :  { %v1875_v29 = vmul.f32 %v2737_v27, %v1873_v3  ;;  %vm1880_vm11 = vweird.f32 %v2737_v27 }
0x191f   :  { %vm1881_vm13 = vmor %vm1879_vm12, %vm1880_vm11 }
0x1920   :  { %v1876_v59 = vsub.f32 1.0, %v1875_v29 }
0x1922   :  { %v1877_v41 = vmul.f32 %v2737_v27, %v1876_v59 }
0x1924   :  { %v1878_v7 = vadd.f32 %v2737_v27, %v1877_v41 }
0x1926   :  { %v1882_v26 = vsel %vm1881_vm13, %v2737_v27, %v1878_v7 }
0x1927   :  { %v1887_v40 = vsel %vm1884_vm14, %v1886_v14, %v1882_v26 }
0x1928   :  { %v1900_v33 = vsub.f32 1.0, %v1887_v40  ;;  %v1906_v52 = vmul.f32 %v1887_v40, %v3683_v44 }
0x1975   :  { %v1832_v5 = vpop.permute.xlu2 %1831 }
0x1976   :  { %v1834_v49 = vadd.f32 %v1832_v5, %v1310_v50 }
0x1978   :  { %2738 = vtanh.f32 %v1834_v49 }
0x197c   :  { %v1891_v36 = vpop.permute.xlu1 %1890 }
0x197d   :  { %v1893_v22 = vmul.f32 %v1891_v36, %v1887_v40 }
0x197e   :  { %v2739_v25 = vpop.eup %2738 }
0x197f   :  { %1895 = vrot.lane.b32.xlu0 %v1893_v22, %s2840_s0  ;;  %1838 = vrot.lane.b32.xlu1 %v2739_v25, %s2841_s28 }
0x19f1   :  { %v1896_v1 = vpop.permute.xlu0 %1895  ;;  %v1839_v46 = vpop.permute.xlu1 %1838 }
0x19f2   :  { %v1898_v8 = vadd.f32 %v1896_v1, %v1368_v18  ;;  %v1841_v28 = vmul.f32 %v1839_v46, %v1836_v42 }
0x19f4   :  { %2740 = vtanh.f32 %v1898_v8  ;;  %v3709_v50 = vadd.f32 %v1842_v47, %v1841_v28 }
0x19f6   :  { %1909 = vrot.lane.b32.xlu0 %v3709_v50, %s2841_s28 }
0x19fa   :  { %v2741_v51 = vpop.eup %2740 }
0x19fb   :  { %1902 = vrot.lane.b32.xlu2 %v2741_v51, %s2841_s28 }
0x1a55   :  { %v1903_v35 = vpop.permute.xlu2 %1902 }
0x1a56   :  { %v1905_v54 = vmul.f32 %v1903_v35, %v1900_v33 }
0x1a58   :  { %v3715_v56 = vadd.f32 %v1906_v52, %v1905_v54  ;;  %v2801_v54 = vld [vmem:[%s3915_s6 + $0x18] sm:$0xff] }
0x1a5a   :  { %1913 = vst.msk [vmem:[%s3918_s9 + $0x20] sm:$0xff] %vm312_vm9, %v3715_v56  ;;  %1976 = vrot.lane.b32.xlu1 %v3715_v56, %s2841_s28 }
0x1a68   :  { %v1910_v38 = vpop.permute.xlu0 %1909 }
0x1a69   :  { %1912 = vst.msk [vmem:[%s3918_s9 + $0x18] sm:$0xff] %vm51_vm0, %v1910_v38  ;;  %2568 = vmatmul.msk.f32.vlgmr.msra.gmra.mxu2 %vm51_vm0, %v1910_v38  ;;  %v2802_v38 = vld [vmem:[%s3915_s6 + $0x10] sm:$0xff] }
0x1a6a   :  { %2190 = vmatpush.msra.mxu2 %v3373_v6 }
0x1a6c   :  { %2191 = vmatpush.msra.mxu2 %v3378_v53  ;;  %v1312_v53 = vpop.f32.mrf.mxu0 }
0x1a6e   :  { %2192 = vmatpush.msra.mxu2 %v3390_v12  ;;  %v1313_v12 = vadd.f32 %v3564_v58, %v1312_v53  ;;  %v2803_v53 = vld [vmem:[%s3915_s6 + $0x8] sm:$0xff] }
0x1a70   :  { %2193 = vmatpush.msra.mxu2 %v3402_v16 }
0x1acc   :  { %v1977_v44 = vpop.permute.xlu1 %1976 }
0x1acd   :  { %2570 = vmatmul.msk.f32.vlgmr.msra.gmra.mxu3 %vm51_vm0, %v1977_v44 }
0x1ace   :  { %2254 = vmatpush.msra.mxu3 %v3458_v13 }
0x1ad0   :  { %2255 = vmatpush.msra.mxu3 %v3464_v19 }
0x1ad2   :  { %2256 = vmatpush.msra.mxu3 %v3469_v31 }
0x1ad4   :  { %2257 = vmatpush.msra.mxu3 %v3475_v4 }
0x1aec   :  { %v1933_v57 = vpop.f32.mrf.mxu2 }
0x1aed   :  { %v1934_v6 = vadd.f32 %v3515_v2, %v1933_v57 }
0x1aef   :  { %1957 = vrot.lane.b32.xlu2 %v1934_v6, %s2840_s0  ;;  %v1936_v16 = vadd.f32 %v1934_v6, %v1313_v12 }
0x1af1   :  { %v2569_v48 = vmul.f32 -1.442695, %v1936_v16  ;;  %v2804_v16 = vld [vmem:[%s3915_s6] sm:$0xff] }
0x1af3   :  { %2742 = vpow2.f32 %v2569_v48  ;;  %v2805_v48 = vld [vmem:[%s3915_s6 + $0x38] sm:$0xff] }
0x1af9   :  { %v2743_v60 = vpop.eup %2742 }
0x1afa   :  { %v1940_v30 = vadd.f32 1.0, %v2743_v60  ;;  %v2806_v60 = vld [vmem:[%s3915_s6 + $0x30] sm:$0xff] }
0x1afc   :  { %2744 = vrcp.f32 %v1940_v30  ;;  %v1952_v4 = vand.u32 2147483648, %v1940_v30  ;;  %vm1946_vm1 = vweird.f32 %v1940_v30  ;;  %v1950_v63 = vand.u32 2147483647, %v1940_v30 }
0x1afe   :  { %v1953_v9 = vor.u32 1.1754944e-38, %v1952_v4  ;;  %vm1951_vm3 = vcmp.eq.f32.partialorder %v1950_v63, 8.507059e+37 }
0x1b02   :  { %v2745_v13 = vpop.eup %2744 }
0x1b03   :  { %v1942_v19 = vmul.f32 %v2745_v13, %v1940_v30  ;;  %vm1947_vm15 = vweird.f32 %v2745_v13  ;;  %v2807_v30 = vld [vmem:[%s3915_s6 + $0x28] sm:$0xff] }
0x1b04   :  { %vm1948_vm2 = vmor %vm1946_vm1, %vm1947_vm15 }
0x1b05   :  { %v1943_v45 = vsub.f32 1.0, %v1942_v19  ;;  %v2808_v19 = vld [vmem:[%s3915_s6 + $0x20] sm:$0xff] }
0x1b07   :  { %v1944_v31 = vmul.f32 %v2745_v13, %v1943_v45 }
0x1b09   :  { %v1945_v62 = vadd.f32 %v2745_v13, %v1944_v31  ;;  %v1315_v31 = vpop.f32.mrf.mxu0 }
0x1b0b   :  { %v1949_v0 = vsel %vm1948_vm2, %v2745_v13, %v1945_v62  ;;  %v1316_v62 = vadd.f32 %v3564_v58, %v1315_v31 }
0x1b0c   :  { %v1954_v43 = vsel %vm1951_vm3, %v1953_v9, %v1949_v0 }
0x1b0d   :  { %v1967_v47 = vsub.f32 1.0, %v1954_v43  ;;  %v1973_v51 = vmul.f32 %v1954_v43, %v3709_v50 }
0x1b49   :  { %v1958_v10 = vpop.permute.xlu2 %1957 }
0x1b4a   :  { %v1960_v15 = vmul.f32 %v1958_v10, %v1954_v43 }
0x1b4c   :  { %1962 = vrot.lane.b32.xlu1 %v1960_v15, %s2840_s0 }
0x1b50   :  { %v1997_v18 = vpop.f32.mrf.mxu3 }
0x1b51   :  { %v1998_v61 = vadd.f32 %v3557_v55, %v1997_v18 }
0x1b53   :  { %2021 = vrot.lane.b32.xlu0 %v1998_v61, %s2840_s0  ;;  %v2000_v37 = vadd.f32 %v1998_v61, %v1365_v20 }
0x1b55   :  { %v2571_v3 = vmul.f32 -1.442695, %v2000_v37 }
0x1b57   :  { %2746 = vpow2.f32 %v2571_v3 }
0x1b5d   :  { %v2747_v27 = vpop.eup %2746 }
0x1b5e   :  { %v2004_v29 = vadd.f32 1.0, %v2747_v27 }
0x1b60   :  { %2748 = vrcp.f32 %v2004_v29  ;;  %v2016_v26 = vand.u32 2147483648, %v2004_v29  ;;  %vm2010_vm5 = vweird.f32 %v2004_v29  ;;  %v2014_v14 = vand.u32 2147483647, %v2004_v29 }
0x1b62   :  { %v2017_v40 = vor.u32 1.1754944e-38, %v2016_v26  ;;  %vm2015_vm7 = vcmp.eq.f32.partialorder %v2014_v14, 8.507059e+37 }
0x1b66   :  { %v2749_v59 = vpop.eup %2748 }
0x1b67   :  { %v2006_v41 = vmul.f32 %v2749_v59, %v2004_v29  ;;  %vm2011_vm4 = vweird.f32 %v2749_v59 }
0x1b68   :  { %vm2012_vm6 = vmor %vm2010_vm5, %vm2011_vm4 }
0x1b69   :  { %v2007_v5 = vsub.f32 1.0, %v2006_v41 }
0x1b6b   :  { %v2008_v7 = vmul.f32 %v2749_v59, %v2007_v5  ;;  %v1362_v5 = vadd.f32 %v3585_v23, %v3572_v24 }
0x1b6d   :  { %v2009_v34 = vadd.f32 %v2749_v59, %v2008_v7 }
0x1b6f   :  { %v2013_v32 = vsel %vm2012_vm6, %v2749_v59, %v2009_v34 }
0x1b70   :  { %v2018_v22 = vsel %vm2015_vm7, %v2017_v40, %v2013_v32 }
0x1b71   :  { %v2031_v50 = vsub.f32 1.0, %v2018_v22  ;;  %v2037_v57 = vmul.f32 %v2018_v22, %v3715_v56 }
0x1bbe   :  { %v1963_v49 = vpop.permute.xlu1 %1962 }
0x1bbf   :  { %v1965_v11 = vadd.f32 %v1963_v49, %v1313_v12 }
0x1bc1   :  { %2750 = vtanh.f32 %v1965_v11 }
0x1bc5   :  { %v2022_v36 = vpop.permute.xlu0 %2021 }
0x1bc6   :  { %v2024_v25 = vmul.f32 %v2022_v36, %v2018_v22 }
0x1bc7   :  { %v2751_v42 = vpop.eup %2750 }
0x1bc8   :  { %2026 = vrot.lane.b32.xlu2 %v2024_v25, %s2840_s0  ;;  %1969 = vrot.lane.b32.xlu0 %v2751_v42, %s2841_s28 }
0x1c22   :  { %v2027_v1 = vpop.permute.xlu2 %2026 }
0x1c23   :  { %v2029_v46 = vadd.f32 %v2027_v1, %v1365_v20 }
0x1c25   :  { %2752 = vtanh.f32 %v2029_v46 }
0x1c2b   :  { %v2753_v8 = vpop.eup %2752 }
0x1c2c   :  { %2033 = vrot.lane.b32.xlu1 %v2753_v8, %s2841_s28 }
0x1c3a   :  { %v1970_v28 = vpop.permute.xlu0 %1969 }
0x1c3b   :  { %v1972_v33 = vmul.f32 %v1970_v28, %v1967_v47 }
0x1c3d   :  { %v3750_v35 = vadd.f32 %v1973_v51, %v1972_v33 }
0x1c3f   :  { %2040 = vrot.lane.b32.xlu2 %v3750_v35, %s2841_s28 }
0x1c99   :  { %v2041_v52 = vpop.permute.xlu2 %2040 }
0x1c9a   :  { %2043 = vst.msk [vmem:[%s3918_s9 + $0x20] sm:$0xff] %vm51_vm0, %v2041_v52  ;;  %2572 = vmatmul.msk.f32.vlgmr.msrb.gmra.mxu2 %vm51_vm0, %v2041_v52 }
0x1c9b   :  { %2321 = vmatpush.msrb.mxu2 %v2801_v54 }
0x1c9d   :  { %2322 = vmatpush.msrb.mxu2 %v2802_v38 }
0x1c9e   :  { %v2034_v44 = vpop.permute.xlu1 %2033 }
0x1c9f   :  { %v2036_v6 = vmul.f32 %v2034_v44, %v2031_v50  ;;  %2323 = vmatpush.msrb.mxu2 %v2803_v53 }
0x1ca1   :  { %v3769_v12 = vadd.f32 %v2037_v57, %v2036_v6  ;;  %2324 = vmatpush.msrb.mxu2 %v2804_v16 }
0x1ca3   :  { %2044 = vst.msk [vmem:[%s3918_s9 + $0x18] sm:$0xff] %vm312_vm9, %v3769_v12  ;;  %2107 = vrot.lane.b32.xlu0 %v3769_v12, %s2841_s28 }
0x1d15   :  { %v2108_v56 = vpop.permute.xlu0 %2107 }
0x1d16   :  { %2574 = vmatmul.msk.f32.vlgmr.msrb.gmra.mxu3 %vm51_vm0, %v2108_v56 }
0x1d17   :  { %2385 = vmatpush.msrb.mxu3 %v2805_v48 }
0x1d19   :  { %2386 = vmatpush.msrb.mxu3 %v2806_v60 }
0x1d1b   :  { %2387 = vmatpush.msrb.mxu3 %v2807_v30 }
0x1d1d   :  { %v2064_v13 = vpop.f32.mrf.mxu2  ;;  %2388 = vmatpush.msrb.mxu3 %v2808_v19  ;;  %v3836_v19 = vld [vmem:[%s3916_s7] ss:$0 sm:$0xff] }
0x1d1e   :  { %v2065_v45 = vadd.f32 %v3515_v2, %v2064_v13  ;;  %v1318_v13 = vpop.f32.mrf.mxu0 }
0x1d20   :  { %2088 = vrot.lane.b32.xlu1 %v2065_v45, %s2840_s0  ;;  %v2067_v4 = vadd.f32 %v2065_v45, %v1316_v62  ;;  %v1319_v45 = vadd.f32 %v3836_v19, %v1318_v13 }
0x1d22   :  { %v2573_v63 = vmul.f32 -1.442695, %v2067_v4 }
0x1d24   :  { %2754 = vpow2.f32 %v2573_v63 }
0x1d2a   :  { %v2755_v0 = vpop.eup %2754 }
0x1d2b   :  { %v2071_v9 = vadd.f32 1.0, %v2755_v0 }
0x1d2d   :  { %2756 = vrcp.f32 %v2071_v9  ;;  %v2083_v20 = vand.u32 2147483648, %v2071_v9  ;;  %vm2077_vm10 = vweird.f32 %v2071_v9  ;;  %v2081_v2 = vand.u32 2147483647, %v2071_v9 }
0x1d2f   :  { %v2084_v3 = vor.u32 1.1754944e-38, %v2083_v20  ;;  %vm2082_vm12 = vcmp.eq.f32.partialorder %v2081_v2, 8.507059e+37 }
0x1d33   :  { %v2757_v10 = vpop.eup %2756 }
0x1d34   :  { %v2073_v43 = vmul.f32 %v2757_v10, %v2071_v9  ;;  %vm2078_vm8 = vweird.f32 %v2757_v10 }
0x1d35   :  { %vm2079_vm11 = vmor %vm2077_vm10, %vm2078_vm8 }
0x1d36   :  { %v2074_v15 = vsub.f32 1.0, %v2073_v43  ;;  %v3842_v43 = vld [vmem:[%s3917_s8 + $0x1] ss:$0 sm:$0xff] }
0x1d38   :  { %v2075_v18 = vmul.f32 %v2757_v10, %v2074_v15 }
0x1d3a   :  { %v2076_v61 = vadd.f32 %v2757_v10, %v2075_v18 }
0x1d3c   :  { %v2080_v37 = vsel %vm2079_vm11, %v2757_v10, %v2076_v61 }
0x1d3d   :  { %v2085_v58 = vsel %vm2082_vm12, %v2084_v3, %v2080_v37 }
0x1d3e   :  { %v2098_v28 = vsub.f32 1.0, %v2085_v58  ;;  %v2104_v54 = vmul.f32 %v2085_v58, %v3750_v35 }
0x1d92   :  { %v2089_v27 = vpop.permute.xlu1 %2088 }
0x1d93   :  { %v2091_v29 = vmul.f32 %v2089_v27, %v2085_v58 }
0x1d95   :  { %2093 = vrot.lane.b32.xlu0 %v2091_v29, %s2840_s0 }
0x1d99   :  { %v2128_v59 = vpop.f32.mrf.mxu3 }
0x1d9a   :  { %v2129_v41 = vadd.f32 %v3557_v55, %v2128_v59 }
0x1d9c   :  { %2152 = vrot.lane.b32.xlu2 %v2129_v41, %s2840_s0  ;;  %v2131_v7 = vadd.f32 %v2129_v41, %v1362_v5  ;;  %v3850_v41 = vld [vmem:[%s3916_s7 + $0x1] ss:$0 sm:$0xff] }
0x1d9e   :  { %v2575_v49 = vmul.f32 -1.442695, %v2131_v7 }
0x1da0   :  { %2758 = vpow2.f32 %v2575_v49 }
0x1da6   :  { %v2759_v34 = vpop.eup %2758 }
0x1da7   :  { %v2135_v11 = vadd.f32 1.0, %v2759_v34 }
0x1da9   :  { %2760 = vrcp.f32 %v2135_v11  ;;  %v2147_v22 = vand.u32 2147483648, %v2135_v11  ;;  %vm2141_vm14 = vweird.f32 %v2135_v11  ;;  %v2145_v55 = vand.u32 2147483647, %v2135_v11 }
0x1dab   :  { %v2148_v42 = vor.u32 1.1754944e-38, %v2147_v22  ;;  %vm2146_vm1 = vcmp.eq.f32.partialorder %v2145_v55, 8.507059e+37 }
0x1daf   :  { %v2761_v26 = vpop.eup %2760 }
0x1db0   :  { %v2137_v14 = vmul.f32 %v2761_v26, %v2135_v11  ;;  %vm2142_vm13 = vweird.f32 %v2761_v26 }
0x1db1   :  { %vm2143_vm15 = vmor %vm2141_vm14, %vm2142_vm13 }
0x1db2   :  { %v2138_v32 = vsub.f32 1.0, %v2137_v14 }
0x1db4   :  { %v2139_v40 = vmul.f32 %v2761_v26, %v2138_v32 }
0x1db6   :  { %v2140_v36 = vadd.f32 %v2761_v26, %v2139_v40 }
0x1db8   :  { %v2144_v25 = vsel %vm2143_vm15, %v2761_v26, %v2140_v36 }
0x1db9   :  { %v2149_v23 = vsel %vm2146_vm1, %v2148_v42, %v2144_v25 }
0x1dba   :  { %v2162_v6 = vsub.f32 1.0, %v2149_v23  ;;  %v2168_v53 = vmul.f32 %v2149_v23, %v3769_v12  ;;  %v3829_v12 = vld [vmem:[%s3917_s8] ss:$0 sm:$0xff] }
0x1df6   :  { %v2153_v24 = vpop.permute.xlu2 %2152 }
0x1df7   :  { %v2155_v1 = vmul.f32 %v2153_v24, %v2149_v23 }
0x1df9   :  { %2157 = vrot.lane.b32.xlu1 %v2155_v1, %s2840_s0 }
0x1e07   :  { %v2094_v46 = vpop.permute.xlu0 %2093 }
0x1e08   :  { %v2096_v8 = vadd.f32 %v2094_v46, %v1316_v62 }
0x1e0a   :  { %2762 = vtanh.f32 %v2096_v8 }
0x1e10   :  { %v2763_v47 = vpop.eup %2762 }
0x1e11   :  { %2100 = vrot.lane.b32.xlu2 %v2763_v47, %s2841_s28 }
0x1e6b   :  { %v2158_v51 = vpop.permute.xlu1 %2157  ;;  %v2101_v33 = vpop.permute.xlu2 %2100 }
0x1e6c   :  { %v2160_v52 = vadd.f32 %v2158_v51, %v1362_v5  ;;  %v2103_v50 = vmul.f32 %v2101_v33, %v2098_v28  ;;  %v1359_v5 = vadd.f32 %v3850_v41, %v3570_v39 }
0x1e6e   :  { %2764 = vtanh.f32 %v2160_v52  ;;  %v3805_v38 = vadd.f32 %v2104_v54, %v2103_v50 }
0x1e70   :  { %2171 = vrot.lane.b32.xlu1 %v3805_v38, %s2841_s28 }
0x1e74   :  { %v2765_v44 = vpop.eup %2764 }
0x1e75   :  { %2164 = vrot.lane.b32.xlu0 %v2765_v44, %s2841_s28 }
0x1ee2   :  { %v2172_v57 = vpop.permute.xlu1 %2171 }
0x1ee3   :  { %2174 = vst.msk [vmem:[%s3918_s9 + $0x28] sm:$0xff] %vm51_vm0, %v2172_v57  ;;  %2576 = vmatmul.msk.f32.vlgmr.msra.gmra.mxu2 %vm51_vm0, %v2172_v57 }
0x1ee7   :  { %v2165_v35 = vpop.permute.xlu0 %2164 }
0x1ee8   :  { %v2167_v16 = vmul.f32 %v2165_v35, %v2162_v6 }
0x1eea   :  { %v3816_v56 = vadd.f32 %v2168_v53, %v2167_v16 }
0x1eec   :  { %2175 = vst.msk [vmem:[%s3918_s9 + $0x10] sm:$0xff] %vm312_vm9, %v3816_v56  ;;  %2238 = vrot.lane.b32.xlu2 %v3816_v56, %s2841_s28 }
0x1f46   :  { %v2239_v48 = vpop.permute.xlu2 %2238 }
0x1f47   :  { %2578 = vmatmul.msk.f32.vlgmr.msra.gmra.mxu3 %vm51_vm0, %v2239_v48 }
0x1f66   :  { %v2195_v60 = vpop.f32.mrf.mxu2 }
0x1f67   :  { %v2196_v30 = vadd.f32 %v3829_v12, %v2195_v60 }
0x1f69   :  { %2219 = vrot.lane.b32.xlu0 %v2196_v30, %s2840_s0  ;;  %v2198_v31 = vadd.f32 %v2196_v30, %v1319_v45  ;;  %v1321_v30 = vpop.f32.mrf.mxu0 }
0x1f6a   :  { %v1322_v13 = vadd.f32 %v3836_v19, %v1321_v30 }
0x1f6b   :  { %v2577_v62 = vmul.f32 -1.442695, %v2198_v31 }
0x1f6d   :  { %2766 = vpow2.f32 %v2577_v62 }
0x1f73   :  { %v2767_v4 = vpop.eup %2766 }
0x1f74   :  { %v2202_v63 = vadd.f32 1.0, %v2767_v4 }
0x1f76   :  { %2768 = vrcp.f32 %v2202_v63  ;;  %v2214_v2 = vand.u32 2147483648, %v2202_v63  ;;  %vm2208_vm3 = vweird.f32 %v2202_v63  ;;  %v2212_v37 = vand.u32 2147483647, %v2202_v63 }
0x1f78   :  { %v2215_v58 = vor.u32 1.1754944e-38, %v2214_v2  ;;  %vm2213_vm5 = vcmp.eq.f32.partialorder %v2212_v37, 8.507059e+37 }
0x1f7c   :  { %v2769_v0 = vpop.eup %2768 }
0x1f7d   :  { %v2204_v9 = vmul.f32 %v2769_v0, %v2202_v63  ;;  %vm2209_vm2 = vweird.f32 %v2769_v0 }
0x1f7e   :  { %vm2210_vm4 = vmor %vm2208_vm3, %vm2209_vm2 }
0x1f7f   :  { %v2205_v18 = vsub.f32 1.0, %v2204_v9 }
0x1f81   :  { %v2206_v61 = vmul.f32 %v2769_v0, %v2205_v18 }
0x1f83   :  { %v2207_v20 = vadd.f32 %v2769_v0, %v2206_v61 }
0x1f85   :  { %v2211_v3 = vsel %vm2210_vm4, %v2769_v0, %v2207_v20 }
0x1f86   :  { %v2216_v29 = vsel %vm2213_vm5, %v2215_v58, %v2211_v3 }
0x1f87   :  { %v2229_v47 = vsub.f32 1.0, %v2216_v29  ;;  %v2235_v52 = vmul.f32 %v2216_v29, %v3805_v38 }
0x1fca   :  { %v2259_v10 = vpop.f32.mrf.mxu3 }
0x1fcb   :  { %v2260_v15 = vadd.f32 %v3842_v43, %v2259_v10 }
0x1fcd   :  { %2283 = vrot.lane.b32.xlu1 %v2260_v15, %s2840_s0  ;;  %v2262_v7 = vadd.f32 %v2260_v15, %v1359_v5 }
0x1fcf   :  { %v2579_v49 = vmul.f32 -1.442695, %v2262_v7 }
0x1fd1   :  { %2770 = vpow2.f32 %v2579_v49 }
0x1fd7   :  { %v2771_v34 = vpop.eup %2770 }
0x1fd8   :  { %v2266_v11 = vadd.f32 1.0, %v2771_v34 }
0x1fda   :  { %2772 = vrcp.f32 %v2266_v11  ;;  %v2278_v25 = vand.u32 2147483648, %v2266_v11  ;;  %vm2272_vm7 = vweird.f32 %v2266_v11  ;;  %v2276_v42 = vand.u32 2147483647, %v2266_v11 }
0x1fdb   :  { %v2220_v27 = vpop.permute.xlu0 %2219 }
0x1fdc   :  { %v2222_v59 = vmul.f32 %v2220_v27, %v2216_v29  ;;  %v2279_v24 = vor.u32 1.1754944e-38, %v2278_v25  ;;  %vm2277_vm10 = vcmp.eq.f32.partialorder %v2276_v42, 8.507059e+37  ;;  %v1356_v27 = vadd.f32 %v3850_v41, %v3567_v21 }
0x1fde   :  { %2224 = vrot.lane.b32.xlu2 %v2222_v59, %s2840_s0 }
0x1fe0   :  { %v2773_v26 = vpop.eup %2772 }
0x1fe1   :  { %v2268_v14 = vmul.f32 %v2773_v26, %v2266_v11  ;;  %vm2273_vm6 = vweird.f32 %v2773_v26 }
0x1fe2   :  { %vm2274_vm8 = vmor %vm2272_vm7, %vm2273_vm6 }
0x1fe3   :  { %v2269_v32 = vsub.f32 1.0, %v2268_v14 }
0x1fe5   :  { %v2270_v40 = vmul.f32 %v2773_v26, %v2269_v32 }
0x1fe7   :  { %v2271_v22 = vadd.f32 %v2773_v26, %v2270_v40 }
0x1fe9   :  { %v2275_v39 = vsel %vm2274_vm8, %v2773_v26, %v2271_v22 }
0x1fea   :  { %v2280_v23 = vsel %vm2277_vm10, %v2279_v24, %v2275_v39 }
0x1feb   :  { %v2293_v57 = vsub.f32 1.0, %v2280_v23  ;;  %v2299_v35 = vmul.f32 %v2280_v23, %v3816_v56 }
0x2038   :  { %v2225_v36 = vpop.permute.xlu2 %2224 }
0x2039   :  { %v2227_v55 = vadd.f32 %v2225_v36, %v1319_v45 }
0x203b   :  { %2774 = vtanh.f32 %v2227_v55 }
0x203f   :  { %v2284_v1 = vpop.permute.xlu1 %2283 }
0x2040   :  { %v2286_v46 = vmul.f32 %v2284_v1, %v2280_v23 }
0x2041   :  { %v2775_v8 = vpop.eup %2774 }
0x2042   :  { %2288 = vrot.lane.b32.xlu0 %v2286_v46, %s2840_s0  ;;  %2231 = vrot.lane.b32.xlu1 %v2775_v8, %s2841_s28 }
0x20b4   :  { %v2289_v28 = vpop.permute.xlu0 %2288  ;;  %v2232_v51 = vpop.permute.xlu1 %2231 }
0x20b5   :  { %v2291_v33 = vadd.f32 %v2289_v28, %v1359_v5  ;;  %v2234_v54 = vmul.f32 %v2232_v51, %v2229_v47 }
0x20b7   :  { %2776 = vtanh.f32 %v2291_v33  ;;  %v3857_v50 = vadd.f32 %v2235_v52, %v2234_v54 }
0x20b9   :  { %2302 = vrot.lane.b32.xlu0 %v3857_v50, %s2841_s28 }
0x20bd   :  { %v2777_v44 = vpop.eup %2776 }
0x20be   :  { %2295 = vrot.lane.b32.xlu2 %v2777_v44, %s2841_s28 }
0x2118   :  { %v2296_v6 = vpop.permute.xlu2 %2295 }
0x2119   :  { %v2298_v53 = vmul.f32 %v2296_v6, %v2293_v57 }
0x211b   :  { %v3863_v16 = vadd.f32 %v2299_v35, %v2298_v53 }
0x211d   :  { %2306 = vst.msk [vmem:[%s3918_s9 + $0x8] sm:$0xff] %vm312_vm9, %v3863_v16  ;;  %2369 = vrot.lane.b32.xlu1 %v3863_v16, %s2841_s28 }
0x212b   :  { %v2303_v38 = vpop.permute.xlu0 %2302 }
0x212c   :  { %2305 = vst.msk [vmem:[%s3918_s9 + $0x30] sm:$0xff] %vm51_vm0, %v2303_v38  ;;  %2580 = vmatmul.msk.f32.vlgmr.msrb.gmra.mxu2 %vm51_vm0, %v2303_v38 }
0x218f   :  { %v2370_v56 = vpop.permute.xlu1 %2369 }
0x2190   :  { %2582 = vmatmul.msk.f32.vlgmr.msrb.gmra.mxu3 %vm51_vm0, %v2370_v56 }
0x21af   :  { %v2326_v48 = vpop.f32.mrf.mxu2 }
0x21b0   :  { %v2327_v60 = vadd.f32 %v3829_v12, %v2326_v48 }
0x21b2   :  { %2350 = vrot.lane.b32.xlu2 %v2327_v60, %s2840_s0  ;;  %v2329_v45 = vadd.f32 %v2327_v60, %v1322_v13 }
0x21b4   :  { %v2581_v31 = vmul.f32 -1.442695, %v2329_v45 }
0x21b6   :  { %2778 = vpow2.f32 %v2581_v31 }
0x21bc   :  { %v2779_v62 = vpop.eup %2778 }
0x21bd   :  { %v2333_v4 = vadd.f32 1.0, %v2779_v62 }
0x21bf   :  { %2780 = vrcp.f32 %v2333_v4  ;;  %v2345_v18 = vand.u32 2147483648, %v2333_v4  ;;  %vm2339_vm12 = vweird.f32 %v2333_v4  ;;  %v2343_v12 = vand.u32 2147483647, %v2333_v4 }
0x21c1   :  { %v2346_v20 = vor.u32 1.1754944e-38, %v2345_v18  ;;  %vm2344_vm14 = vcmp.eq.f32.partialorder %v2343_v12, 8.507059e+37 }
0x21c5   :  { %v2781_v63 = vpop.eup %2780 }
0x21c6   :  { %v2335_v0 = vmul.f32 %v2781_v63, %v2333_v4  ;;  %vm2340_vm11 = vweird.f32 %v2781_v63 }
0x21c7   :  { %vm2341_vm13 = vmor %vm2339_vm12, %vm2340_vm11 }
0x21c8   :  { %v2336_v9 = vsub.f32 1.0, %v2335_v0 }
0x21ca   :  { %v2337_v10 = vmul.f32 %v2781_v63, %v2336_v9 }
0x21cc   :  { %v2338_v15 = vadd.f32 %v2781_v63, %v2337_v10 }
0x21ce   :  { %v2342_v61 = vsel %vm2341_vm13, %v2781_v63, %v2338_v15 }
0x21cf   :  { %v2347_v2 = vsel %vm2344_vm14, %v2346_v20, %v2342_v61 }
0x21d0   :  { %v2360_v46 = vsub.f32 1.0, %v2347_v2  ;;  %v2366_v47 = vmul.f32 %v2347_v2, %v3857_v50 }
0x220c   :  { %v2351_v19 = vpop.permute.xlu2 %2350 }
0x220d   :  { %v2353_v37 = vmul.f32 %v2351_v19, %v2347_v2 }
0x220f   :  { %2355 = vrot.lane.b32.xlu1 %v2353_v37, %s2840_s0 }
0x2213   :  { %v2390_v3 = vpop.f32.mrf.mxu3 }
0x2214   :  { %v2391_v58 = vadd.f32 %v3842_v43, %v2390_v3 }
0x2216   :  { %2414 = vrot.lane.b32.xlu0 %v2391_v58, %s2840_s0  ;;  %v2393_v29 = vadd.f32 %v2391_v58, %v1356_v27 }
0x2218   :  { %v2583_v59 = vmul.f32 -1.442695, %v2393_v29 }
0x221a   :  { %2782 = vpow2.f32 %v2583_v59 }
0x2220   :  { %v2783_v5 = vpop.eup %2782 }
0x2221   :  { %v2397_v7 = vadd.f32 1.0, %v2783_v5 }
0x2223   :  { %2784 = vrcp.f32 %v2397_v7  ;;  %v2409_v43 = vand.u32 2147483648, %v2397_v7  ;;  %vm2403_vm1 = vweird.f32 %v2397_v7  ;;  %v2407_v36 = vand.u32 2147483647, %v2397_v7 }
0x2225   :  { %v2410_v41 = vor.u32 1.1754944e-38, %v2409_v43  ;;  %vm2408_vm3 = vcmp.eq.f32.partialorder %v2407_v36, 8.507059e+37 }
0x2229   :  { %v2785_v49 = vpop.eup %2784 }
0x222a   :  { %v2399_v34 = vmul.f32 %v2785_v49, %v2397_v7  ;;  %vm2404_vm15 = vweird.f32 %v2785_v49 }
0x222b   :  { %vm2405_vm2 = vmor %vm2403_vm1, %vm2404_vm15 }
0x222c   :  { %v2400_v11 = vsub.f32 1.0, %v2399_v34 }
0x222e   :  { %v2401_v26 = vmul.f32 %v2785_v49, %v2400_v11 }
0x2230   :  { %v2402_v32 = vadd.f32 %v2785_v49, %v2401_v26 }
0x2232   :  { %v2406_v21 = vsel %vm2405_vm2, %v2785_v49, %v2402_v32 }
0x2233   :  { %v2411_v55 = vsel %vm2408_vm3, %v2410_v41, %v2406_v21 }
0x2234   :  { %v2424_v33 = vsub.f32 1.0, %v2411_v55 }
0x2281   :  { %v2356_v14 = vpop.permute.xlu1 %2355 }
0x2282   :  { %v2358_v40 = vadd.f32 %v2356_v14, %v1322_v13 }
0x2284   :  { %2786 = vtanh.f32 %v2358_v40 }
0x2288   :  { %v2415_v22 = vpop.permute.xlu0 %2414 }
0x2289   :  { %v2417_v25 = vmul.f32 %v2415_v22, %v2411_v55 }
0x228a   :  { %v2787_v42 = vpop.eup %2786 }
0x228b   :  { %2419 = vrot.lane.b32.xlu2 %v2417_v25, %s2840_s0  ;;  %2362 = vrot.lane.b32.xlu0 %v2787_v42, %s2841_s28 }
0x2293   :  { %1233 = vrot.lane.b32.xlu2 %v3490_v17, %s2841_s28  ;;  %v2430_v17 = vmul.f32 %v2411_v55, %v3863_v16 }
0x22e5   :  { %v2420_v39 = vpop.permute.xlu2 %2419 }
0x22e6   :  { %v2422_v24 = vadd.f32 %v2420_v39, %v1356_v27 }
0x22e8   :  { %2788 = vtanh.f32 %v2422_v24 }
0x22ed   :  { %v1234_v23 = vpop.permute.xlu2 %1233 }
0x22ee   :  { %v2789_v1 = vpop.eup %2788  ;;  %1237 = vst.msk [vmem:[#allocation2 + $0x8] sm:$0xff] %vm51_vm0, %v1234_v23 }
0x22ef   :  { %2426 = vrot.lane.b32.xlu1 %v2789_v1, %s2841_s28 }
0x22fd   :  { %v2363_v8 = vpop.permute.xlu0 %2362 }
0x22fe   :  { %v2365_v28 = vmul.f32 %v2363_v8, %v2360_v46 }
0x2300   :  { %v2367_v51 = vadd.f32 %v2366_v47, %v2365_v28 }
0x2302   :  { %2433 = vrot.lane.b32.xlu0 %v2367_v51, %s2841_s28 }
0x2361   :  { %v2427_v52 = vpop.permute.xlu1 %2426 }
0x2362   :  { %v2429_v54 = vmul.f32 %v2427_v52, %v2424_v33 }
0x2364   :  { %v2431_v44 = vadd.f32 %v2430_v17, %v2429_v54 }
0x2366   :  { %2437 = vst.msk [vmem:[%s3918_s9] sm:$0xff] %vm312_vm9, %v2431_v44  ;;  %2441 = vrot.lane.b32.xlu1 %v2431_v44, %s2841_s28  ;;  %s2843_s28 = smov 128  }
0x2374   :  { %v2434_v57 = vpop.permute.xlu0 %2433 }
0x2375   :  { %2436 = vst.msk [vmem:[%s3918_s9 + $0x38] sm:$0xff] %vm51_vm0, %v2434_v57 }
0x2376   :  { %2439 = vst.msk [vmem:[#allocation2 + $0x10] sm:$0xff] %vm51_vm0, %v2434_v57 }
0x23d8   :  { %v2442_v50 = vpop.permute.xlu1 %2441 }
0x23d9   :  { %2445 = vst.msk [vmem:[#allocation2 + $0x18] sm:$0xff] %vm51_vm0, %v2442_v50 }
0x23da   :  { %2460 = dma.vmem_to_hbm [thread:$0]  %s2453_s24, 512, %s2455_s27, [#allocation3], %s2843_s28, %s2843_s28, %s2844_s1  }
0x23db   :  { %2837 = dma.done.wait [#allocation3], 512  }
0x23dc   :  { %2838 = vsyncadd [#allocation3], 4294966784 }
0x23dd   :  { %2467 = vsyncpa [#allocation3], 1 }

</bundles_post_ra>
